<compile_context>
chip_gen: v7x
topology: tpu7x:2x2x1
jax: 0.10.0
libtpu: 0.0.40
codegen_flags: <defaults>
</compile_context>

<pallas_src>
import functools

import jax
import jax.numpy as jnp
from jax.experimental import pallas as pl
from jax.experimental.pallas import tpu as pltpu

# ----------------------------- problem sizes --------------------------------
X_DIM = 8
N_INEQ = 8
N_DIM = X_DIM + N_INEQ            # primal + slack dimension (16)
NULL_DIM = N_DIM - N_INEQ         # null-space dimension (8)
PARM_DIM = X_DIM + N_INEQ         # parms = [q (x_dim) , b (n_ineq)]
HIDDEN = 10 * N_DIM               # 160 (ParametricDiagonal hidden width)
BATCH = 4
GAMMA = 2.0                       # ObjectiveConstraintComposition.gamma
NUM_STEPS = 3
INITIAL_STEPS = 1
INITIAL_LB_P, INITIAL_UB_P = 1e-8, 1e8
LB_P, UB_P = 1.0 / 5.0, 5.0
OUT_PAD = 128                     # lane-dense output slab width
SUBLANE = 8

F32 = jnp.float32
VMEM = pl.BlockSpec(memory_space=pltpu.MemorySpace.VMEM)
ANY = pl.BlockSpec(memory_space=pl.ANY)

# ---- packed-slab row offsets (every block start is a multiple of 8 sublanes) ----
# MLP "main" slabs (lanes = HIDDEN): rows = [W1 | b1(pad 8) | W2 | b2(pad 8)]
PM_B1 = PARM_DIM                      # 16
PM_W2 = PARM_DIM + 8                  # 24
PM_B2 = PARM_DIM + 8 + HIDDEN         # 184
PM_ROWS = PARM_DIM + 16 + HIDDEN      # 192
FP_IN = N_DIM + PARM_DIM              # 32
FP_B1 = FP_IN                         # 32
FP_W2 = FP_IN + 8                     # 40
FP_B2 = FP_IN + 8 + HIDDEN            # 200
FP_ROWS = FP_IN + 16 + HIDDEN         # 208
# 16-lane constant slab: solver constants + the three (W3, b3) heads
C16_MZETA, C16_ATFULL, C16_QRT, C16_QNT = 0, 8, 24, 32
C16_QR, C16_QN, C16_L, C16_U = 40, 56, 72, 80
C16_PM_W3, C16_PM_B3 = 88, 248
C16_FP_W3, C16_FP_B3 = 256, 416
C16_FM_W3, C16_FM_B3 = 424, 584
C16_ROWS = 592
# 128-lane constant slab: Khatri-Rao matrices + output selectors
C128_GR, C128_GN, C128_SELX, C128_SELG, C128_ROWS = 0, 16, 32, 48, 64


# ------------------------------ fused kernel ---------------------------------
def fused_forward_kernel(xp_ref, parms_ref, c16_ref, c128_ref,
                         pm_ref, fp_ref, fm_hbm_ref,
                         out_ref, fm_vmem, fm_sem):
    # Stage-3 MLP weights live in HBM (memory_space=pl.ANY): kick off their fetch now so
    # the DMA overlaps stage-1/2 compute instead of serialising in the kernel prologue.
    fm_copy = pltpu.make_async_copy(fm_hbm_ref, fm_vmem, fm_sem)
    fm_copy.start()

    xk = xp_ref[...]                       # (Bp, N_DIM): x already lifted to [x ; 0]
    parms = parms_ref[...]                 # (Bp, PARM_DIM)
    b_par = parms[:, X_DIM:]               # (Bp, N_INEQ)

    # ---- solver constants: static slices of one packed slab (single DMA) ----
    M_zeta = c16_ref[C16_MZETA:C16_MZETA + N_INEQ, :]          # (8, 16)
    ATfull = c16_ref[C16_ATFULL:C16_ATFULL + N_DIM, :]         # (16, 16)
    QrT = c16_ref[C16_QRT:C16_QRT + N_INEQ, :]                 # (8, 16)
    QnT = c16_ref[C16_QNT:C16_QNT + NULL_DIM, :]               # (8, 16)
    Qr = c16_ref[C16_QR:C16_QR + N_DIM, 0:N_INEQ]              # (16, 8)
    Qn = c16_ref[C16_QN:C16_QN + N_DIM, 0:NULL_DIM]            # (16, 8)
    l_vec = c16_ref[C16_L:C16_L + 1, :]                        # (1, 16)
    u_vec = c16_ref[C16_U:C16_U + 1, :]                        # (1, 16)
    Gr = c128_ref[C128_GR:C128_GR + N_DIM, 0:N_INEQ * N_INEQ]      # (16, 64)
    Gn = c128_ref[C128_GN:C128_GN + N_DIM, 0:NULL_DIM * NULL_DIM]  # (16, 64)
    sel_x = c128_ref[C128_SELX:C128_SELX + N_DIM, :]           # (16, 128)
    sel_g = c128_ref[C128_SELG:C128_SELG + N_DIM, :]           # (16, 128)

    # ---- lane masks: built ONCE (broadcast_in_dim is not CSE'd across uses) ----
    lane16 = jax.lax.broadcasted_iota(jnp.int32, (1, N_DIM), 1)
    mask_x = (lane16 < X_DIM).astype(F32)
    mask_s = 1.0 - mask_x
    lane8 = jax.lax.broadcasted_iota(jnp.int32, (1, N_INEQ), 1)
    lane_eq = [lane8 == k for k in range(N_INEQ)]              # GJ pivot-lane masks

    # ---- zeta hoist: J_F v - F(v) == b_par identically for this affine F ----
    zeta = jnp.dot(b_par, M_zeta, preferred_element_type=F32)  # (Bp, N_DIM)

    def mlp_tail(h1, W2, b2, W3, b3, lb, ub):
        """Tail of ParametricDiagonal: relu -> linear -> relu -> linear -> sigmoid."""
        h1 = jnp.maximum(h1, 0.0)
        h2 = jnp.maximum(jnp.dot(h1, W2, preferred_element_type=F32) + b2, 0.0)
        pd = jnp.dot(h2, W3, preferred_element_type=F32) + b3
        sig = pl.reciprocal(1.0 + jnp.exp(-pd), approx=False)  # exp on the EUP
        return lb + sig * (ub - lb)

    def gj_factor(all_cols, n):
        """Gauss-Jordan elimination of the SPD system (Q^T diag(p) Q); p > 0 so no
        pivoting. all_cols = p @ G holds every column; returns the per-step pivot
        columns / reciprocals so multiple rhs can be solved with gj_apply."""
        cols = [all_cols[:, j * n:(j + 1) * n] for j in range(n)]
        pivs = []
        for k in range(n):
            pivcol = cols[k]
            inv = 1.0 / pivcol[:, k:k + 1]
            pivs.append((pivcol, inv))
            for j in range(k + 1, n):                          # cols <= k never read again
                rkj = cols[j][:, k:k + 1] * inv
                cols[j] = jnp.where(lane_eq[k], rkj, cols[j] - pivcol * rkj)
        return pivs

    def gj_apply(pivs, rhs):
        """Apply the recorded row operations to one rhs -> solution of the SPD system."""
        y = rhs
        for k, (pivcol, inv) in enumerate(pivs):
            yk = y[:, k:k + 1] * inv
            y = jnp.where(lane_eq[k], yk, y - pivcol * yk)
        return y

    def box(xc):
        """BoxConstraint prox: y = l + relu(u - l - relu(u - x)); also v = 2y - x."""
        y = l_vec + jnp.maximum(u_vec - l_vec - jnp.maximum(u_vec - xc, 0.0), 0.0)
        return y, 2.0 * y - xc

    def dr_step(xc, pdiag, pivs):
        """One Douglas-Rachford step with a learned diagonal metric (zeta hoisted)."""
        y_k, v = box(xc)
        fg = (v + parms) * mask_x                              # grad f at v: [v_x + q ; 0]
        w = pdiag * (v - zeta) - (GAMMA * 0.5) * fg
        rhs = jnp.dot(w, Qn, preferred_element_type=F32)       # (Bp, NULL_DIM)
        zq = gj_apply(pivs, rhs)
        z_k = jnp.dot(zq, QnT, preferred_element_type=F32) + zeta
        gap = z_k - y_k
        return xc + gap, gap

    # ---- stage 1: initial learned-metric DR iterations (metric + factorisation hoisted) ----
    h1 = (jnp.dot(parms, pm_ref[0:PARM_DIM, :], preferred_element_type=F32)
          + pm_ref[PM_B1:PM_B1 + 1, :])
    pdiag1 = mlp_tail(h1, pm_ref[PM_W2:PM_W2 + HIDDEN, :], pm_ref[PM_B2:PM_B2 + 1, :],
                      c16_ref[C16_PM_W3:C16_PM_W3 + HIDDEN, :],
                      c16_ref[C16_PM_B3:C16_PM_B3 + 1, :],
                      INITIAL_LB_P, INITIAL_UB_P)
    pivs1 = gj_factor(jnp.dot(pdiag1, Gn, preferred_element_type=F32), NULL_DIM)
    for _ in range(INITIAL_STEPS):
        xk, _ = dr_step(xk, pdiag1, pivs1)

    # ---- stage 2: fixed-point-condition projection (ParametricStateDiagonal metric) ----
    # slacks = -(A x - b) written directly into the slack lanes (padded A^T, no concat)
    slacks = parms * mask_s - jnp.dot(xk, ATfull, preferred_element_type=F32)
    xfull = xk * mask_x + slacks                               # [x ; slacks]
    # first layer split so no lane concat is needed:
    # concat([xfull, parms]) @ W1 == xfull @ W1[:N_DIM] + parms @ W1[N_DIM:]
    h1 = (jnp.dot(xfull, fp_ref[0:N_DIM, :], preferred_element_type=F32)
          + jnp.dot(parms, fp_ref[N_DIM:FP_IN, :], preferred_element_type=F32)
          + fp_ref[FP_B1:FP_B1 + 1, :])
    pdiag2 = mlp_tail(h1, fp_ref[FP_W2:FP_W2 + HIDDEN, :], fp_ref[FP_B2:FP_B2 + 1, :],
                      c16_ref[C16_FP_W3:C16_FP_W3 + HIDDEN, :],
                      c16_ref[C16_FP_B3:C16_FP_B3 + 1, :],
                      INITIAL_LB_P, INITIAL_UB_P)
    s_plus = jnp.maximum(slacks, 0.0)                          # [0 ; relu(slacks)]
    grads = (GAMMA * 0.5) * (xk + parms) * mask_x              # gamma/2 * [x + q ; 0]
    eta = s_plus + grads
    u2 = xk * mask_x + jnp.abs(slacks) - eta                   # [x ; |slacks|] - eta
    w2 = pdiag2 * u2                                           # r == 0 here
    rhs2 = jnp.dot(w2, Qr, preferred_element_type=F32)         # (Bp, N_INEQ)
    pivs2 = gj_factor(jnp.dot(pdiag2, Gr, preferred_element_type=F32), N_INEQ)
    zq2 = gj_apply(pivs2, rhs2)
    z2 = jnp.dot(zq2, QrT, preferred_element_type=F32) + eta
    xk = z2 * (mask_x - mask_s) + 2.0 * s_plus                 # [z_x ; 2 relu(s) - z_s]

    # ---- stage 3: final learned-metric DR iterations ----
    fm_copy.wait()                                             # stage-3 weights now in VMEM
    h1 = (jnp.dot(parms, fm_vmem[0:PARM_DIM, :], preferred_element_type=F32)
          + fm_vmem[PM_B1:PM_B1 + 1, :])
    pdiag3 = mlp_tail(h1, fm_vmem[PM_W2:PM_W2 + HIDDEN, :], fm_vmem[PM_B2:PM_B2 + 1, :],
                      c16_ref[C16_FM_W3:C16_FM_W3 + HIDDEN, :],
                      c16_ref[C16_FM_B3:C16_FM_B3 + 1, :],
                      LB_P, UB_P)
    pivs3 = gj_factor(jnp.dot(pdiag3, Gn, preferred_element_type=F32), NULL_DIM)
    gap = jnp.zeros_like(xk)
    for _ in range(NUM_STEPS):
        xk, gap = dr_step(xk, pdiag3, pivs3)

    # ---- lane-dense output: one (Bp, 128) slab [x_out | cnv_gap | 0], one store ----
    out_ref[...] = (jnp.dot(xk, sel_x, preferred_element_type=F32)
                    + jnp.dot(gap, sel_g, preferred_element_type=F32))


def parametric_dr_forward(x, parms, packed):
    """Fused single-pallas_call forward; returns (x_out, cnv_gap)."""
    B = x.shape[0]
    b_pad = ((B + SUBLANE - 1) // SUBLANE) * SUBLANE
    # lift x -> [x ; 0] and pad batch to a full sublane tile in the wrapper (free)
    xp = jnp.zeros((b_pad, N_DIM), F32).at[:B, :X_DIM].set(x)
    pp = jnp.zeros((b_pad, PARM_DIM), F32).at[:B, :].set(parms)
    out = pl.pallas_call(
        fused_forward_kernel,
        out_shape=jax.ShapeDtypeStruct((b_pad, OUT_PAD), jnp.float32),
        in_specs=[VMEM, VMEM, VMEM, VMEM, VMEM, VMEM, ANY],
        out_specs=VMEM,
        scratch_shapes=[pltpu.VMEM((PM_ROWS, HIDDEN), jnp.float32),
                        pltpu.SemaphoreType.DMA],
    )(xp, pp, packed["c16"], packed["c128"], packed["pm"], packed["fp"], packed["fm"])
    return out[:B, :X_DIM], out[:B, X_DIM:X_DIM + N_DIM]


# --------------------- pure-JAX reference (for checking) --------------------
# Intentionally uses the UNhoisted zeta path, einsum-built qtpq and jnp.linalg.solve so
# that the in-kernel zeta hoist / Khatri-Rao build / Gauss-Jordan solve are validated
# against independent math.
def ref_mlp(inp, w, lb, ub):
    W1, b1, W2, b2, W3, b3 = w
    h = jnp.maximum(inp @ W1 + b1, 0.0)
    h = jnp.maximum(h @ W2 + b2, 0.0)
    return lb + jax.nn.sigmoid(h @ W3 + b3) * (ub - lb)


def ref_dr_step(x_k, parms, pdiag, C):
    l, u = C["l_vec"], C["u_vec"]
    B = x_k.shape[0]
    y_k = l + jnp.maximum(u - l - jnp.maximum(u - x_k, 0.0), 0.0)
    v = 2.0 * y_k - x_k
    Fv = v[:, :X_DIM] @ C["AT"] + v[:, X_DIM:] - parms[:, X_DIM:]
    Jv = v @ C["JFT"]
    zeta = ((Jv - Fv) @ C["RrT_inv_T"]) @ C["QrT"]
    fg = jnp.concatenate([v[:, :X_DIM] + parms[:, :X_DIM],
                          jnp.zeros((B, N_INEQ), jnp.float32)], axis=-1)
    u_val = v - zeta
    r = -(GAMMA / 2.0) * fg
    rhs = (pdiag * u_val + r) @ C["Qn"]
    qtpq = jnp.einsum("ni,bn,nj->bij", C["Qn"], pdiag, C["Qn"])
    zq = jnp.linalg.solve(qtpq, rhs[..., None])[..., 0]
    z_k = zq @ C["QnT"] + zeta
    gap = z_k - y_k
    return x_k + gap, gap


def ref_fixed_point(x, parms, fp_w, C):
    B = x.shape[0]
    slacks = -(x @ C["AT"] - parms[:, X_DIM:])
    mlp_in = jnp.concatenate([x, slacks, parms], axis=-1)
    pdiag = ref_mlp(mlp_in, fp_w, INITIAL_LB_P, INITIAL_UB_P)
    relu_s = jnp.maximum(slacks, 0.0)
    grads = (GAMMA / 2.0) * jnp.concatenate(
        [x + parms[:, :X_DIM], jnp.zeros((B, N_INEQ), jnp.float32)], axis=-1)
    eta = jnp.concatenate([jnp.zeros((B, X_DIM), jnp.float32), relu_s], axis=-1) + grads
    xabs = jnp.concatenate([x, jnp.abs(slacks)], axis=-1)
    u_val = xabs - eta
    rhs = (pdiag * u_val) @ C["Qr"]
    qtpq = jnp.einsum("ni,bn,nj->bij", C["Qr"], pdiag, C["Qr"])
    zq = jnp.linalg.solve(qtpq, rhs[..., None])[..., 0]
    z = zq @ C["QrT"] + eta
    new_slacks = 2.0 * relu_s - z[:, X_DIM:]
    return jnp.concatenate([z[:, :X_DIM], new_slacks], axis=-1)


def ref_forward(x, parms, params, C):
    pm_w, fp_w, fm_w, _A = params
    B = x.shape[0]
    x_k = jnp.concatenate([x, jnp.zeros((B, N_INEQ), jnp.float32)], axis=-1)
    pdiag1 = ref_mlp(parms, pm_w, INITIAL_LB_P, INITIAL_UB_P)
    for _ in range(INITIAL_STEPS):
        x_k, _ = ref_dr_step(x_k, parms, pdiag1, C)
    x_k = ref_fixed_point(x_k[:, :X_DIM], parms, fp_w, C)
    pdiag3 = ref_mlp(parms, fm_w, LB_P, UB_P)
    gap = None
    for _ in range(NUM_STEPS):
        x_k, gap = ref_dr_step(x_k, parms, pdiag3, C)
    return x_k[:, :X_DIM], gap


# ------------------------ deterministic parameter init -----------------------
def init_params(key):
    def linear(k, fan_in, fan_out):
        k1, k2 = jax.random.split(k)
        bound = 1.0 / jnp.sqrt(jnp.float32(fan_in))
        W = jax.random.uniform(k1, (fan_in, fan_out), jnp.float32, -bound, bound)
        b = jax.random.uniform(k2, (1, fan_out), jnp.float32, -bound, bound)
        return W, b

    keys = jax.random.split(key, 10)

    def mlp(ks, in_dim):
        W1, b1 = linear(ks[0], in_dim, HIDDEN)
        W2, b2 = linear(ks[1], HIDDEN, HIDDEN)
        W3, b3 = linear(ks[2], HIDDEN, N_DIM)
        return (W1, b1, W2, b2, W3, b3)

    pm_w = mlp(keys[0:3], PARM_DIM)                 # stage-1 ParametricDiagonal
    fp_w = mlp(keys[3:6], N_DIM + PARM_DIM)         # stage-2 ParametricStateDiagonal
    pm_final_w = mlp(keys[6:9], PARM_DIM)           # stage-3 ParametricDiagonal
    A = 0.5 * jax.random.normal(keys[9], (N_INEQ, X_DIM), jnp.float32)
    return pm_w, fp_w, pm_final_w, A


def build_constants(A):
    JF = jnp.concatenate([A, jnp.eye(N_INEQ, dtype=jnp.float32)], axis=1)  # (m, n_dim)
    # torch.linalg.qr(JF^T, mode='complete') — constant, done once on the host.
    Qc, Rc = jnp.linalg.qr(JF.T, mode="complete")
    Rr = Rc[:N_INEQ, :]
    Qr = Qc[:, :N_INEQ]                         # (n_dim, m)
    Qn = Qc[:, N_INEQ:]                         # (n_dim, n_dim - m)
    RrT_inv_T = jnp.linalg.inv(Rr.T).T          # rows @ this == Rr^-T @ cols
    M_zeta = RrT_inv_T @ Qr.T                   # zeta = b @ M_zeta (hoisted)
    l_vec = jnp.concatenate([-1000.0 * jnp.ones((1, X_DIM), jnp.float32),
                             jnp.zeros((1, N_INEQ), jnp.float32)], axis=1)
    u_vec = 1000.0 * jnp.ones((1, N_DIM), jnp.float32)
    ATfull = jnp.zeros((N_DIM, N_DIM), jnp.float32).at[:X_DIM, X_DIM:].set(A.T)
    # Khatri-Rao matrices: (p @ G)[b, j*n+i] == (Q^T diag(p_b) Q)[i, j]
    Gr = (Qr[:, :, None] * Qr[:, None, :]).reshape(N_DIM, N_INEQ * N_INEQ)
    Gn = (Qn[:, :, None] * Qn[:, None, :]).reshape(N_DIM, NULL_DIM * NULL_DIM)
    # output selectors: [x_out | cnv_gap | 0] in a 128-wide slab
    sel_x = jnp.zeros((N_DIM, OUT_PAD), jnp.float32).at[
        jnp.arange(X_DIM), jnp.arange(X_DIM)].set(1.0)
    sel_g = jnp.zeros((N_DIM, OUT_PAD), jnp.float32).at[
        jnp.arange(N_DIM), X_DIM + jnp.arange(N_DIM)].set(1.0)
    return dict(AT=A.T, ATfull=ATfull, JFT=JF.T, RrT_inv_T=RrT_inv_T, M_zeta=M_zeta,
                Qr=Qr, QrT=Qr.T, Qn=Qn, QnT=Qn.T, l_vec=l_vec, u_vec=u_vec,
                Gr=Gr, Gn=Gn, sel_x=sel_x, sel_g=sel_g)


def pack_inputs(params, C):
    """Pack the ~30 tiny weight/constant tensors into 5 lane-aligned f32 slabs."""
    pm_w, fp_w, fm_w, _A = params

    def mlp_main_slab(w):
        W1, b1, W2, b2, _W3, _b3 = w
        in_dim = W1.shape[0]
        rows = in_dim + 16 + HIDDEN
        s = jnp.zeros((rows, HIDDEN), jnp.float32)
        s = s.at[0:in_dim, :].set(W1)
        s = s.at[in_dim:in_dim + 1, :].set(b1)
        s = s.at[in_dim + 8:in_dim + 8 + HIDDEN, :].set(W2)
        s = s.at[in_dim + 8 + HIDDEN:in_dim + 9 + HIDDEN, :].set(b2)
        return s

    c16 = jnp.zeros((C16_ROWS, N_DIM), jnp.float32)
    c16 = c16.at[C16_MZETA:C16_MZETA + N_INEQ, :].set(C["M_zeta"])
    c16 = c16.at[C16_ATFULL:C16_ATFULL + N_DIM, :].set(C["ATfull"])
    c16 = c16.at[C16_QRT:C16_QRT + N_INEQ, :].set(C["QrT"])
    c16 = c16.at[C16_QNT:C16_QNT + NULL_DIM, :].set(C["QnT"])
    c16 = c16.at[C16_QR:C16_QR + N_DIM, 0:N_INEQ].set(C["Qr"])
    c16 = c16.at[C16_QN:C16_QN + N_DIM, 0:NULL_DIM].set(C["Qn"])
    c16 = c16.at[C16_L:C16_L + 1, :].set(C["l_vec"])
    c16 = c16.at[C16_U:C16_U + 1, :].set(C["u_vec"])
    for off_w3, off_b3, w in ((C16_PM_W3, C16_PM_B3, pm_w),
                              (C16_FP_W3, C16_FP_B3, fp_w),
                              (C16_FM_W3, C16_FM_B3, fm_w)):
        c16 = c16.at[off_w3:off_w3 + HIDDEN, :].set(w[4])
        c16 = c16.at[off_b3:off_b3 + 1, :].set(w[5])

    c128 = jnp.zeros((C128_ROWS, OUT_PAD), jnp.float32)
    c128 = c128.at[C128_GR:C128_GR + N_DIM, 0:N_INEQ * N_INEQ].set(C["Gr"])
    c128 = c128.at[C128_GN:C128_GN + N_DIM, 0:NULL_DIM * NULL_DIM].set(C["Gn"])
    c128 = c128.at[C128_SELX:C128_SELX + N_DIM, :].set(C["sel_x"])
    c128 = c128.at[C128_SELG:C128_SELG + N_DIM, :].set(C["sel_g"])

    return dict(c16=c16, c128=c128,
                pm=mlp_main_slab(pm_w), fp=mlp_main_slab(fp_w), fm=mlp_main_slab(fm_w))


# ----------------------------------- main ------------------------------------
if __name__ == "__main__":
    key = jax.random.PRNGKey(0)
    kp, kx, kparm = jax.random.split(key, 3)
    params = init_params(kp)
    C = build_constants(params[3])
    packed = pack_inputs(params, C)

    x = jax.random.normal(kx, (BATCH, X_DIM), jnp.float32)
    parms = jax.random.normal(kparm, (BATCH, PARM_DIM), jnp.float32)

    fwd = jax.jit(functools.partial(parametric_dr_forward, packed=packed))
    x_out, cnv_gap = fwd(x, parms)
    jax.block_until_ready((x_out, cnv_gap))

    # pure-JAX reference of the identical forward pass (unhoisted zeta, einsum qtpq,
    # jnp.linalg.solve) — independently validates the fused-kernel math.
    x_ref, cnv_ref = jax.jit(functools.partial(ref_forward, params=params, C=C))(x, parms)
    jax.block_until_ready((x_ref, cnv_ref))

    assert x_out.shape == (BATCH, X_DIM) and cnv_gap.shape == (BATCH, N_DIM)
    assert bool(jnp.all(jnp.isfinite(x_out))) and bool(jnp.all(jnp.isfinite(cnv_gap)))
    err = max(float(jnp.max(jnp.abs(x_out - x_ref))),
              float(jnp.max(jnp.abs(cnv_gap - cnv_ref))))
    scale = max(float(jnp.max(jnp.abs(x_ref))), float(jnp.max(jnp.abs(cnv_ref))), 1.0)
    assert err <= 5e-3 * scale + 5e-3, f"mismatch vs reference: {err} (scale {scale})"

    print("KERNEL_OK")
</pallas_src>

<mosaic_0001>
module attributes {stable_mosaic.version = 11 : i64} {
  func.func @fused_forward_kernel(%arg0: memref<8x16xf32, #tpu.memory_space<vmem>>, %arg1: memref<8x16xf32, #tpu.memory_space<vmem>>, %arg2: memref<592x16xf32, #tpu.memory_space<vmem>>, %arg3: memref<64x128xf32, #tpu.memory_space<vmem>>, %arg4: memref<192x160xf32, #tpu.memory_space<vmem>>, %arg5: memref<208x160xf32, #tpu.memory_space<vmem>>, %arg6: memref<192x160xf32, #tpu.memory_space<any>>, %arg7: memref<8x128xf32, #tpu.memory_space<vmem>>, %arg8: memref<192x160xf32, #tpu.memory_space<vmem>>, %arg9: memref<!tpu.dma_semaphore, #tpu.memory_space<semaphore_mem>>) attributes {dimension_semantics = [], scalar_prefetch = 0 : i64, scratch_operands = 2 : i64, tpu.core_type = #tpu.core_type<tc>} {
    tpu.enqueue_dma source(%arg6 : memref<192x160xf32, #tpu.memory_space<any>>) target(%arg8 : memref<192x160xf32, #tpu.memory_space<vmem>>) target_semaphore(%arg9 : memref<!tpu.dma_semaphore, #tpu.memory_space<semaphore_mem>>)
    %c0 = arith.constant 0 : index
    %c0_0 = arith.constant 0 : index
    %0 = vector.load %arg0[%c0, %c0_0] : memref<8x16xf32, #tpu.memory_space<vmem>>, vector<8x16xf32>
    %c0_1 = arith.constant 0 : index
    %c0_2 = arith.constant 0 : index
    %1 = vector.load %arg1[%c0_1, %c0_2] : memref<8x16xf32, #tpu.memory_space<vmem>>, vector<8x16xf32>
    %2 = vector.extract_strided_slice %1 {offsets = [0, 8], sizes = [8, 8], strides = [1, 1]} : vector<8x16xf32> to vector<8x8xf32>
    %c0_3 = arith.constant 0 : index
    %c0_4 = arith.constant 0 : index
    %3 = vector.load %arg2[%c0_3, %c0_4] : memref<592x16xf32, #tpu.memory_space<vmem>>, vector<8x16xf32>
    %c8 = arith.constant 8 : index
    %c0_5 = arith.constant 0 : index
    %4 = vector.load %arg2[%c8, %c0_5] : memref<592x16xf32, #tpu.memory_space<vmem>>, vector<16x16xf32>
    %c24 = arith.constant 24 : index
    %c0_6 = arith.constant 0 : index
    %5 = vector.load %arg2[%c24, %c0_6] : memref<592x16xf32, #tpu.memory_space<vmem>>, vector<8x16xf32>
    %c32 = arith.constant 32 : index
    %c0_7 = arith.constant 0 : index
    %6 = vector.load %arg2[%c32, %c0_7] : memref<592x16xf32, #tpu.memory_space<vmem>>, vector<8x16xf32>
    %c40 = arith.constant 40 : index
    %c0_8 = arith.constant 0 : index
    %7 = vector.load %arg2[%c40, %c0_8] : memref<592x16xf32, #tpu.memory_space<vmem>>, vector<16x8xf32>
    %c56 = arith.constant 56 : index
    %c0_9 = arith.constant 0 : index
    %8 = vector.load %arg2[%c56, %c0_9] : memref<592x16xf32, #tpu.memory_space<vmem>>, vector<16x8xf32>
    %c72 = arith.constant 72 : index
    %c0_10 = arith.constant 0 : index
    %9 = vector.load %arg2[%c72, %c0_10] : memref<592x16xf32, #tpu.memory_space<vmem>>, vector<1x16xf32>
    %c80 = arith.constant 80 : index
    %c0_11 = arith.constant 0 : index
    %10 = vector.load %arg2[%c80, %c0_11] : memref<592x16xf32, #tpu.memory_space<vmem>>, vector<1x16xf32>
    %c0_12 = arith.constant 0 : index
    %c0_13 = arith.constant 0 : index
    %11 = vector.load %arg3[%c0_12, %c0_13] : memref<64x128xf32, #tpu.memory_space<vmem>>, vector<16x64xf32>
    %c16 = arith.constant 16 : index
    %c0_14 = arith.constant 0 : index
    %12 = vector.load %arg3[%c16, %c0_14] : memref<64x128xf32, #tpu.memory_space<vmem>>, vector<16x64xf32>
    %c32_15 = arith.constant 32 : index
    %c0_16 = arith.constant 0 : index
    %13 = vector.load %arg3[%c32_15, %c0_16] : memref<64x128xf32, #tpu.memory_space<vmem>>, vector<16x128xf32>
    %c48 = arith.constant 48 : index
    %c0_17 = arith.constant 0 : index
    %14 = vector.load %arg3[%c48, %c0_17] : memref<64x128xf32, #tpu.memory_space<vmem>>, vector<16x128xf32>
    %15 = tpu.iota {dimensions = array<i32: 1>} : vector<1x16xi32>
    %c8_i32 = arith.constant 8 : i32
    %16 = vector.broadcast %c8_i32 : i32 to vector<1x16xi32>
    %17 = arith.cmpi slt, %15, %16 : vector<1x16xi32>
    %18 = arith.extui %17 : vector<1x16xi1> to vector<1x16xi32>
    %19 = arith.sitofp %18 : vector<1x16xi32> to vector<1x16xf32>
    %cst = arith.constant 1.000000e+00 : f32
    %20 = vector.broadcast %cst : f32 to vector<1x16xf32>
    %21 = arith.subf %20, %19 : vector<1x16xf32>
    %22 = tpu.iota {dimensions = array<i32: 1>} : vector<1x8xi32>
    %c0_i32 = arith.constant 0 : i32
    %23 = vector.broadcast %c0_i32 : i32 to vector<1x8xi32>
    %24 = arith.cmpi eq, %22, %23 : vector<1x8xi32>
    %c1_i32 = arith.constant 1 : i32
    %25 = vector.broadcast %c1_i32 : i32 to vector<1x8xi32>
    %26 = arith.cmpi eq, %22, %25 : vector<1x8xi32>
    %c2_i32 = arith.constant 2 : i32
    %27 = vector.broadcast %c2_i32 : i32 to vector<1x8xi32>
    %28 = arith.cmpi eq, %22, %27 : vector<1x8xi32>
    %c3_i32 = arith.constant 3 : i32
    %29 = vector.broadcast %c3_i32 : i32 to vector<1x8xi32>
    %30 = arith.cmpi eq, %22, %29 : vector<1x8xi32>
    %c4_i32 = arith.constant 4 : i32
    %31 = vector.broadcast %c4_i32 : i32 to vector<1x8xi32>
    %32 = arith.cmpi eq, %22, %31 : vector<1x8xi32>
    %c5_i32 = arith.constant 5 : i32
    %33 = vector.broadcast %c5_i32 : i32 to vector<1x8xi32>
    %34 = arith.cmpi eq, %22, %33 : vector<1x8xi32>
    %c6_i32 = arith.constant 6 : i32
    %35 = vector.broadcast %c6_i32 : i32 to vector<1x8xi32>
    %36 = arith.cmpi eq, %22, %35 : vector<1x8xi32>
    %c7_i32 = arith.constant 7 : i32
    %37 = vector.broadcast %c7_i32 : i32 to vector<1x8xi32>
    %38 = arith.cmpi eq, %22, %37 : vector<1x8xi32>
    %cst_18 = arith.constant dense<0.000000e+00> : vector<8x16xf32>
    %39 = tpu.matmul %2, %3, %cst_18 {dimension_numbers = #tpu.dot_dimension_numbers<[1], [0], [0], [1], [0, 0, 1, 1], [], []>} : vector<8x8xf32>, vector<8x16xf32>, vector<8x16xf32> -> vector<8x16xf32>
    %c0_19 = arith.constant 0 : index
    %c0_20 = arith.constant 0 : index
    %40 = vector.load %arg4[%c0_19, %c0_20] : memref<192x160xf32, #tpu.memory_space<vmem>>, vector<16x160xf32>
    %cst_21 = arith.constant dense<0.000000e+00> : vector<8x160xf32>
    %41 = tpu.matmul %1, %40, %cst_21 {dimension_numbers = #tpu.dot_dimension_numbers<[1], [0], [0], [1], [0, 0, 1, 1], [], []>} : vector<8x16xf32>, vector<16x160xf32>, vector<8x160xf32> -> vector<8x160xf32>
    %c16_22 = arith.constant 16 : index
    %c0_23 = arith.constant 0 : index
    %42 = vector.load %arg4[%c16_22, %c0_23] : memref<192x160xf32, #tpu.memory_space<vmem>>, vector<1x160xf32>
    %43 = vector.broadcast %42 : vector<1x160xf32> to vector<8x160xf32>
    %44 = arith.addf %41, %43 : vector<8x160xf32>
    %c24_24 = arith.constant 24 : index
    %c0_25 = arith.constant 0 : index
    %45 = vector.load %arg4[%c24_24, %c0_25] : memref<192x160xf32, #tpu.memory_space<vmem>>, vector<160x160xf32>
    %c184 = arith.constant 184 : index
    %c0_26 = arith.constant 0 : index
    %46 = vector.load %arg4[%c184, %c0_26] : memref<192x160xf32, #tpu.memory_space<vmem>>, vector<1x160xf32>
    %c88 = arith.constant 88 : index
    %c0_27 = arith.constant 0 : index
    %47 = vector.load %arg2[%c88, %c0_27] : memref<592x16xf32, #tpu.memory_space<vmem>>, vector<160x16xf32>
    %c248 = arith.constant 248 : index
    %c0_28 = arith.constant 0 : index
    %48 = vector.load %arg2[%c248, %c0_28] : memref<592x16xf32, #tpu.memory_space<vmem>>, vector<1x16xf32>
    %cst_29 = arith.constant 0.000000e+00 : f32
    %49 = vector.broadcast %cst_29 : f32 to vector<8x160xf32>
    %50 = arith.maximumf %44, %49 : vector<8x160xf32>
    %cst_30 = arith.constant dense<0.000000e+00> : vector<8x160xf32>
    %51 = tpu.matmul %50, %45, %cst_30 {dimension_numbers = #tpu.dot_dimension_numbers<[1], [0], [0], [1], [0, 0, 1, 1], [], []>} : vector<8x160xf32>, vector<160x160xf32>, vector<8x160xf32> -> vector<8x160xf32>
    %52 = vector.broadcast %46 : vector<1x160xf32> to vector<8x160xf32>
    %53 = arith.addf %51, %52 : vector<8x160xf32>
    %cst_31 = arith.constant 0.000000e+00 : f32
    %54 = vector.broadcast %cst_31 : f32 to vector<8x160xf32>
    %55 = arith.maximumf %53, %54 : vector<8x160xf32>
    %cst_32 = arith.constant dense<0.000000e+00> : vector<8x16xf32>
    %56 = tpu.matmul %55, %47, %cst_32 {dimension_numbers = #tpu.dot_dimension_numbers<[1], [0], [0], [1], [0, 0, 1, 1], [], []>} : vector<8x160xf32>, vector<160x16xf32>, vector<8x16xf32> -> vector<8x16xf32>
    %57 = vector.broadcast %48 : vector<1x16xf32> to vector<8x16xf32>
    %58 = arith.addf %56, %57 : vector<8x16xf32>
    %cst_33 = arith.constant 0.000000e+00 : f32
    %59 = vector.broadcast %cst_33 : f32 to vector<8x16xf32>
    %60 = arith.subf %59, %58 : vector<8x16xf32>
    %61 = math.exp %60 : vector<8x16xf32>
    %cst_34 = arith.constant 1.000000e+00 : f32
    %62 = vector.broadcast %cst_34 : f32 to vector<8x16xf32>
    %63 = arith.addf %62, %61 : vector<8x16xf32>
    %64 = tpu.reciprocal %63 : vector<8x16xf32> -> vector<8x16xf32>
    %cst_35 = arith.constant 1.000000e+08 : f32
    %65 = vector.broadcast %cst_35 : f32 to vector<8x16xf32>
    %66 = arith.mulf %64, %65 : vector<8x16xf32>
    %cst_36 = arith.constant 9.99999993E-9 : f32
    %67 = vector.broadcast %cst_36 : f32 to vector<8x16xf32>
    %68 = arith.addf %67, %66 : vector<8x16xf32>
    %cst_37 = arith.constant dense<0.000000e+00> : vector<8x64xf32>
    %69 = tpu.matmul %68, %12, %cst_37 {dimension_numbers = #tpu.dot_dimension_numbers<[1], [0], [0], [1], [0, 0, 1, 1], [], []>} : vector<8x16xf32>, vector<16x64xf32>, vector<8x64xf32> -> vector<8x64xf32>
    %70 = vector.extract_strided_slice %69 {offsets = [0, 0], sizes = [8, 8], strides = [1, 1]} : vector<8x64xf32> to vector<8x8xf32>
    %71 = vector.extract_strided_slice %69 {offsets = [0, 8], sizes = [8, 8], strides = [1, 1]} : vector<8x64xf32> to vector<8x8xf32>
    %72 = vector.extract_strided_slice %69 {offsets = [0, 16], sizes = [8, 8], strides = [1, 1]} : vector<8x64xf32> to vector<8x8xf32>
    %73 = vector.extract_strided_slice %69 {offsets = [0, 24], sizes = [8, 8], strides = [1, 1]} : vector<8x64xf32> to vector<8x8xf32>
    %74 = vector.extract_strided_slice %69 {offsets = [0, 32], sizes = [8, 8], strides = [1, 1]} : vector<8x64xf32> to vector<8x8xf32>
    %75 = vector.extract_strided_slice %69 {offsets = [0, 40], sizes = [8, 8], strides = [1, 1]} : vector<8x64xf32> to vector<8x8xf32>
    %76 = vector.extract_strided_slice %69 {offsets = [0, 48], sizes = [8, 8], strides = [1, 1]} : vector<8x64xf32> to vector<8x8xf32>
    %77 = vector.extract_strided_slice %69 {offsets = [0, 56], sizes = [8, 8], strides = [1, 1]} : vector<8x64xf32> to vector<8x8xf32>
    %78 = vector.extract_strided_slice %70 {offsets = [0, 0], sizes = [8, 1], strides = [1, 1]} : vector<8x8xf32> to vector<8x1xf32>
    %cst_38 = arith.constant 1.000000e+00 : f32
    %79 = vector.broadcast %cst_38 : f32 to vector<8x1xf32>
    %80 = arith.divf %79, %78 : vector<8x1xf32>
    %81 = vector.extract_strided_slice %71 {offsets = [0, 0], sizes = [8, 1], strides = [1, 1]} : vector<8x8xf32> to vector<8x1xf32>
    %82 = arith.mulf %81, %80 : vector<8x1xf32>
    %83 = vector.broadcast %82 : vector<8x1xf32> to vector<8x8xf32>
    %84 = arith.mulf %70, %83 : vector<8x8xf32>
    %85 = arith.subf %71, %84 : vector<8x8xf32>
    %86 = vector.shape_cast %24 : vector<1x8xi1> to vector<1x8xi1>
    %87 = vector.broadcast %86 : vector<1x8xi1> to vector<8x8xi1>
    %88 = vector.shape_cast %82 : vector<8x1xf32> to vector<8x1xf32>
    %89 = vector.broadcast %88 : vector<8x1xf32> to vector<8x8xf32>
    %90 = arith.select %87, %89, %85 : vector<8x8xi1>, vector<8x8xf32>
    %91 = vector.extract_strided_slice %72 {offsets = [0, 0], sizes = [8, 1], strides = [1, 1]} : vector<8x8xf32> to vector<8x1xf32>
    %92 = arith.mulf %91, %80 : vector<8x1xf32>
    %93 = vector.broadcast %92 : vector<8x1xf32> to vector<8x8xf32>
    %94 = arith.mulf %70, %93 : vector<8x8xf32>
    %95 = arith.subf %72, %94 : vector<8x8xf32>
    %96 = vector.shape_cast %24 : vector<1x8xi1> to vector<1x8xi1>
    %97 = vector.broadcast %96 : vector<1x8xi1> to vector<8x8xi1>
    %98 = vector.shape_cast %92 : vector<8x1xf32> to vector<8x1xf32>
    %99 = vector.broadcast %98 : vector<8x1xf32> to vector<8x8xf32>
    %100 = arith.select %97, %99, %95 : vector<8x8xi1>, vector<8x8xf32>
    %101 = vector.extract_strided_slice %73 {offsets = [0, 0], sizes = [8, 1], strides = [1, 1]} : vector<8x8xf32> to vector<8x1xf32>
    %102 = arith.mulf %101, %80 : vector<8x1xf32>
    %103 = vector.broadcast %102 : vector<8x1xf32> to vector<8x8xf32>
    %104 = arith.mulf %70, %103 : vector<8x8xf32>
    %105 = arith.subf %73, %104 : vector<8x8xf32>
    %106 = vector.shape_cast %24 : vector<1x8xi1> to vector<1x8xi1>
    %107 = vector.broadcast %106 : vector<1x8xi1> to vector<8x8xi1>
    %108 = vector.shape_cast %102 : vector<8x1xf32> to vector<8x1xf32>
    %109 = vector.broadcast %108 : vector<8x1xf32> to vector<8x8xf32>
    %110 = arith.select %107, %109, %105 : vector<8x8xi1>, vector<8x8xf32>
    %111 = vector.extract_strided_slice %74 {offsets = [0, 0], sizes = [8, 1], strides = [1, 1]} : vector<8x8xf32> to vector<8x1xf32>
    %112 = arith.mulf %111, %80 : vector<8x1xf32>
    %113 = vector.broadcast %112 : vector<8x1xf32> to vector<8x8xf32>
    %114 = arith.mulf %70, %113 : vector<8x8xf32>
    %115 = arith.subf %74, %114 : vector<8x8xf32>
    %116 = vector.shape_cast %24 : vector<1x8xi1> to vector<1x8xi1>
    %117 = vector.broadcast %116 : vector<1x8xi1> to vector<8x8xi1>
    %118 = vector.shape_cast %112 : vector<8x1xf32> to vector<8x1xf32>
    %119 = vector.broadcast %118 : vector<8x1xf32> to vector<8x8xf32>
    %120 = arith.select %117, %119, %115 : vector<8x8xi1>, vector<8x8xf32>
    %121 = vector.extract_strided_slice %75 {offsets = [0, 0], sizes = [8, 1], strides = [1, 1]} : vector<8x8xf32> to vector<8x1xf32>
    %122 = arith.mulf %121, %80 : vector<8x1xf32>
    %123 = vector.broadcast %122 : vector<8x1xf32> to vector<8x8xf32>
    %124 = arith.mulf %70, %123 : vector<8x8xf32>
    %125 = arith.subf %75, %124 : vector<8x8xf32>
    %126 = vector.shape_cast %24 : vector<1x8xi1> to vector<1x8xi1>
    %127 = vector.broadcast %126 : vector<1x8xi1> to vector<8x8xi1>
    %128 = vector.shape_cast %122 : vector<8x1xf32> to vector<8x1xf32>
    %129 = vector.broadcast %128 : vector<8x1xf32> to vector<8x8xf32>
    %130 = arith.select %127, %129, %125 : vector<8x8xi1>, vector<8x8xf32>
    %131 = vector.extract_strided_slice %76 {offsets = [0, 0], sizes = [8, 1], strides = [1, 1]} : vector<8x8xf32> to vector<8x1xf32>
    %132 = arith.mulf %131, %80 : vector<8x1xf32>
    %133 = vector.broadcast %132 : vector<8x1xf32> to vector<8x8xf32>
    %134 = arith.mulf %70, %133 : vector<8x8xf32>
    %135 = arith.subf %76, %134 : vector<8x8xf32>
    %136 = vector.shape_cast %24 : vector<1x8xi1> to vector<1x8xi1>
    %137 = vector.broadcast %136 : vector<1x8xi1> to vector<8x8xi1>
    %138 = vector.shape_cast %132 : vector<8x1xf32> to vector<8x1xf32>
    %139 = vector.broadcast %138 : vector<8x1xf32> to vector<8x8xf32>
    %140 = arith.select %137, %139, %135 : vector<8x8xi1>, vector<8x8xf32>
    %141 = vector.extract_strided_slice %77 {offsets = [0, 0], sizes = [8, 1], strides = [1, 1]} : vector<8x8xf32> to vector<8x1xf32>
    %142 = arith.mulf %141, %80 : vector<8x1xf32>
    %143 = vector.broadcast %142 : vector<8x1xf32> to vector<8x8xf32>
    %144 = arith.mulf %70, %143 : vector<8x8xf32>
    %145 = arith.subf %77, %144 : vector<8x8xf32>
    %146 = vector.shape_cast %24 : vector<1x8xi1> to vector<1x8xi1>
    %147 = vector.broadcast %146 : vector<1x8xi1> to vector<8x8xi1>
    %148 = vector.shape_cast %142 : vector<8x1xf32> to vector<8x1xf32>
    %149 = vector.broadcast %148 : vector<8x1xf32> to vector<8x8xf32>
    %150 = arith.select %147, %149, %145 : vector<8x8xi1>, vector<8x8xf32>
    %151 = vector.extract_strided_slice %90 {offsets = [0, 1], sizes = [8, 1], strides = [1, 1]} : vector<8x8xf32> to vector<8x1xf32>
    %cst_39 = arith.constant 1.000000e+00 : f32
    %152 = vector.broadcast %cst_39 : f32 to vector<8x1xf32>
    %153 = arith.divf %152, %151 : vector<8x1xf32>
    %154 = vector.extract_strided_slice %100 {offsets = [0, 1], sizes = [8, 1], strides = [1, 1]} : vector<8x8xf32> to vector<8x1xf32>
    %155 = arith.mulf %154, %153 : vector<8x1xf32>
    %156 = vector.broadcast %155 : vector<8x1xf32> to vector<8x8xf32>
    %157 = arith.mulf %90, %156 : vector<8x8xf32>
    %158 = arith.subf %100, %157 : vector<8x8xf32>
    %159 = vector.shape_cast %26 : vector<1x8xi1> to vector<1x8xi1>
    %160 = vector.broadcast %159 : vector<1x8xi1> to vector<8x8xi1>
    %161 = vector.shape_cast %155 : vector<8x1xf32> to vector<8x1xf32>
    %162 = vector.broadcast %161 : vector<8x1xf32> to vector<8x8xf32>
    %163 = arith.select %160, %162, %158 : vector<8x8xi1>, vector<8x8xf32>
    %164 = vector.extract_strided_slice %110 {offsets = [0, 1], sizes = [8, 1], strides = [1, 1]} : vector<8x8xf32> to vector<8x1xf32>
    %165 = arith.mulf %164, %153 : vector<8x1xf32>
    %166 = vector.broadcast %165 : vector<8x1xf32> to vector<8x8xf32>
    %167 = arith.mulf %90, %166 : vector<8x8xf32>
    %168 = arith.subf %110, %167 : vector<8x8xf32>
    %169 = vector.shape_cast %26 : vector<1x8xi1> to vector<1x8xi1>
    %170 = vector.broadcast %169 : vector<1x8xi1> to vector<8x8xi1>
    %171 = vector.shape_cast %165 : vector<8x1xf32> to vector<8x1xf32>
    %172 = vector.broadcast %171 : vector<8x1xf32> to vector<8x8xf32>
    %173 = arith.select %170, %172, %168 : vector<8x8xi1>, vector<8x8xf32>
    %174 = vector.extract_strided_slice %120 {offsets = [0, 1], sizes = [8, 1], strides = [1, 1]} : vector<8x8xf32> to vector<8x1xf32>
    %175 = arith.mulf %174, %153 : vector<8x1xf32>
    %176 = vector.broadcast %175 : vector<8x1xf32> to vector<8x8xf32>
    %177 = arith.mulf %90, %176 : vector<8x8xf32>
    %178 = arith.subf %120, %177 : vector<8x8xf32>
    %179 = vector.shape_cast %26 : vector<1x8xi1> to vector<1x8xi1>
    %180 = vector.broadcast %179 : vector<1x8xi1> to vector<8x8xi1>
    %181 = vector.shape_cast %175 : vector<8x1xf32> to vector<8x1xf32>
    %182 = vector.broadcast %181 : vector<8x1xf32> to vector<8x8xf32>
    %183 = arith.select %180, %182, %178 : vector<8x8xi1>, vector<8x8xf32>
    %184 = vector.extract_strided_slice %130 {offsets = [0, 1], sizes = [8, 1], strides = [1, 1]} : vector<8x8xf32> to vector<8x1xf32>
    %185 = arith.mulf %184, %153 : vector<8x1xf32>
    %186 = vector.broadcast %185 : vector<8x1xf32> to vector<8x8xf32>
    %187 = arith.mulf %90, %186 : vector<8x8xf32>
    %188 = arith.subf %130, %187 : vector<8x8xf32>
    %189 = vector.shape_cast %26 : vector<1x8xi1> to vector<1x8xi1>
    %190 = vector.broadcast %189 : vector<1x8xi1> to vector<8x8xi1>
    %191 = vector.shape_cast %185 : vector<8x1xf32> to vector<8x1xf32>
    %192 = vector.broadcast %191 : vector<8x1xf32> to vector<8x8xf32>
    %193 = arith.select %190, %192, %188 : vector<8x8xi1>, vector<8x8xf32>
    %194 = vector.extract_strided_slice %140 {offsets = [0, 1], sizes = [8, 1], strides = [1, 1]} : vector<8x8xf32> to vector<8x1xf32>
    %195 = arith.mulf %194, %153 : vector<8x1xf32>
    %196 = vector.broadcast %195 : vector<8x1xf32> to vector<8x8xf32>
    %197 = arith.mulf %90, %196 : vector<8x8xf32>
    %198 = arith.subf %140, %197 : vector<8x8xf32>
    %199 = vector.shape_cast %26 : vector<1x8xi1> to vector<1x8xi1>
    %200 = vector.broadcast %199 : vector<1x8xi1> to vector<8x8xi1>
    %201 = vector.shape_cast %195 : vector<8x1xf32> to vector<8x1xf32>
    %202 = vector.broadcast %201 : vector<8x1xf32> to vector<8x8xf32>
    %203 = arith.select %200, %202, %198 : vector<8x8xi1>, vector<8x8xf32>
    %204 = vector.extract_strided_slice %150 {offsets = [0, 1], sizes = [8, 1], strides = [1, 1]} : vector<8x8xf32> to vector<8x1xf32>
    %205 = arith.mulf %204, %153 : vector<8x1xf32>
    %206 = vector.broadcast %205 : vector<8x1xf32> to vector<8x8xf32>
    %207 = arith.mulf %90, %206 : vector<8x8xf32>
    %208 = arith.subf %150, %207 : vector<8x8xf32>
    %209 = vector.shape_cast %26 : vector<1x8xi1> to vector<1x8xi1>
    %210 = vector.broadcast %209 : vector<1x8xi1> to vector<8x8xi1>
    %211 = vector.shape_cast %205 : vector<8x1xf32> to vector<8x1xf32>
    %212 = vector.broadcast %211 : vector<8x1xf32> to vector<8x8xf32>
    %213 = arith.select %210, %212, %208 : vector<8x8xi1>, vector<8x8xf32>
    %214 = vector.extract_strided_slice %163 {offsets = [0, 2], sizes = [8, 1], strides = [1, 1]} : vector<8x8xf32> to vector<8x1xf32>
    %cst_40 = arith.constant 1.000000e+00 : f32
    %215 = vector.broadcast %cst_40 : f32 to vector<8x1xf32>
    %216 = arith.divf %215, %214 : vector<8x1xf32>
    %217 = vector.extract_strided_slice %173 {offsets = [0, 2], sizes = [8, 1], strides = [1, 1]} : vector<8x8xf32> to vector<8x1xf32>
    %218 = arith.mulf %217, %216 : vector<8x1xf32>
    %219 = vector.broadcast %218 : vector<8x1xf32> to vector<8x8xf32>
    %220 = arith.mulf %163, %219 : vector<8x8xf32>
    %221 = arith.subf %173, %220 : vector<8x8xf32>
    %222 = vector.shape_cast %28 : vector<1x8xi1> to vector<1x8xi1>
    %223 = vector.broadcast %222 : vector<1x8xi1> to vector<8x8xi1>
    %224 = vector.shape_cast %218 : vector<8x1xf32> to vector<8x1xf32>
    %225 = vector.broadcast %224 : vector<8x1xf32> to vector<8x8xf32>
    %226 = arith.select %223, %225, %221 : vector<8x8xi1>, vector<8x8xf32>
    %227 = vector.extract_strided_slice %183 {offsets = [0, 2], sizes = [8, 1], strides = [1, 1]} : vector<8x8xf32> to vector<8x1xf32>
    %228 = arith.mulf %227, %216 : vector<8x1xf32>
    %229 = vector.broadcast %228 : vector<8x1xf32> to vector<8x8xf32>
    %230 = arith.mulf %163, %229 : vector<8x8xf32>
    %231 = arith.subf %183, %230 : vector<8x8xf32>
    %232 = vector.shape_cast %28 : vector<1x8xi1> to vector<1x8xi1>
    %233 = vector.broadcast %232 : vector<1x8xi1> to vector<8x8xi1>
    %234 = vector.shape_cast %228 : vector<8x1xf32> to vector<8x1xf32>
    %235 = vector.broadcast %234 : vector<8x1xf32> to vector<8x8xf32>
    %236 = arith.select %233, %235, %231 : vector<8x8xi1>, vector<8x8xf32>
    %237 = vector.extract_strided_slice %193 {offsets = [0, 2], sizes = [8, 1], strides = [1, 1]} : vector<8x8xf32> to vector<8x1xf32>
    %238 = arith.mulf %237, %216 : vector<8x1xf32>
    %239 = vector.broadcast %238 : vector<8x1xf32> to vector<8x8xf32>
    %240 = arith.mulf %163, %239 : vector<8x8xf32>
    %241 = arith.subf %193, %240 : vector<8x8xf32>
    %242 = vector.shape_cast %28 : vector<1x8xi1> to vector<1x8xi1>
    %243 = vector.broadcast %242 : vector<1x8xi1> to vector<8x8xi1>
    %244 = vector.shape_cast %238 : vector<8x1xf32> to vector<8x1xf32>
    %245 = vector.broadcast %244 : vector<8x1xf32> to vector<8x8xf32>
    %246 = arith.select %243, %245, %241 : vector<8x8xi1>, vector<8x8xf32>
    %247 = vector.extract_strided_slice %203 {offsets = [0, 2], sizes = [8, 1], strides = [1, 1]} : vector<8x8xf32> to vector<8x1xf32>
    %248 = arith.mulf %247, %216 : vector<8x1xf32>
    %249 = vector.broadcast %248 : vector<8x1xf32> to vector<8x8xf32>
    %250 = arith.mulf %163, %249 : vector<8x8xf32>
    %251 = arith.subf %203, %250 : vector<8x8xf32>
    %252 = vector.shape_cast %28 : vector<1x8xi1> to vector<1x8xi1>
    %253 = vector.broadcast %252 : vector<1x8xi1> to vector<8x8xi1>
    %254 = vector.shape_cast %248 : vector<8x1xf32> to vector<8x1xf32>
    %255 = vector.broadcast %254 : vector<8x1xf32> to vector<8x8xf32>
    %256 = arith.select %253, %255, %251 : vector<8x8xi1>, vector<8x8xf32>
    %257 = vector.extract_strided_slice %213 {offsets = [0, 2], sizes = [8, 1], strides = [1, 1]} : vector<8x8xf32> to vector<8x1xf32>
    %258 = arith.mulf %257, %216 : vector<8x1xf32>
    %259 = vector.broadcast %258 : vector<8x1xf32> to vector<8x8xf32>
    %260 = arith.mulf %163, %259 : vector<8x8xf32>
    %261 = arith.subf %213, %260 : vector<8x8xf32>
    %262 = vector.shape_cast %28 : vector<1x8xi1> to vector<1x8xi1>
    %263 = vector.broadcast %262 : vector<1x8xi1> to vector<8x8xi1>
    %264 = vector.shape_cast %258 : vector<8x1xf32> to vector<8x1xf32>
    %265 = vector.broadcast %264 : vector<8x1xf32> to vector<8x8xf32>
    %266 = arith.select %263, %265, %261 : vector<8x8xi1>, vector<8x8xf32>
    %267 = vector.extract_strided_slice %226 {offsets = [0, 3], sizes = [8, 1], strides = [1, 1]} : vector<8x8xf32> to vector<8x1xf32>
    %cst_41 = arith.constant 1.000000e+00 : f32
    %268 = vector.broadcast %cst_41 : f32 to vector<8x1xf32>
    %269 = arith.divf %268, %267 : vector<8x1xf32>
    %270 = vector.extract_strided_slice %236 {offsets = [0, 3], sizes = [8, 1], strides = [1, 1]} : vector<8x8xf32> to vector<8x1xf32>
    %271 = arith.mulf %270, %269 : vector<8x1xf32>
    %272 = vector.broadcast %271 : vector<8x1xf32> to vector<8x8xf32>
    %273 = arith.mulf %226, %272 : vector<8x8xf32>
    %274 = arith.subf %236, %273 : vector<8x8xf32>
    %275 = vector.shape_cast %30 : vector<1x8xi1> to vector<1x8xi1>
    %276 = vector.broadcast %275 : vector<1x8xi1> to vector<8x8xi1>
    %277 = vector.shape_cast %271 : vector<8x1xf32> to vector<8x1xf32>
    %278 = vector.broadcast %277 : vector<8x1xf32> to vector<8x8xf32>
    %279 = arith.select %276, %278, %274 : vector<8x8xi1>, vector<8x8xf32>
    %280 = vector.extract_strided_slice %246 {offsets = [0, 3], sizes = [8, 1], strides = [1, 1]} : vector<8x8xf32> to vector<8x1xf32>
    %281 = arith.mulf %280, %269 : vector<8x1xf32>
    %282 = vector.broadcast %281 : vector<8x1xf32> to vector<8x8xf32>
    %283 = arith.mulf %226, %282 : vector<8x8xf32>
    %284 = arith.subf %246, %283 : vector<8x8xf32>
    %285 = vector.shape_cast %30 : vector<1x8xi1> to vector<1x8xi1>
    %286 = vector.broadcast %285 : vector<1x8xi1> to vector<8x8xi1>
    %287 = vector.shape_cast %281 : vector<8x1xf32> to vector<8x1xf32>
    %288 = vector.broadcast %287 : vector<8x1xf32> to vector<8x8xf32>
    %289 = arith.select %286, %288, %284 : vector<8x8xi1>, vector<8x8xf32>
    %290 = vector.extract_strided_slice %256 {offsets = [0, 3], sizes = [8, 1], strides = [1, 1]} : vector<8x8xf32> to vector<8x1xf32>
    %291 = arith.mulf %290, %269 : vector<8x1xf32>
    %292 = vector.broadcast %291 : vector<8x1xf32> to vector<8x8xf32>
    %293 = arith.mulf %226, %292 : vector<8x8xf32>
    %294 = arith.subf %256, %293 : vector<8x8xf32>
    %295 = vector.shape_cast %30 : vector<1x8xi1> to vector<1x8xi1>
    %296 = vector.broadcast %295 : vector<1x8xi1> to vector<8x8xi1>
    %297 = vector.shape_cast %291 : vector<8x1xf32> to vector<8x1xf32>
    %298 = vector.broadcast %297 : vector<8x1xf32> to vector<8x8xf32>
    %299 = arith.select %296, %298, %294 : vector<8x8xi1>, vector<8x8xf32>
    %300 = vector.extract_strided_slice %266 {offsets = [0, 3], sizes = [8, 1], strides = [1, 1]} : vector<8x8xf32> to vector<8x1xf32>
    %301 = arith.mulf %300, %269 : vector<8x1xf32>
    %302 = vector.broadcast %301 : vector<8x1xf32> to vector<8x8xf32>
    %303 = arith.mulf %226, %302 : vector<8x8xf32>
    %304 = arith.subf %266, %303 : vector<8x8xf32>
    %305 = vector.shape_cast %30 : vector<1x8xi1> to vector<1x8xi1>
    %306 = vector.broadcast %305 : vector<1x8xi1> to vector<8x8xi1>
    %307 = vector.shape_cast %301 : vector<8x1xf32> to vector<8x1xf32>
    %308 = vector.broadcast %307 : vector<8x1xf32> to vector<8x8xf32>
    %309 = arith.select %306, %308, %304 : vector<8x8xi1>, vector<8x8xf32>
    %310 = vector.extract_strided_slice %279 {offsets = [0, 4], sizes = [8, 1], strides = [1, 1]} : vector<8x8xf32> to vector<8x1xf32>
    %cst_42 = arith.constant 1.000000e+00 : f32
    %311 = vector.broadcast %cst_42 : f32 to vector<8x1xf32>
    %312 = arith.divf %311, %310 : vector<8x1xf32>
    %313 = vector.extract_strided_slice %289 {offsets = [0, 4], sizes = [8, 1], strides = [1, 1]} : vector<8x8xf32> to vector<8x1xf32>
    %314 = arith.mulf %313, %312 : vector<8x1xf32>
    %315 = vector.broadcast %314 : vector<8x1xf32> to vector<8x8xf32>
    %316 = arith.mulf %279, %315 : vector<8x8xf32>
    %317 = arith.subf %289, %316 : vector<8x8xf32>
    %318 = vector.shape_cast %32 : vector<1x8xi1> to vector<1x8xi1>
    %319 = vector.broadcast %318 : vector<1x8xi1> to vector<8x8xi1>
    %320 = vector.shape_cast %314 : vector<8x1xf32> to vector<8x1xf32>
    %321 = vector.broadcast %320 : vector<8x1xf32> to vector<8x8xf32>
    %322 = arith.select %319, %321, %317 : vector<8x8xi1>, vector<8x8xf32>
    %323 = vector.extract_strided_slice %299 {offsets = [0, 4], sizes = [8, 1], strides = [1, 1]} : vector<8x8xf32> to vector<8x1xf32>
    %324 = arith.mulf %323, %312 : vector<8x1xf32>
    %325 = vector.broadcast %324 : vector<8x1xf32> to vector<8x8xf32>
    %326 = arith.mulf %279, %325 : vector<8x8xf32>
    %327 = arith.subf %299, %326 : vector<8x8xf32>
    %328 = vector.shape_cast %32 : vector<1x8xi1> to vector<1x8xi1>
    %329 = vector.broadcast %328 : vector<1x8xi1> to vector<8x8xi1>
    %330 = vector.shape_cast %324 : vector<8x1xf32> to vector<8x1xf32>
    %331 = vector.broadcast %330 : vector<8x1xf32> to vector<8x8xf32>
    %332 = arith.select %329, %331, %327 : vector<8x8xi1>, vector<8x8xf32>
    %333 = vector.extract_strided_slice %309 {offsets = [0, 4], sizes = [8, 1], strides = [1, 1]} : vector<8x8xf32> to vector<8x1xf32>
    %334 = arith.mulf %333, %312 : vector<8x1xf32>
    %335 = vector.broadcast %334 : vector<8x1xf32> to vector<8x8xf32>
    %336 = arith.mulf %279, %335 : vector<8x8xf32>
    %337 = arith.subf %309, %336 : vector<8x8xf32>
    %338 = vector.shape_cast %32 : vector<1x8xi1> to vector<1x8xi1>
    %339 = vector.broadcast %338 : vector<1x8xi1> to vector<8x8xi1>
    %340 = vector.shape_cast %334 : vector<8x1xf32> to vector<8x1xf32>
    %341 = vector.broadcast %340 : vector<8x1xf32> to vector<8x8xf32>
    %342 = arith.select %339, %341, %337 : vector<8x8xi1>, vector<8x8xf32>
    %343 = vector.extract_strided_slice %322 {offsets = [0, 5], sizes = [8, 1], strides = [1, 1]} : vector<8x8xf32> to vector<8x1xf32>
    %cst_43 = arith.constant 1.000000e+00 : f32
    %344 = vector.broadcast %cst_43 : f32 to vector<8x1xf32>
    %345 = arith.divf %344, %343 : vector<8x1xf32>
    %346 = vector.extract_strided_slice %332 {offsets = [0, 5], sizes = [8, 1], strides = [1, 1]} : vector<8x8xf32> to vector<8x1xf32>
    %347 = arith.mulf %346, %345 : vector<8x1xf32>
    %348 = vector.broadcast %347 : vector<8x1xf32> to vector<8x8xf32>
    %349 = arith.mulf %322, %348 : vector<8x8xf32>
    %350 = arith.subf %332, %349 : vector<8x8xf32>
    %351 = vector.shape_cast %34 : vector<1x8xi1> to vector<1x8xi1>
    %352 = vector.broadcast %351 : vector<1x8xi1> to vector<8x8xi1>
    %353 = vector.shape_cast %347 : vector<8x1xf32> to vector<8x1xf32>
    %354 = vector.broadcast %353 : vector<8x1xf32> to vector<8x8xf32>
    %355 = arith.select %352, %354, %350 : vector<8x8xi1>, vector<8x8xf32>
    %356 = vector.extract_strided_slice %342 {offsets = [0, 5], sizes = [8, 1], strides = [1, 1]} : vector<8x8xf32> to vector<8x1xf32>
    %357 = arith.mulf %356, %345 : vector<8x1xf32>
    %358 = vector.broadcast %357 : vector<8x1xf32> to vector<8x8xf32>
    %359 = arith.mulf %322, %358 : vector<8x8xf32>
    %360 = arith.subf %342, %359 : vector<8x8xf32>
    %361 = vector.shape_cast %34 : vector<1x8xi1> to vector<1x8xi1>
    %362 = vector.broadcast %361 : vector<1x8xi1> to vector<8x8xi1>
    %363 = vector.shape_cast %357 : vector<8x1xf32> to vector<8x1xf32>
    %364 = vector.broadcast %363 : vector<8x1xf32> to vector<8x8xf32>
    %365 = arith.select %362, %364, %360 : vector<8x8xi1>, vector<8x8xf32>
    %366 = vector.extract_strided_slice %355 {offsets = [0, 6], sizes = [8, 1], strides = [1, 1]} : vector<8x8xf32> to vector<8x1xf32>
    %cst_44 = arith.constant 1.000000e+00 : f32
    %367 = vector.broadcast %cst_44 : f32 to vector<8x1xf32>
    %368 = arith.divf %367, %366 : vector<8x1xf32>
    %369 = vector.extract_strided_slice %365 {offsets = [0, 6], sizes = [8, 1], strides = [1, 1]} : vector<8x8xf32> to vector<8x1xf32>
    %370 = arith.mulf %369, %368 : vector<8x1xf32>
    %371 = vector.broadcast %370 : vector<8x1xf32> to vector<8x8xf32>
    %372 = arith.mulf %355, %371 : vector<8x8xf32>
    %373 = arith.subf %365, %372 : vector<8x8xf32>
    %374 = vector.shape_cast %36 : vector<1x8xi1> to vector<1x8xi1>
    %375 = vector.broadcast %374 : vector<1x8xi1> to vector<8x8xi1>
    %376 = vector.shape_cast %370 : vector<8x1xf32> to vector<8x1xf32>
    %377 = vector.broadcast %376 : vector<8x1xf32> to vector<8x8xf32>
    %378 = arith.select %375, %377, %373 : vector<8x8xi1>, vector<8x8xf32>
    %379 = vector.extract_strided_slice %378 {offsets = [0, 7], sizes = [8, 1], strides = [1, 1]} : vector<8x8xf32> to vector<8x1xf32>
    %cst_45 = arith.constant 1.000000e+00 : f32
    %380 = vector.broadcast %cst_45 : f32 to vector<8x1xf32>
    %381 = arith.divf %380, %379 : vector<8x1xf32>
    %382 = arith.subf %10, %9 : vector<1x16xf32>
    %383 = vector.broadcast %10 : vector<1x16xf32> to vector<8x16xf32>
    %384 = arith.subf %383, %0 : vector<8x16xf32>
    %cst_46 = arith.constant 0.000000e+00 : f32
    %385 = vector.broadcast %cst_46 : f32 to vector<8x16xf32>
    %386 = arith.maximumf %384, %385 : vector<8x16xf32>
    %387 = vector.broadcast %382 : vector<1x16xf32> to vector<8x16xf32>
    %388 = arith.subf %387, %386 : vector<8x16xf32>
    %cst_47 = arith.constant 0.000000e+00 : f32
    %389 = vector.broadcast %cst_47 : f32 to vector<8x16xf32>
    %390 = arith.maximumf %388, %389 : vector<8x16xf32>
    %391 = vector.broadcast %9 : vector<1x16xf32> to vector<8x16xf32>
    %392 = arith.addf %391, %390 : vector<8x16xf32>
    %cst_48 = arith.constant 2.000000e+00 : f32
    %393 = vector.broadcast %cst_48 : f32 to vector<8x16xf32>
    %394 = arith.mulf %393, %392 : vector<8x16xf32>
    %395 = arith.subf %394, %0 : vector<8x16xf32>
    %396 = arith.addf %395, %1 : vector<8x16xf32>
    %397 = vector.broadcast %19 : vector<1x16xf32> to vector<8x16xf32>
    %398 = arith.mulf %396, %397 : vector<8x16xf32>
    %399 = arith.subf %395, %39 : vector<8x16xf32>
    %400 = arith.mulf %68, %399 : vector<8x16xf32>
    %cst_49 = arith.constant 1.000000e+00 : f32
    %401 = vector.broadcast %cst_49 : f32 to vector<8x16xf32>
    %402 = arith.mulf %401, %398 : vector<8x16xf32>
    %403 = arith.subf %400, %402 : vector<8x16xf32>
    %cst_50 = arith.constant dense<0.000000e+00> : vector<8x8xf32>
    %404 = tpu.matmul %403, %8, %cst_50 {dimension_numbers = #tpu.dot_dimension_numbers<[1], [0], [0], [1], [0, 0, 1, 1], [], []>} : vector<8x16xf32>, vector<16x8xf32>, vector<8x8xf32> -> vector<8x8xf32>
    %405 = vector.extract_strided_slice %404 {offsets = [0, 0], sizes = [8, 1], strides = [1, 1]} : vector<8x8xf32> to vector<8x1xf32>
    %406 = arith.mulf %405, %80 : vector<8x1xf32>
    %407 = vector.broadcast %406 : vector<8x1xf32> to vector<8x8xf32>
    %408 = arith.mulf %70, %407 : vector<8x8xf32>
    %409 = arith.subf %404, %408 : vector<8x8xf32>
    %410 = vector.shape_cast %24 : vector<1x8xi1> to vector<1x8xi1>
    %411 = vector.broadcast %410 : vector<1x8xi1> to vector<8x8xi1>
    %412 = vector.shape_cast %406 : vector<8x1xf32> to vector<8x1xf32>
    %413 = vector.broadcast %412 : vector<8x1xf32> to vector<8x8xf32>
    %414 = arith.select %411, %413, %409 : vector<8x8xi1>, vector<8x8xf32>
    %415 = vector.extract_strided_slice %414 {offsets = [0, 1], sizes = [8, 1], strides = [1, 1]} : vector<8x8xf32> to vector<8x1xf32>
    %416 = arith.mulf %415, %153 : vector<8x1xf32>
    %417 = vector.broadcast %416 : vector<8x1xf32> to vector<8x8xf32>
    %418 = arith.mulf %90, %417 : vector<8x8xf32>
    %419 = arith.subf %414, %418 : vector<8x8xf32>
    %420 = vector.shape_cast %26 : vector<1x8xi1> to vector<1x8xi1>
    %421 = vector.broadcast %420 : vector<1x8xi1> to vector<8x8xi1>
    %422 = vector.shape_cast %416 : vector<8x1xf32> to vector<8x1xf32>
    %423 = vector.broadcast %422 : vector<8x1xf32> to vector<8x8xf32>
    %424 = arith.select %421, %423, %419 : vector<8x8xi1>, vector<8x8xf32>
    %425 = vector.extract_strided_slice %424 {offsets = [0, 2], sizes = [8, 1], strides = [1, 1]} : vector<8x8xf32> to vector<8x1xf32>
    %426 = arith.mulf %425, %216 : vector<8x1xf32>
    %427 = vector.broadcast %426 : vector<8x1xf32> to vector<8x8xf32>
    %428 = arith.mulf %163, %427 : vector<8x8xf32>
    %429 = arith.subf %424, %428 : vector<8x8xf32>
    %430 = vector.shape_cast %28 : vector<1x8xi1> to vector<1x8xi1>
    %431 = vector.broadcast %430 : vector<1x8xi1> to vector<8x8xi1>
    %432 = vector.shape_cast %426 : vector<8x1xf32> to vector<8x1xf32>
    %433 = vector.broadcast %432 : vector<8x1xf32> to vector<8x8xf32>
    %434 = arith.select %431, %433, %429 : vector<8x8xi1>, vector<8x8xf32>
    %435 = vector.extract_strided_slice %434 {offsets = [0, 3], sizes = [8, 1], strides = [1, 1]} : vector<8x8xf32> to vector<8x1xf32>
    %436 = arith.mulf %435, %269 : vector<8x1xf32>
    %437 = vector.broadcast %436 : vector<8x1xf32> to vector<8x8xf32>
    %438 = arith.mulf %226, %437 : vector<8x8xf32>
    %439 = arith.subf %434, %438 : vector<8x8xf32>
    %440 = vector.shape_cast %30 : vector<1x8xi1> to vector<1x8xi1>
    %441 = vector.broadcast %440 : vector<1x8xi1> to vector<8x8xi1>
    %442 = vector.shape_cast %436 : vector<8x1xf32> to vector<8x1xf32>
    %443 = vector.broadcast %442 : vector<8x1xf32> to vector<8x8xf32>
    %444 = arith.select %441, %443, %439 : vector<8x8xi1>, vector<8x8xf32>
    %445 = vector.extract_strided_slice %444 {offsets = [0, 4], sizes = [8, 1], strides = [1, 1]} : vector<8x8xf32> to vector<8x1xf32>
    %446 = arith.mulf %445, %312 : vector<8x1xf32>
    %447 = vector.broadcast %446 : vector<8x1xf32> to vector<8x8xf32>
    %448 = arith.mulf %279, %447 : vector<8x8xf32>
    %449 = arith.subf %444, %448 : vector<8x8xf32>
    %450 = vector.shape_cast %32 : vector<1x8xi1> to vector<1x8xi1>
    %451 = vector.broadcast %450 : vector<1x8xi1> to vector<8x8xi1>
    %452 = vector.shape_cast %446 : vector<8x1xf32> to vector<8x1xf32>
    %453 = vector.broadcast %452 : vector<8x1xf32> to vector<8x8xf32>
    %454 = arith.select %451, %453, %449 : vector<8x8xi1>, vector<8x8xf32>
    %455 = vector.extract_strided_slice %454 {offsets = [0, 5], sizes = [8, 1], strides = [1, 1]} : vector<8x8xf32> to vector<8x1xf32>
    %456 = arith.mulf %455, %345 : vector<8x1xf32>
    %457 = vector.broadcast %456 : vector<8x1xf32> to vector<8x8xf32>
    %458 = arith.mulf %322, %457 : vector<8x8xf32>
    %459 = arith.subf %454, %458 : vector<8x8xf32>
    %460 = vector.shape_cast %34 : vector<1x8xi1> to vector<1x8xi1>
    %461 = vector.broadcast %460 : vector<1x8xi1> to vector<8x8xi1>
    %462 = vector.shape_cast %456 : vector<8x1xf32> to vector<8x1xf32>
    %463 = vector.broadcast %462 : vector<8x1xf32> to vector<8x8xf32>
    %464 = arith.select %461, %463, %459 : vector<8x8xi1>, vector<8x8xf32>
    %465 = vector.extract_strided_slice %464 {offsets = [0, 6], sizes = [8, 1], strides = [1, 1]} : vector<8x8xf32> to vector<8x1xf32>
    %466 = arith.mulf %465, %368 : vector<8x1xf32>
    %467 = vector.broadcast %466 : vector<8x1xf32> to vector<8x8xf32>
    %468 = arith.mulf %355, %467 : vector<8x8xf32>
    %469 = arith.subf %464, %468 : vector<8x8xf32>
    %470 = vector.shape_cast %36 : vector<1x8xi1> to vector<1x8xi1>
    %471 = vector.broadcast %470 : vector<1x8xi1> to vector<8x8xi1>
    %472 = vector.shape_cast %466 : vector<8x1xf32> to vector<8x1xf32>
    %473 = vector.broadcast %472 : vector<8x1xf32> to vector<8x8xf32>
    %474 = arith.select %471, %473, %469 : vector<8x8xi1>, vector<8x8xf32>
    %475 = vector.extract_strided_slice %474 {offsets = [0, 7], sizes = [8, 1], strides = [1, 1]} : vector<8x8xf32> to vector<8x1xf32>
    %476 = arith.mulf %475, %381 : vector<8x1xf32>
    %477 = vector.broadcast %476 : vector<8x1xf32> to vector<8x8xf32>
    %478 = arith.mulf %378, %477 : vector<8x8xf32>
    %479 = arith.subf %474, %478 : vector<8x8xf32>
    %480 = vector.shape_cast %38 : vector<1x8xi1> to vector<1x8xi1>
    %481 = vector.broadcast %480 : vector<1x8xi1> to vector<8x8xi1>
    %482 = vector.shape_cast %476 : vector<8x1xf32> to vector<8x1xf32>
    %483 = vector.broadcast %482 : vector<8x1xf32> to vector<8x8xf32>
    %484 = arith.select %481, %483, %479 : vector<8x8xi1>, vector<8x8xf32>
    %cst_51 = arith.constant dense<0.000000e+00> : vector<8x16xf32>
    %485 = tpu.matmul %484, %6, %cst_51 {dimension_numbers = #tpu.dot_dimension_numbers<[1], [0], [0], [1], [0, 0, 1, 1], [], []>} : vector<8x8xf32>, vector<8x16xf32>, vector<8x16xf32> -> vector<8x16xf32>
    %486 = arith.addf %485, %39 : vector<8x16xf32>
    %487 = arith.subf %486, %392 : vector<8x16xf32>
    %488 = arith.addf %0, %487 : vector<8x16xf32>
    %489 = vector.broadcast %21 : vector<1x16xf32> to vector<8x16xf32>
    %490 = arith.mulf %1, %489 : vector<8x16xf32>
    %cst_52 = arith.constant dense<0.000000e+00> : vector<8x16xf32>
    %491 = tpu.matmul %488, %4, %cst_52 {dimension_numbers = #tpu.dot_dimension_numbers<[1], [0], [0], [1], [0, 0, 1, 1], [], []>} : vector<8x16xf32>, vector<16x16xf32>, vector<8x16xf32> -> vector<8x16xf32>
    %492 = arith.subf %490, %491 : vector<8x16xf32>
    %493 = vector.broadcast %19 : vector<1x16xf32> to vector<8x16xf32>
    %494 = arith.mulf %488, %493 : vector<8x16xf32>
    %495 = arith.addf %494, %492 : vector<8x16xf32>
    %c0_53 = arith.constant 0 : index
    %c0_54 = arith.constant 0 : index
    %496 = vector.load %arg5[%c0_53, %c0_54] : memref<208x160xf32, #tpu.memory_space<vmem>>, vector<16x160xf32>
    %cst_55 = arith.constant dense<0.000000e+00> : vector<8x160xf32>
    %497 = tpu.matmul %495, %496, %cst_55 {dimension_numbers = #tpu.dot_dimension_numbers<[1], [0], [0], [1], [0, 0, 1, 1], [], []>} : vector<8x16xf32>, vector<16x160xf32>, vector<8x160xf32> -> vector<8x160xf32>
    %c16_56 = arith.constant 16 : index
    %c0_57 = arith.constant 0 : index
    %498 = vector.load %arg5[%c16_56, %c0_57] : memref<208x160xf32, #tpu.memory_space<vmem>>, vector<16x160xf32>
    %cst_58 = arith.constant dense<0.000000e+00> : vector<8x160xf32>
    %499 = tpu.matmul %1, %498, %cst_58 {dimension_numbers = #tpu.dot_dimension_numbers<[1], [0], [0], [1], [0, 0, 1, 1], [], []>} : vector<8x16xf32>, vector<16x160xf32>, vector<8x160xf32> -> vector<8x160xf32>
    %500 = arith.addf %497, %499 : vector<8x160xf32>
    %c32_59 = arith.constant 32 : index
    %c0_60 = arith.constant 0 : index
    %501 = vector.load %arg5[%c32_59, %c0_60] : memref<208x160xf32, #tpu.memory_space<vmem>>, vector<1x160xf32>
    %502 = vector.broadcast %501 : vector<1x160xf32> to vector<8x160xf32>
    %503 = arith.addf %500, %502 : vector<8x160xf32>
    %c40_61 = arith.constant 40 : index
    %c0_62 = arith.constant 0 : index
    %504 = vector.load %arg5[%c40_61, %c0_62] : memref<208x160xf32, #tpu.memory_space<vmem>>, vector<160x160xf32>
    %c200 = arith.constant 200 : index
    %c0_63 = arith.constant 0 : index
    %505 = vector.load %arg5[%c200, %c0_63] : memref<208x160xf32, #tpu.memory_space<vmem>>, vector<1x160xf32>
    %c256 = arith.constant 256 : index
    %c0_64 = arith.constant 0 : index
    %506 = vector.load %arg2[%c256, %c0_64] : memref<592x16xf32, #tpu.memory_space<vmem>>, vector<160x16xf32>
    %c416 = arith.constant 416 : index
    %c0_65 = arith.constant 0 : index
    %507 = vector.load %arg2[%c416, %c0_65] : memref<592x16xf32, #tpu.memory_space<vmem>>, vector<1x16xf32>
    %cst_66 = arith.constant 0.000000e+00 : f32
    %508 = vector.broadcast %cst_66 : f32 to vector<8x160xf32>
    %509 = arith.maximumf %503, %508 : vector<8x160xf32>
    %cst_67 = arith.constant dense<0.000000e+00> : vector<8x160xf32>
    %510 = tpu.matmul %509, %504, %cst_67 {dimension_numbers = #tpu.dot_dimension_numbers<[1], [0], [0], [1], [0, 0, 1, 1], [], []>} : vector<8x160xf32>, vector<160x160xf32>, vector<8x160xf32> -> vector<8x160xf32>
    %511 = vector.broadcast %505 : vector<1x160xf32> to vector<8x160xf32>
    %512 = arith.addf %510, %511 : vector<8x160xf32>
    %cst_68 = arith.constant 0.000000e+00 : f32
    %513 = vector.broadcast %cst_68 : f32 to vector<8x160xf32>
    %514 = arith.maximumf %512, %513 : vector<8x160xf32>
    %cst_69 = arith.constant dense<0.000000e+00> : vector<8x16xf32>
    %515 = tpu.matmul %514, %506, %cst_69 {dimension_numbers = #tpu.dot_dimension_numbers<[1], [0], [0], [1], [0, 0, 1, 1], [], []>} : vector<8x160xf32>, vector<160x16xf32>, vector<8x16xf32> -> vector<8x16xf32>
    %516 = vector.broadcast %507 : vector<1x16xf32> to vector<8x16xf32>
    %517 = arith.addf %515, %516 : vector<8x16xf32>
    %cst_70 = arith.constant 0.000000e+00 : f32
    %518 = vector.broadcast %cst_70 : f32 to vector<8x16xf32>
    %519 = arith.subf %518, %517 : vector<8x16xf32>
    %520 = math.exp %519 : vector<8x16xf32>
    %cst_71 = arith.constant 1.000000e+00 : f32
    %521 = vector.broadcast %cst_71 : f32 to vector<8x16xf32>
    %522 = arith.addf %521, %520 : vector<8x16xf32>
    %523 = tpu.reciprocal %522 : vector<8x16xf32> -> vector<8x16xf32>
    %cst_72 = arith.constant 1.000000e+08 : f32
    %524 = vector.broadcast %cst_72 : f32 to vector<8x16xf32>
    %525 = arith.mulf %523, %524 : vector<8x16xf32>
    %cst_73 = arith.constant 9.99999993E-9 : f32
    %526 = vector.broadcast %cst_73 : f32 to vector<8x16xf32>
    %527 = arith.addf %526, %525 : vector<8x16xf32>
    %cst_74 = arith.constant 0.000000e+00 : f32
    %528 = vector.broadcast %cst_74 : f32 to vector<8x16xf32>
    %529 = arith.maximumf %492, %528 : vector<8x16xf32>
    %530 = arith.addf %488, %1 : vector<8x16xf32>
    %cst_75 = arith.constant 1.000000e+00 : f32
    %531 = vector.broadcast %cst_75 : f32 to vector<8x16xf32>
    %532 = arith.mulf %531, %530 : vector<8x16xf32>
    %533 = vector.broadcast %19 : vector<1x16xf32> to vector<8x16xf32>
    %534 = arith.mulf %532, %533 : vector<8x16xf32>
    %535 = arith.addf %529, %534 : vector<8x16xf32>
    %536 = vector.broadcast %19 : vector<1x16xf32> to vector<8x16xf32>
    %537 = arith.mulf %488, %536 : vector<8x16xf32>
    %538 = math.absf %492 : vector<8x16xf32>
    %539 = arith.addf %537, %538 : vector<8x16xf32>
    %540 = arith.subf %539, %535 : vector<8x16xf32>
    %541 = arith.mulf %527, %540 : vector<8x16xf32>
    %cst_76 = arith.constant dense<0.000000e+00> : vector<8x8xf32>
    %542 = tpu.matmul %541, %7, %cst_76 {dimension_numbers = #tpu.dot_dimension_numbers<[1], [0], [0], [1], [0, 0, 1, 1], [], []>} : vector<8x16xf32>, vector<16x8xf32>, vector<8x8xf32> -> vector<8x8xf32>
    %cst_77 = arith.constant dense<0.000000e+00> : vector<8x64xf32>
    %543 = tpu.matmul %527, %11, %cst_77 {dimension_numbers = #tpu.dot_dimension_numbers<[1], [0], [0], [1], [0, 0, 1, 1], [], []>} : vector<8x16xf32>, vector<16x64xf32>, vector<8x64xf32> -> vector<8x64xf32>
    %544 = vector.extract_strided_slice %543 {offsets = [0, 0], sizes = [8, 8], strides = [1, 1]} : vector<8x64xf32> to vector<8x8xf32>
    %545 = vector.extract_strided_slice %543 {offsets = [0, 8], sizes = [8, 8], strides = [1, 1]} : vector<8x64xf32> to vector<8x8xf32>
    %546 = vector.extract_strided_slice %543 {offsets = [0, 16], sizes = [8, 8], strides = [1, 1]} : vector<8x64xf32> to vector<8x8xf32>
    %547 = vector.extract_strided_slice %543 {offsets = [0, 24], sizes = [8, 8], strides = [1, 1]} : vector<8x64xf32> to vector<8x8xf32>
    %548 = vector.extract_strided_slice %543 {offsets = [0, 32], sizes = [8, 8], strides = [1, 1]} : vector<8x64xf32> to vector<8x8xf32>
    %549 = vector.extract_strided_slice %543 {offsets = [0, 40], sizes = [8, 8], strides = [1, 1]} : vector<8x64xf32> to vector<8x8xf32>
    %550 = vector.extract_strided_slice %543 {offsets = [0, 48], sizes = [8, 8], strides = [1, 1]} : vector<8x64xf32> to vector<8x8xf32>
    %551 = vector.extract_strided_slice %543 {offsets = [0, 56], sizes = [8, 8], strides = [1, 1]} : vector<8x64xf32> to vector<8x8xf32>
    %552 = vector.extract_strided_slice %544 {offsets = [0, 0], sizes = [8, 1], strides = [1, 1]} : vector<8x8xf32> to vector<8x1xf32>
    %cst_78 = arith.constant 1.000000e+00 : f32
    %553 = vector.broadcast %cst_78 : f32 to vector<8x1xf32>
    %554 = arith.divf %553, %552 : vector<8x1xf32>
    %555 = vector.extract_strided_slice %545 {offsets = [0, 0], sizes = [8, 1], strides = [1, 1]} : vector<8x8xf32> to vector<8x1xf32>
    %556 = arith.mulf %555, %554 : vector<8x1xf32>
    %557 = vector.broadcast %556 : vector<8x1xf32> to vector<8x8xf32>
    %558 = arith.mulf %544, %557 : vector<8x8xf32>
    %559 = arith.subf %545, %558 : vector<8x8xf32>
    %560 = vector.shape_cast %24 : vector<1x8xi1> to vector<1x8xi1>
    %561 = vector.broadcast %560 : vector<1x8xi1> to vector<8x8xi1>
    %562 = vector.shape_cast %556 : vector<8x1xf32> to vector<8x1xf32>
    %563 = vector.broadcast %562 : vector<8x1xf32> to vector<8x8xf32>
    %564 = arith.select %561, %563, %559 : vector<8x8xi1>, vector<8x8xf32>
    %565 = vector.extract_strided_slice %546 {offsets = [0, 0], sizes = [8, 1], strides = [1, 1]} : vector<8x8xf32> to vector<8x1xf32>
    %566 = arith.mulf %565, %554 : vector<8x1xf32>
    %567 = vector.broadcast %566 : vector<8x1xf32> to vector<8x8xf32>
    %568 = arith.mulf %544, %567 : vector<8x8xf32>
    %569 = arith.subf %546, %568 : vector<8x8xf32>
    %570 = vector.shape_cast %24 : vector<1x8xi1> to vector<1x8xi1>
    %571 = vector.broadcast %570 : vector<1x8xi1> to vector<8x8xi1>
    %572 = vector.shape_cast %566 : vector<8x1xf32> to vector<8x1xf32>
    %573 = vector.broadcast %572 : vector<8x1xf32> to vector<8x8xf32>
    %574 = arith.select %571, %573, %569 : vector<8x8xi1>, vector<8x8xf32>
    %575 = vector.extract_strided_slice %547 {offsets = [0, 0], sizes = [8, 1], strides = [1, 1]} : vector<8x8xf32> to vector<8x1xf32>
    %576 = arith.mulf %575, %554 : vector<8x1xf32>
    %577 = vector.broadcast %576 : vector<8x1xf32> to vector<8x8xf32>
    %578 = arith.mulf %544, %577 : vector<8x8xf32>
    %579 = arith.subf %547, %578 : vector<8x8xf32>
    %580 = vector.shape_cast %24 : vector<1x8xi1> to vector<1x8xi1>
    %581 = vector.broadcast %580 : vector<1x8xi1> to vector<8x8xi1>
    %582 = vector.shape_cast %576 : vector<8x1xf32> to vector<8x1xf32>
    %583 = vector.broadcast %582 : vector<8x1xf32> to vector<8x8xf32>
    %584 = arith.select %581, %583, %579 : vector<8x8xi1>, vector<8x8xf32>
    %585 = vector.extract_strided_slice %548 {offsets = [0, 0], sizes = [8, 1], strides = [1, 1]} : vector<8x8xf32> to vector<8x1xf32>
    %586 = arith.mulf %585, %554 : vector<8x1xf32>
    %587 = vector.broadcast %586 : vector<8x1xf32> to vector<8x8xf32>
    %588 = arith.mulf %544, %587 : vector<8x8xf32>
    %589 = arith.subf %548, %588 : vector<8x8xf32>
    %590 = vector.shape_cast %24 : vector<1x8xi1> to vector<1x8xi1>
    %591 = vector.broadcast %590 : vector<1x8xi1> to vector<8x8xi1>
    %592 = vector.shape_cast %586 : vector<8x1xf32> to vector<8x1xf32>
    %593 = vector.broadcast %592 : vector<8x1xf32> to vector<8x8xf32>
    %594 = arith.select %591, %593, %589 : vector<8x8xi1>, vector<8x8xf32>
    %595 = vector.extract_strided_slice %549 {offsets = [0, 0], sizes = [8, 1], strides = [1, 1]} : vector<8x8xf32> to vector<8x1xf32>
    %596 = arith.mulf %595, %554 : vector<8x1xf32>
    %597 = vector.broadcast %596 : vector<8x1xf32> to vector<8x8xf32>
    %598 = arith.mulf %544, %597 : vector<8x8xf32>
    %599 = arith.subf %549, %598 : vector<8x8xf32>
    %600 = vector.shape_cast %24 : vector<1x8xi1> to vector<1x8xi1>
    %601 = vector.broadcast %600 : vector<1x8xi1> to vector<8x8xi1>
    %602 = vector.shape_cast %596 : vector<8x1xf32> to vector<8x1xf32>
    %603 = vector.broadcast %602 : vector<8x1xf32> to vector<8x8xf32>
    %604 = arith.select %601, %603, %599 : vector<8x8xi1>, vector<8x8xf32>
    %605 = vector.extract_strided_slice %550 {offsets = [0, 0], sizes = [8, 1], strides = [1, 1]} : vector<8x8xf32> to vector<8x1xf32>
    %606 = arith.mulf %605, %554 : vector<8x1xf32>
    %607 = vector.broadcast %606 : vector<8x1xf32> to vector<8x8xf32>
    %608 = arith.mulf %544, %607 : vector<8x8xf32>
    %609 = arith.subf %550, %608 : vector<8x8xf32>
    %610 = vector.shape_cast %24 : vector<1x8xi1> to vector<1x8xi1>
    %611 = vector.broadcast %610 : vector<1x8xi1> to vector<8x8xi1>
    %612 = vector.shape_cast %606 : vector<8x1xf32> to vector<8x1xf32>
    %613 = vector.broadcast %612 : vector<8x1xf32> to vector<8x8xf32>
    %614 = arith.select %611, %613, %609 : vector<8x8xi1>, vector<8x8xf32>
    %615 = vector.extract_strided_slice %551 {offsets = [0, 0], sizes = [8, 1], strides = [1, 1]} : vector<8x8xf32> to vector<8x1xf32>
    %616 = arith.mulf %615, %554 : vector<8x1xf32>
    %617 = vector.broadcast %616 : vector<8x1xf32> to vector<8x8xf32>
    %618 = arith.mulf %544, %617 : vector<8x8xf32>
    %619 = arith.subf %551, %618 : vector<8x8xf32>
    %620 = vector.shape_cast %24 : vector<1x8xi1> to vector<1x8xi1>
    %621 = vector.broadcast %620 : vector<1x8xi1> to vector<8x8xi1>
    %622 = vector.shape_cast %616 : vector<8x1xf32> to vector<8x1xf32>
    %623 = vector.broadcast %622 : vector<8x1xf32> to vector<8x8xf32>
    %624 = arith.select %621, %623, %619 : vector<8x8xi1>, vector<8x8xf32>
    %625 = vector.extract_strided_slice %564 {offsets = [0, 1], sizes = [8, 1], strides = [1, 1]} : vector<8x8xf32> to vector<8x1xf32>
    %cst_79 = arith.constant 1.000000e+00 : f32
    %626 = vector.broadcast %cst_79 : f32 to vector<8x1xf32>
    %627 = arith.divf %626, %625 : vector<8x1xf32>
    %628 = vector.extract_strided_slice %574 {offsets = [0, 1], sizes = [8, 1], strides = [1, 1]} : vector<8x8xf32> to vector<8x1xf32>
    %629 = arith.mulf %628, %627 : vector<8x1xf32>
    %630 = vector.broadcast %629 : vector<8x1xf32> to vector<8x8xf32>
    %631 = arith.mulf %564, %630 : vector<8x8xf32>
    %632 = arith.subf %574, %631 : vector<8x8xf32>
    %633 = vector.shape_cast %26 : vector<1x8xi1> to vector<1x8xi1>
    %634 = vector.broadcast %633 : vector<1x8xi1> to vector<8x8xi1>
    %635 = vector.shape_cast %629 : vector<8x1xf32> to vector<8x1xf32>
    %636 = vector.broadcast %635 : vector<8x1xf32> to vector<8x8xf32>
    %637 = arith.select %634, %636, %632 : vector<8x8xi1>, vector<8x8xf32>
    %638 = vector.extract_strided_slice %584 {offsets = [0, 1], sizes = [8, 1], strides = [1, 1]} : vector<8x8xf32> to vector<8x1xf32>
    %639 = arith.mulf %638, %627 : vector<8x1xf32>
    %640 = vector.broadcast %639 : vector<8x1xf32> to vector<8x8xf32>
    %641 = arith.mulf %564, %640 : vector<8x8xf32>
    %642 = arith.subf %584, %641 : vector<8x8xf32>
    %643 = vector.shape_cast %26 : vector<1x8xi1> to vector<1x8xi1>
    %644 = vector.broadcast %643 : vector<1x8xi1> to vector<8x8xi1>
    %645 = vector.shape_cast %639 : vector<8x1xf32> to vector<8x1xf32>
    %646 = vector.broadcast %645 : vector<8x1xf32> to vector<8x8xf32>
    %647 = arith.select %644, %646, %642 : vector<8x8xi1>, vector<8x8xf32>
    %648 = vector.extract_strided_slice %594 {offsets = [0, 1], sizes = [8, 1], strides = [1, 1]} : vector<8x8xf32> to vector<8x1xf32>
    %649 = arith.mulf %648, %627 : vector<8x1xf32>
    %650 = vector.broadcast %649 : vector<8x1xf32> to vector<8x8xf32>
    %651 = arith.mulf %564, %650 : vector<8x8xf32>
    %652 = arith.subf %594, %651 : vector<8x8xf32>
    %653 = vector.shape_cast %26 : vector<1x8xi1> to vector<1x8xi1>
    %654 = vector.broadcast %653 : vector<1x8xi1> to vector<8x8xi1>
    %655 = vector.shape_cast %649 : vector<8x1xf32> to vector<8x1xf32>
    %656 = vector.broadcast %655 : vector<8x1xf32> to vector<8x8xf32>
    %657 = arith.select %654, %656, %652 : vector<8x8xi1>, vector<8x8xf32>
    %658 = vector.extract_strided_slice %604 {offsets = [0, 1], sizes = [8, 1], strides = [1, 1]} : vector<8x8xf32> to vector<8x1xf32>
    %659 = arith.mulf %658, %627 : vector<8x1xf32>
    %660 = vector.broadcast %659 : vector<8x1xf32> to vector<8x8xf32>
    %661 = arith.mulf %564, %660 : vector<8x8xf32>
    %662 = arith.subf %604, %661 : vector<8x8xf32>
    %663 = vector.shape_cast %26 : vector<1x8xi1> to vector<1x8xi1>
    %664 = vector.broadcast %663 : vector<1x8xi1> to vector<8x8xi1>
    %665 = vector.shape_cast %659 : vector<8x1xf32> to vector<8x1xf32>
    %666 = vector.broadcast %665 : vector<8x1xf32> to vector<8x8xf32>
    %667 = arith.select %664, %666, %662 : vector<8x8xi1>, vector<8x8xf32>
    %668 = vector.extract_strided_slice %614 {offsets = [0, 1], sizes = [8, 1], strides = [1, 1]} : vector<8x8xf32> to vector<8x1xf32>
    %669 = arith.mulf %668, %627 : vector<8x1xf32>
    %670 = vector.broadcast %669 : vector<8x1xf32> to vector<8x8xf32>
    %671 = arith.mulf %564, %670 : vector<8x8xf32>
    %672 = arith.subf %614, %671 : vector<8x8xf32>
    %673 = vector.shape_cast %26 : vector<1x8xi1> to vector<1x8xi1>
    %674 = vector.broadcast %673 : vector<1x8xi1> to vector<8x8xi1>
    %675 = vector.shape_cast %669 : vector<8x1xf32> to vector<8x1xf32>
    %676 = vector.broadcast %675 : vector<8x1xf32> to vector<8x8xf32>
    %677 = arith.select %674, %676, %672 : vector<8x8xi1>, vector<8x8xf32>
    %678 = vector.extract_strided_slice %624 {offsets = [0, 1], sizes = [8, 1], strides = [1, 1]} : vector<8x8xf32> to vector<8x1xf32>
    %679 = arith.mulf %678, %627 : vector<8x1xf32>
    %680 = vector.broadcast %679 : vector<8x1xf32> to vector<8x8xf32>
    %681 = arith.mulf %564, %680 : vector<8x8xf32>
    %682 = arith.subf %624, %681 : vector<8x8xf32>
    %683 = vector.shape_cast %26 : vector<1x8xi1> to vector<1x8xi1>
    %684 = vector.broadcast %683 : vector<1x8xi1> to vector<8x8xi1>
    %685 = vector.shape_cast %679 : vector<8x1xf32> to vector<8x1xf32>
    %686 = vector.broadcast %685 : vector<8x1xf32> to vector<8x8xf32>
    %687 = arith.select %684, %686, %682 : vector<8x8xi1>, vector<8x8xf32>
    %688 = vector.extract_strided_slice %637 {offsets = [0, 2], sizes = [8, 1], strides = [1, 1]} : vector<8x8xf32> to vector<8x1xf32>
    %cst_80 = arith.constant 1.000000e+00 : f32
    %689 = vector.broadcast %cst_80 : f32 to vector<8x1xf32>
    %690 = arith.divf %689, %688 : vector<8x1xf32>
    %691 = vector.extract_strided_slice %647 {offsets = [0, 2], sizes = [8, 1], strides = [1, 1]} : vector<8x8xf32> to vector<8x1xf32>
    %692 = arith.mulf %691, %690 : vector<8x1xf32>
    %693 = vector.broadcast %692 : vector<8x1xf32> to vector<8x8xf32>
    %694 = arith.mulf %637, %693 : vector<8x8xf32>
    %695 = arith.subf %647, %694 : vector<8x8xf32>
    %696 = vector.shape_cast %28 : vector<1x8xi1> to vector<1x8xi1>
    %697 = vector.broadcast %696 : vector<1x8xi1> to vector<8x8xi1>
    %698 = vector.shape_cast %692 : vector<8x1xf32> to vector<8x1xf32>
    %699 = vector.broadcast %698 : vector<8x1xf32> to vector<8x8xf32>
    %700 = arith.select %697, %699, %695 : vector<8x8xi1>, vector<8x8xf32>
    %701 = vector.extract_strided_slice %657 {offsets = [0, 2], sizes = [8, 1], strides = [1, 1]} : vector<8x8xf32> to vector<8x1xf32>
    %702 = arith.mulf %701, %690 : vector<8x1xf32>
    %703 = vector.broadcast %702 : vector<8x1xf32> to vector<8x8xf32>
    %704 = arith.mulf %637, %703 : vector<8x8xf32>
    %705 = arith.subf %657, %704 : vector<8x8xf32>
    %706 = vector.shape_cast %28 : vector<1x8xi1> to vector<1x8xi1>
    %707 = vector.broadcast %706 : vector<1x8xi1> to vector<8x8xi1>
    %708 = vector.shape_cast %702 : vector<8x1xf32> to vector<8x1xf32>
    %709 = vector.broadcast %708 : vector<8x1xf32> to vector<8x8xf32>
    %710 = arith.select %707, %709, %705 : vector<8x8xi1>, vector<8x8xf32>
    %711 = vector.extract_strided_slice %667 {offsets = [0, 2], sizes = [8, 1], strides = [1, 1]} : vector<8x8xf32> to vector<8x1xf32>
    %712 = arith.mulf %711, %690 : vector<8x1xf32>
    %713 = vector.broadcast %712 : vector<8x1xf32> to vector<8x8xf32>
    %714 = arith.mulf %637, %713 : vector<8x8xf32>
    %715 = arith.subf %667, %714 : vector<8x8xf32>
    %716 = vector.shape_cast %28 : vector<1x8xi1> to vector<1x8xi1>
    %717 = vector.broadcast %716 : vector<1x8xi1> to vector<8x8xi1>
    %718 = vector.shape_cast %712 : vector<8x1xf32> to vector<8x1xf32>
    %719 = vector.broadcast %718 : vector<8x1xf32> to vector<8x8xf32>
    %720 = arith.select %717, %719, %715 : vector<8x8xi1>, vector<8x8xf32>
    %721 = vector.extract_strided_slice %677 {offsets = [0, 2], sizes = [8, 1], strides = [1, 1]} : vector<8x8xf32> to vector<8x1xf32>
    %722 = arith.mulf %721, %690 : vector<8x1xf32>
    %723 = vector.broadcast %722 : vector<8x1xf32> to vector<8x8xf32>
    %724 = arith.mulf %637, %723 : vector<8x8xf32>
    %725 = arith.subf %677, %724 : vector<8x8xf32>
    %726 = vector.shape_cast %28 : vector<1x8xi1> to vector<1x8xi1>
    %727 = vector.broadcast %726 : vector<1x8xi1> to vector<8x8xi1>
    %728 = vector.shape_cast %722 : vector<8x1xf32> to vector<8x1xf32>
    %729 = vector.broadcast %728 : vector<8x1xf32> to vector<8x8xf32>
    %730 = arith.select %727, %729, %725 : vector<8x8xi1>, vector<8x8xf32>
    %731 = vector.extract_strided_slice %687 {offsets = [0, 2], sizes = [8, 1], strides = [1, 1]} : vector<8x8xf32> to vector<8x1xf32>
    %732 = arith.mulf %731, %690 : vector<8x1xf32>
    %733 = vector.broadcast %732 : vector<8x1xf32> to vector<8x8xf32>
    %734 = arith.mulf %637, %733 : vector<8x8xf32>
    %735 = arith.subf %687, %734 : vector<8x8xf32>
    %736 = vector.shape_cast %28 : vector<1x8xi1> to vector<1x8xi1>
    %737 = vector.broadcast %736 : vector<1x8xi1> to vector<8x8xi1>
    %738 = vector.shape_cast %732 : vector<8x1xf32> to vector<8x1xf32>
    %739 = vector.broadcast %738 : vector<8x1xf32> to vector<8x8xf32>
    %740 = arith.select %737, %739, %735 : vector<8x8xi1>, vector<8x8xf32>
    %741 = vector.extract_strided_slice %700 {offsets = [0, 3], sizes = [8, 1], strides = [1, 1]} : vector<8x8xf32> to vector<8x1xf32>
    %cst_81 = arith.constant 1.000000e+00 : f32
    %742 = vector.broadcast %cst_81 : f32 to vector<8x1xf32>
    %743 = arith.divf %742, %741 : vector<8x1xf32>
    %744 = vector.extract_strided_slice %710 {offsets = [0, 3], sizes = [8, 1], strides = [1, 1]} : vector<8x8xf32> to vector<8x1xf32>
    %745 = arith.mulf %744, %743 : vector<8x1xf32>
    %746 = vector.broadcast %745 : vector<8x1xf32> to vector<8x8xf32>
    %747 = arith.mulf %700, %746 : vector<8x8xf32>
    %748 = arith.subf %710, %747 : vector<8x8xf32>
    %749 = vector.shape_cast %30 : vector<1x8xi1> to vector<1x8xi1>
    %750 = vector.broadcast %749 : vector<1x8xi1> to vector<8x8xi1>
    %751 = vector.shape_cast %745 : vector<8x1xf32> to vector<8x1xf32>
    %752 = vector.broadcast %751 : vector<8x1xf32> to vector<8x8xf32>
    %753 = arith.select %750, %752, %748 : vector<8x8xi1>, vector<8x8xf32>
    %754 = vector.extract_strided_slice %720 {offsets = [0, 3], sizes = [8, 1], strides = [1, 1]} : vector<8x8xf32> to vector<8x1xf32>
    %755 = arith.mulf %754, %743 : vector<8x1xf32>
    %756 = vector.broadcast %755 : vector<8x1xf32> to vector<8x8xf32>
    %757 = arith.mulf %700, %756 : vector<8x8xf32>
    %758 = arith.subf %720, %757 : vector<8x8xf32>
    %759 = vector.shape_cast %30 : vector<1x8xi1> to vector<1x8xi1>
    %760 = vector.broadcast %759 : vector<1x8xi1> to vector<8x8xi1>
    %761 = vector.shape_cast %755 : vector<8x1xf32> to vector<8x1xf32>
    %762 = vector.broadcast %761 : vector<8x1xf32> to vector<8x8xf32>
    %763 = arith.select %760, %762, %758 : vector<8x8xi1>, vector<8x8xf32>
    %764 = vector.extract_strided_slice %730 {offsets = [0, 3], sizes = [8, 1], strides = [1, 1]} : vector<8x8xf32> to vector<8x1xf32>
    %765 = arith.mulf %764, %743 : vector<8x1xf32>
    %766 = vector.broadcast %765 : vector<8x1xf32> to vector<8x8xf32>
    %767 = arith.mulf %700, %766 : vector<8x8xf32>
    %768 = arith.subf %730, %767 : vector<8x8xf32>
    %769 = vector.shape_cast %30 : vector<1x8xi1> to vector<1x8xi1>
    %770 = vector.broadcast %769 : vector<1x8xi1> to vector<8x8xi1>
    %771 = vector.shape_cast %765 : vector<8x1xf32> to vector<8x1xf32>
    %772 = vector.broadcast %771 : vector<8x1xf32> to vector<8x8xf32>
    %773 = arith.select %770, %772, %768 : vector<8x8xi1>, vector<8x8xf32>
    %774 = vector.extract_strided_slice %740 {offsets = [0, 3], sizes = [8, 1], strides = [1, 1]} : vector<8x8xf32> to vector<8x1xf32>
    %775 = arith.mulf %774, %743 : vector<8x1xf32>
    %776 = vector.broadcast %775 : vector<8x1xf32> to vector<8x8xf32>
    %777 = arith.mulf %700, %776 : vector<8x8xf32>
    %778 = arith.subf %740, %777 : vector<8x8xf32>
    %779 = vector.shape_cast %30 : vector<1x8xi1> to vector<1x8xi1>
    %780 = vector.broadcast %779 : vector<1x8xi1> to vector<8x8xi1>
    %781 = vector.shape_cast %775 : vector<8x1xf32> to vector<8x1xf32>
    %782 = vector.broadcast %781 : vector<8x1xf32> to vector<8x8xf32>
    %783 = arith.select %780, %782, %778 : vector<8x8xi1>, vector<8x8xf32>
    %784 = vector.extract_strided_slice %753 {offsets = [0, 4], sizes = [8, 1], strides = [1, 1]} : vector<8x8xf32> to vector<8x1xf32>
    %cst_82 = arith.constant 1.000000e+00 : f32
    %785 = vector.broadcast %cst_82 : f32 to vector<8x1xf32>
    %786 = arith.divf %785, %784 : vector<8x1xf32>
    %787 = vector.extract_strided_slice %763 {offsets = [0, 4], sizes = [8, 1], strides = [1, 1]} : vector<8x8xf32> to vector<8x1xf32>
    %788 = arith.mulf %787, %786 : vector<8x1xf32>
    %789 = vector.broadcast %788 : vector<8x1xf32> to vector<8x8xf32>
    %790 = arith.mulf %753, %789 : vector<8x8xf32>
    %791 = arith.subf %763, %790 : vector<8x8xf32>
    %792 = vector.shape_cast %32 : vector<1x8xi1> to vector<1x8xi1>
    %793 = vector.broadcast %792 : vector<1x8xi1> to vector<8x8xi1>
    %794 = vector.shape_cast %788 : vector<8x1xf32> to vector<8x1xf32>
    %795 = vector.broadcast %794 : vector<8x1xf32> to vector<8x8xf32>
    %796 = arith.select %793, %795, %791 : vector<8x8xi1>, vector<8x8xf32>
    %797 = vector.extract_strided_slice %773 {offsets = [0, 4], sizes = [8, 1], strides = [1, 1]} : vector<8x8xf32> to vector<8x1xf32>
    %798 = arith.mulf %797, %786 : vector<8x1xf32>
    %799 = vector.broadcast %798 : vector<8x1xf32> to vector<8x8xf32>
    %800 = arith.mulf %753, %799 : vector<8x8xf32>
    %801 = arith.subf %773, %800 : vector<8x8xf32>
    %802 = vector.shape_cast %32 : vector<1x8xi1> to vector<1x8xi1>
    %803 = vector.broadcast %802 : vector<1x8xi1> to vector<8x8xi1>
    %804 = vector.shape_cast %798 : vector<8x1xf32> to vector<8x1xf32>
    %805 = vector.broadcast %804 : vector<8x1xf32> to vector<8x8xf32>
    %806 = arith.select %803, %805, %801 : vector<8x8xi1>, vector<8x8xf32>
    %807 = vector.extract_strided_slice %783 {offsets = [0, 4], sizes = [8, 1], strides = [1, 1]} : vector<8x8xf32> to vector<8x1xf32>
    %808 = arith.mulf %807, %786 : vector<8x1xf32>
    %809 = vector.broadcast %808 : vector<8x1xf32> to vector<8x8xf32>
    %810 = arith.mulf %753, %809 : vector<8x8xf32>
    %811 = arith.subf %783, %810 : vector<8x8xf32>
    %812 = vector.shape_cast %32 : vector<1x8xi1> to vector<1x8xi1>
    %813 = vector.broadcast %812 : vector<1x8xi1> to vector<8x8xi1>
    %814 = vector.shape_cast %808 : vector<8x1xf32> to vector<8x1xf32>
    %815 = vector.broadcast %814 : vector<8x1xf32> to vector<8x8xf32>
    %816 = arith.select %813, %815, %811 : vector<8x8xi1>, vector<8x8xf32>
    %817 = vector.extract_strided_slice %796 {offsets = [0, 5], sizes = [8, 1], strides = [1, 1]} : vector<8x8xf32> to vector<8x1xf32>
    %cst_83 = arith.constant 1.000000e+00 : f32
    %818 = vector.broadcast %cst_83 : f32 to vector<8x1xf32>
    %819 = arith.divf %818, %817 : vector<8x1xf32>
    %820 = vector.extract_strided_slice %806 {offsets = [0, 5], sizes = [8, 1], strides = [1, 1]} : vector<8x8xf32> to vector<8x1xf32>
    %821 = arith.mulf %820, %819 : vector<8x1xf32>
    %822 = vector.broadcast %821 : vector<8x1xf32> to vector<8x8xf32>
    %823 = arith.mulf %796, %822 : vector<8x8xf32>
    %824 = arith.subf %806, %823 : vector<8x8xf32>
    %825 = vector.shape_cast %34 : vector<1x8xi1> to vector<1x8xi1>
    %826 = vector.broadcast %825 : vector<1x8xi1> to vector<8x8xi1>
    %827 = vector.shape_cast %821 : vector<8x1xf32> to vector<8x1xf32>
    %828 = vector.broadcast %827 : vector<8x1xf32> to vector<8x8xf32>
    %829 = arith.select %826, %828, %824 : vector<8x8xi1>, vector<8x8xf32>
    %830 = vector.extract_strided_slice %816 {offsets = [0, 5], sizes = [8, 1], strides = [1, 1]} : vector<8x8xf32> to vector<8x1xf32>
    %831 = arith.mulf %830, %819 : vector<8x1xf32>
    %832 = vector.broadcast %831 : vector<8x1xf32> to vector<8x8xf32>
    %833 = arith.mulf %796, %832 : vector<8x8xf32>
    %834 = arith.subf %816, %833 : vector<8x8xf32>
    %835 = vector.shape_cast %34 : vector<1x8xi1> to vector<1x8xi1>
    %836 = vector.broadcast %835 : vector<1x8xi1> to vector<8x8xi1>
    %837 = vector.shape_cast %831 : vector<8x1xf32> to vector<8x1xf32>
    %838 = vector.broadcast %837 : vector<8x1xf32> to vector<8x8xf32>
    %839 = arith.select %836, %838, %834 : vector<8x8xi1>, vector<8x8xf32>
    %840 = vector.extract_strided_slice %829 {offsets = [0, 6], sizes = [8, 1], strides = [1, 1]} : vector<8x8xf32> to vector<8x1xf32>
    %cst_84 = arith.constant 1.000000e+00 : f32
    %841 = vector.broadcast %cst_84 : f32 to vector<8x1xf32>
    %842 = arith.divf %841, %840 : vector<8x1xf32>
    %843 = vector.extract_strided_slice %839 {offsets = [0, 6], sizes = [8, 1], strides = [1, 1]} : vector<8x8xf32> to vector<8x1xf32>
    %844 = arith.mulf %843, %842 : vector<8x1xf32>
    %845 = vector.broadcast %844 : vector<8x1xf32> to vector<8x8xf32>
    %846 = arith.mulf %829, %845 : vector<8x8xf32>
    %847 = arith.subf %839, %846 : vector<8x8xf32>
    %848 = vector.shape_cast %36 : vector<1x8xi1> to vector<1x8xi1>
    %849 = vector.broadcast %848 : vector<1x8xi1> to vector<8x8xi1>
    %850 = vector.shape_cast %844 : vector<8x1xf32> to vector<8x1xf32>
    %851 = vector.broadcast %850 : vector<8x1xf32> to vector<8x8xf32>
    %852 = arith.select %849, %851, %847 : vector<8x8xi1>, vector<8x8xf32>
    %853 = vector.extract_strided_slice %852 {offsets = [0, 7], sizes = [8, 1], strides = [1, 1]} : vector<8x8xf32> to vector<8x1xf32>
    %cst_85 = arith.constant 1.000000e+00 : f32
    %854 = vector.broadcast %cst_85 : f32 to vector<8x1xf32>
    %855 = arith.divf %854, %853 : vector<8x1xf32>
    %856 = vector.extract_strided_slice %542 {offsets = [0, 0], sizes = [8, 1], strides = [1, 1]} : vector<8x8xf32> to vector<8x1xf32>
    %857 = arith.mulf %856, %554 : vector<8x1xf32>
    %858 = vector.broadcast %857 : vector<8x1xf32> to vector<8x8xf32>
    %859 = arith.mulf %544, %858 : vector<8x8xf32>
    %860 = arith.subf %542, %859 : vector<8x8xf32>
    %861 = vector.shape_cast %24 : vector<1x8xi1> to vector<1x8xi1>
    %862 = vector.broadcast %861 : vector<1x8xi1> to vector<8x8xi1>
    %863 = vector.shape_cast %857 : vector<8x1xf32> to vector<8x1xf32>
    %864 = vector.broadcast %863 : vector<8x1xf32> to vector<8x8xf32>
    %865 = arith.select %862, %864, %860 : vector<8x8xi1>, vector<8x8xf32>
    %866 = vector.extract_strided_slice %865 {offsets = [0, 1], sizes = [8, 1], strides = [1, 1]} : vector<8x8xf32> to vector<8x1xf32>
    %867 = arith.mulf %866, %627 : vector<8x1xf32>
    %868 = vector.broadcast %867 : vector<8x1xf32> to vector<8x8xf32>
    %869 = arith.mulf %564, %868 : vector<8x8xf32>
    %870 = arith.subf %865, %869 : vector<8x8xf32>
    %871 = vector.shape_cast %26 : vector<1x8xi1> to vector<1x8xi1>
    %872 = vector.broadcast %871 : vector<1x8xi1> to vector<8x8xi1>
    %873 = vector.shape_cast %867 : vector<8x1xf32> to vector<8x1xf32>
    %874 = vector.broadcast %873 : vector<8x1xf32> to vector<8x8xf32>
    %875 = arith.select %872, %874, %870 : vector<8x8xi1>, vector<8x8xf32>
    %876 = vector.extract_strided_slice %875 {offsets = [0, 2], sizes = [8, 1], strides = [1, 1]} : vector<8x8xf32> to vector<8x1xf32>
    %877 = arith.mulf %876, %690 : vector<8x1xf32>
    %878 = vector.broadcast %877 : vector<8x1xf32> to vector<8x8xf32>
    %879 = arith.mulf %637, %878 : vector<8x8xf32>
    %880 = arith.subf %875, %879 : vector<8x8xf32>
    %881 = vector.shape_cast %28 : vector<1x8xi1> to vector<1x8xi1>
    %882 = vector.broadcast %881 : vector<1x8xi1> to vector<8x8xi1>
    %883 = vector.shape_cast %877 : vector<8x1xf32> to vector<8x1xf32>
    %884 = vector.broadcast %883 : vector<8x1xf32> to vector<8x8xf32>
    %885 = arith.select %882, %884, %880 : vector<8x8xi1>, vector<8x8xf32>
    %886 = vector.extract_strided_slice %885 {offsets = [0, 3], sizes = [8, 1], strides = [1, 1]} : vector<8x8xf32> to vector<8x1xf32>
    %887 = arith.mulf %886, %743 : vector<8x1xf32>
    %888 = vector.broadcast %887 : vector<8x1xf32> to vector<8x8xf32>
    %889 = arith.mulf %700, %888 : vector<8x8xf32>
    %890 = arith.subf %885, %889 : vector<8x8xf32>
    %891 = vector.shape_cast %30 : vector<1x8xi1> to vector<1x8xi1>
    %892 = vector.broadcast %891 : vector<1x8xi1> to vector<8x8xi1>
    %893 = vector.shape_cast %887 : vector<8x1xf32> to vector<8x1xf32>
    %894 = vector.broadcast %893 : vector<8x1xf32> to vector<8x8xf32>
    %895 = arith.select %892, %894, %890 : vector<8x8xi1>, vector<8x8xf32>
    %896 = vector.extract_strided_slice %895 {offsets = [0, 4], sizes = [8, 1], strides = [1, 1]} : vector<8x8xf32> to vector<8x1xf32>
    %897 = arith.mulf %896, %786 : vector<8x1xf32>
    %898 = vector.broadcast %897 : vector<8x1xf32> to vector<8x8xf32>
    %899 = arith.mulf %753, %898 : vector<8x8xf32>
    %900 = arith.subf %895, %899 : vector<8x8xf32>
    %901 = vector.shape_cast %32 : vector<1x8xi1> to vector<1x8xi1>
    %902 = vector.broadcast %901 : vector<1x8xi1> to vector<8x8xi1>
    %903 = vector.shape_cast %897 : vector<8x1xf32> to vector<8x1xf32>
    %904 = vector.broadcast %903 : vector<8x1xf32> to vector<8x8xf32>
    %905 = arith.select %902, %904, %900 : vector<8x8xi1>, vector<8x8xf32>
    %906 = vector.extract_strided_slice %905 {offsets = [0, 5], sizes = [8, 1], strides = [1, 1]} : vector<8x8xf32> to vector<8x1xf32>
    %907 = arith.mulf %906, %819 : vector<8x1xf32>
    %908 = vector.broadcast %907 : vector<8x1xf32> to vector<8x8xf32>
    %909 = arith.mulf %796, %908 : vector<8x8xf32>
    %910 = arith.subf %905, %909 : vector<8x8xf32>
    %911 = vector.shape_cast %34 : vector<1x8xi1> to vector<1x8xi1>
    %912 = vector.broadcast %911 : vector<1x8xi1> to vector<8x8xi1>
    %913 = vector.shape_cast %907 : vector<8x1xf32> to vector<8x1xf32>
    %914 = vector.broadcast %913 : vector<8x1xf32> to vector<8x8xf32>
    %915 = arith.select %912, %914, %910 : vector<8x8xi1>, vector<8x8xf32>
    %916 = vector.extract_strided_slice %915 {offsets = [0, 6], sizes = [8, 1], strides = [1, 1]} : vector<8x8xf32> to vector<8x1xf32>
    %917 = arith.mulf %916, %842 : vector<8x1xf32>
    %918 = vector.broadcast %917 : vector<8x1xf32> to vector<8x8xf32>
    %919 = arith.mulf %829, %918 : vector<8x8xf32>
    %920 = arith.subf %915, %919 : vector<8x8xf32>
    %921 = vector.shape_cast %36 : vector<1x8xi1> to vector<1x8xi1>
    %922 = vector.broadcast %921 : vector<1x8xi1> to vector<8x8xi1>
    %923 = vector.shape_cast %917 : vector<8x1xf32> to vector<8x1xf32>
    %924 = vector.broadcast %923 : vector<8x1xf32> to vector<8x8xf32>
    %925 = arith.select %922, %924, %920 : vector<8x8xi1>, vector<8x8xf32>
    %926 = vector.extract_strided_slice %925 {offsets = [0, 7], sizes = [8, 1], strides = [1, 1]} : vector<8x8xf32> to vector<8x1xf32>
    %927 = arith.mulf %926, %855 : vector<8x1xf32>
    %928 = vector.broadcast %927 : vector<8x1xf32> to vector<8x8xf32>
    %929 = arith.mulf %852, %928 : vector<8x8xf32>
    %930 = arith.subf %925, %929 : vector<8x8xf32>
    %931 = vector.shape_cast %38 : vector<1x8xi1> to vector<1x8xi1>
    %932 = vector.broadcast %931 : vector<1x8xi1> to vector<8x8xi1>
    %933 = vector.shape_cast %927 : vector<8x1xf32> to vector<8x1xf32>
    %934 = vector.broadcast %933 : vector<8x1xf32> to vector<8x8xf32>
    %935 = arith.select %932, %934, %930 : vector<8x8xi1>, vector<8x8xf32>
    %cst_86 = arith.constant dense<0.000000e+00> : vector<8x16xf32>
    %936 = tpu.matmul %935, %5, %cst_86 {dimension_numbers = #tpu.dot_dimension_numbers<[1], [0], [0], [1], [0, 0, 1, 1], [], []>} : vector<8x8xf32>, vector<8x16xf32>, vector<8x16xf32> -> vector<8x16xf32>
    %937 = arith.addf %936, %535 : vector<8x16xf32>
    %938 = arith.subf %19, %21 : vector<1x16xf32>
    %939 = vector.broadcast %938 : vector<1x16xf32> to vector<8x16xf32>
    %940 = arith.mulf %937, %939 : vector<8x16xf32>
    %cst_87 = arith.constant 2.000000e+00 : f32
    %941 = vector.broadcast %cst_87 : f32 to vector<8x16xf32>
    %942 = arith.mulf %941, %529 : vector<8x16xf32>
    %943 = arith.addf %940, %942 : vector<8x16xf32>
    tpu.wait_dma2 semaphore(%arg9 : memref<!tpu.dma_semaphore, #tpu.memory_space<semaphore_mem>>) src(%arg6 : memref<192x160xf32, #tpu.memory_space<any>>) dst(%arg8 : memref<192x160xf32, #tpu.memory_space<vmem>>)
    %c0_88 = arith.constant 0 : index
    %c0_89 = arith.constant 0 : index
    %944 = vector.load %arg8[%c0_88, %c0_89] : memref<192x160xf32, #tpu.memory_space<vmem>>, vector<16x160xf32>
    %cst_90 = arith.constant dense<0.000000e+00> : vector<8x160xf32>
    %945 = tpu.matmul %1, %944, %cst_90 {dimension_numbers = #tpu.dot_dimension_numbers<[1], [0], [0], [1], [0, 0, 1, 1], [], []>} : vector<8x16xf32>, vector<16x160xf32>, vector<8x160xf32> -> vector<8x160xf32>
    %c16_91 = arith.constant 16 : index
    %c0_92 = arith.constant 0 : index
    %946 = vector.load %arg8[%c16_91, %c0_92] : memref<192x160xf32, #tpu.memory_space<vmem>>, vector<1x160xf32>
    %947 = vector.broadcast %946 : vector<1x160xf32> to vector<8x160xf32>
    %948 = arith.addf %945, %947 : vector<8x160xf32>
    %c24_93 = arith.constant 24 : index
    %c0_94 = arith.constant 0 : index
    %949 = vector.load %arg8[%c24_93, %c0_94] : memref<192x160xf32, #tpu.memory_space<vmem>>, vector<160x160xf32>
    %c184_95 = arith.constant 184 : index
    %c0_96 = arith.constant 0 : index
    %950 = vector.load %arg8[%c184_95, %c0_96] : memref<192x160xf32, #tpu.memory_space<vmem>>, vector<1x160xf32>
    %c424 = arith.constant 424 : index
    %c0_97 = arith.constant 0 : index
    %951 = vector.load %arg2[%c424, %c0_97] : memref<592x16xf32, #tpu.memory_space<vmem>>, vector<160x16xf32>
    %c584 = arith.constant 584 : index
    %c0_98 = arith.constant 0 : index
    %952 = vector.load %arg2[%c584, %c0_98] : memref<592x16xf32, #tpu.memory_space<vmem>>, vector<1x16xf32>
    %cst_99 = arith.constant 0.000000e+00 : f32
    %953 = vector.broadcast %cst_99 : f32 to vector<8x160xf32>
    %954 = arith.maximumf %948, %953 : vector<8x160xf32>
    %cst_100 = arith.constant dense<0.000000e+00> : vector<8x160xf32>
    %955 = tpu.matmul %954, %949, %cst_100 {dimension_numbers = #tpu.dot_dimension_numbers<[1], [0], [0], [1], [0, 0, 1, 1], [], []>} : vector<8x160xf32>, vector<160x160xf32>, vector<8x160xf32> -> vector<8x160xf32>
    %956 = vector.broadcast %950 : vector<1x160xf32> to vector<8x160xf32>
    %957 = arith.addf %955, %956 : vector<8x160xf32>
    %cst_101 = arith.constant 0.000000e+00 : f32
    %958 = vector.broadcast %cst_101 : f32 to vector<8x160xf32>
    %959 = arith.maximumf %957, %958 : vector<8x160xf32>
    %cst_102 = arith.constant dense<0.000000e+00> : vector<8x16xf32>
    %960 = tpu.matmul %959, %951, %cst_102 {dimension_numbers = #tpu.dot_dimension_numbers<[1], [0], [0], [1], [0, 0, 1, 1], [], []>} : vector<8x160xf32>, vector<160x16xf32>, vector<8x16xf32> -> vector<8x16xf32>
    %961 = vector.broadcast %952 : vector<1x16xf32> to vector<8x16xf32>
    %962 = arith.addf %960, %961 : vector<8x16xf32>
    %cst_103 = arith.constant 0.000000e+00 : f32
    %963 = vector.broadcast %cst_103 : f32 to vector<8x16xf32>
    %964 = arith.subf %963, %962 : vector<8x16xf32>
    %965 = math.exp %964 : vector<8x16xf32>
    %cst_104 = arith.constant 1.000000e+00 : f32
    %966 = vector.broadcast %cst_104 : f32 to vector<8x16xf32>
    %967 = arith.addf %966, %965 : vector<8x16xf32>
    %968 = tpu.reciprocal %967 : vector<8x16xf32> -> vector<8x16xf32>
    %cst_105 = arith.constant 4.800000e+00 : f32
    %969 = vector.broadcast %cst_105 : f32 to vector<8x16xf32>
    %970 = arith.mulf %968, %969 : vector<8x16xf32>
    %cst_106 = arith.constant 2.000000e-01 : f32
    %971 = vector.broadcast %cst_106 : f32 to vector<8x16xf32>
    %972 = arith.addf %971, %970 : vector<8x16xf32>
    %cst_107 = arith.constant dense<0.000000e+00> : vector<8x64xf32>
    %973 = tpu.matmul %972, %12, %cst_107 {dimension_numbers = #tpu.dot_dimension_numbers<[1], [0], [0], [1], [0, 0, 1, 1], [], []>} : vector<8x16xf32>, vector<16x64xf32>, vector<8x64xf32> -> vector<8x64xf32>
    %974 = vector.extract_strided_slice %973 {offsets = [0, 0], sizes = [8, 8], strides = [1, 1]} : vector<8x64xf32> to vector<8x8xf32>
    %975 = vector.extract_strided_slice %973 {offsets = [0, 8], sizes = [8, 8], strides = [1, 1]} : vector<8x64xf32> to vector<8x8xf32>
    %976 = vector.extract_strided_slice %973 {offsets = [0, 16], sizes = [8, 8], strides = [1, 1]} : vector<8x64xf32> to vector<8x8xf32>
    %977 = vector.extract_strided_slice %973 {offsets = [0, 24], sizes = [8, 8], strides = [1, 1]} : vector<8x64xf32> to vector<8x8xf32>
    %978 = vector.extract_strided_slice %973 {offsets = [0, 32], sizes = [8, 8], strides = [1, 1]} : vector<8x64xf32> to vector<8x8xf32>
    %979 = vector.extract_strided_slice %973 {offsets = [0, 40], sizes = [8, 8], strides = [1, 1]} : vector<8x64xf32> to vector<8x8xf32>
    %980 = vector.extract_strided_slice %973 {offsets = [0, 48], sizes = [8, 8], strides = [1, 1]} : vector<8x64xf32> to vector<8x8xf32>
    %981 = vector.extract_strided_slice %973 {offsets = [0, 56], sizes = [8, 8], strides = [1, 1]} : vector<8x64xf32> to vector<8x8xf32>
    %982 = vector.extract_strided_slice %974 {offsets = [0, 0], sizes = [8, 1], strides = [1, 1]} : vector<8x8xf32> to vector<8x1xf32>
    %cst_108 = arith.constant 1.000000e+00 : f32
    %983 = vector.broadcast %cst_108 : f32 to vector<8x1xf32>
    %984 = arith.divf %983, %982 : vector<8x1xf32>
    %985 = vector.extract_strided_slice %975 {offsets = [0, 0], sizes = [8, 1], strides = [1, 1]} : vector<8x8xf32> to vector<8x1xf32>
    %986 = arith.mulf %985, %984 : vector<8x1xf32>
    %987 = vector.broadcast %986 : vector<8x1xf32> to vector<8x8xf32>
    %988 = arith.mulf %974, %987 : vector<8x8xf32>
    %989 = arith.subf %975, %988 : vector<8x8xf32>
    %990 = vector.shape_cast %24 : vector<1x8xi1> to vector<1x8xi1>
    %991 = vector.broadcast %990 : vector<1x8xi1> to vector<8x8xi1>
    %992 = vector.shape_cast %986 : vector<8x1xf32> to vector<8x1xf32>
    %993 = vector.broadcast %992 : vector<8x1xf32> to vector<8x8xf32>
    %994 = arith.select %991, %993, %989 : vector<8x8xi1>, vector<8x8xf32>
    %995 = vector.extract_strided_slice %976 {offsets = [0, 0], sizes = [8, 1], strides = [1, 1]} : vector<8x8xf32> to vector<8x1xf32>
    %996 = arith.mulf %995, %984 : vector<8x1xf32>
    %997 = vector.broadcast %996 : vector<8x1xf32> to vector<8x8xf32>
    %998 = arith.mulf %974, %997 : vector<8x8xf32>
    %999 = arith.subf %976, %998 : vector<8x8xf32>
    %1000 = vector.shape_cast %24 : vector<1x8xi1> to vector<1x8xi1>
    %1001 = vector.broadcast %1000 : vector<1x8xi1> to vector<8x8xi1>
    %1002 = vector.shape_cast %996 : vector<8x1xf32> to vector<8x1xf32>
    %1003 = vector.broadcast %1002 : vector<8x1xf32> to vector<8x8xf32>
    %1004 = arith.select %1001, %1003, %999 : vector<8x8xi1>, vector<8x8xf32>
    %1005 = vector.extract_strided_slice %977 {offsets = [0, 0], sizes = [8, 1], strides = [1, 1]} : vector<8x8xf32> to vector<8x1xf32>
    %1006 = arith.mulf %1005, %984 : vector<8x1xf32>
    %1007 = vector.broadcast %1006 : vector<8x1xf32> to vector<8x8xf32>
    %1008 = arith.mulf %974, %1007 : vector<8x8xf32>
    %1009 = arith.subf %977, %1008 : vector<8x8xf32>
    %1010 = vector.shape_cast %24 : vector<1x8xi1> to vector<1x8xi1>
    %1011 = vector.broadcast %1010 : vector<1x8xi1> to vector<8x8xi1>
    %1012 = vector.shape_cast %1006 : vector<8x1xf32> to vector<8x1xf32>
    %1013 = vector.broadcast %1012 : vector<8x1xf32> to vector<8x8xf32>
    %1014 = arith.select %1011, %1013, %1009 : vector<8x8xi1>, vector<8x8xf32>
    %1015 = vector.extract_strided_slice %978 {offsets = [0, 0], sizes = [8, 1], strides = [1, 1]} : vector<8x8xf32> to vector<8x1xf32>
    %1016 = arith.mulf %1015, %984 : vector<8x1xf32>
    %1017 = vector.broadcast %1016 : vector<8x1xf32> to vector<8x8xf32>
    %1018 = arith.mulf %974, %1017 : vector<8x8xf32>
    %1019 = arith.subf %978, %1018 : vector<8x8xf32>
    %1020 = vector.shape_cast %24 : vector<1x8xi1> to vector<1x8xi1>
    %1021 = vector.broadcast %1020 : vector<1x8xi1> to vector<8x8xi1>
    %1022 = vector.shape_cast %1016 : vector<8x1xf32> to vector<8x1xf32>
    %1023 = vector.broadcast %1022 : vector<8x1xf32> to vector<8x8xf32>
    %1024 = arith.select %1021, %1023, %1019 : vector<8x8xi1>, vector<8x8xf32>
    %1025 = vector.extract_strided_slice %979 {offsets = [0, 0], sizes = [8, 1], strides = [1, 1]} : vector<8x8xf32> to vector<8x1xf32>
    %1026 = arith.mulf %1025, %984 : vector<8x1xf32>
    %1027 = vector.broadcast %1026 : vector<8x1xf32> to vector<8x8xf32>
    %1028 = arith.mulf %974, %1027 : vector<8x8xf32>
    %1029 = arith.subf %979, %1028 : vector<8x8xf32>
    %1030 = vector.shape_cast %24 : vector<1x8xi1> to vector<1x8xi1>
    %1031 = vector.broadcast %1030 : vector<1x8xi1> to vector<8x8xi1>
    %1032 = vector.shape_cast %1026 : vector<8x1xf32> to vector<8x1xf32>
    %1033 = vector.broadcast %1032 : vector<8x1xf32> to vector<8x8xf32>
    %1034 = arith.select %1031, %1033, %1029 : vector<8x8xi1>, vector<8x8xf32>
    %1035 = vector.extract_strided_slice %980 {offsets = [0, 0], sizes = [8, 1], strides = [1, 1]} : vector<8x8xf32> to vector<8x1xf32>
    %1036 = arith.mulf %1035, %984 : vector<8x1xf32>
    %1037 = vector.broadcast %1036 : vector<8x1xf32> to vector<8x8xf32>
    %1038 = arith.mulf %974, %1037 : vector<8x8xf32>
    %1039 = arith.subf %980, %1038 : vector<8x8xf32>
    %1040 = vector.shape_cast %24 : vector<1x8xi1> to vector<1x8xi1>
    %1041 = vector.broadcast %1040 : vector<1x8xi1> to vector<8x8xi1>
    %1042 = vector.shape_cast %1036 : vector<8x1xf32> to vector<8x1xf32>
    %1043 = vector.broadcast %1042 : vector<8x1xf32> to vector<8x8xf32>
    %1044 = arith.select %1041, %1043, %1039 : vector<8x8xi1>, vector<8x8xf32>
    %1045 = vector.extract_strided_slice %981 {offsets = [0, 0], sizes = [8, 1], strides = [1, 1]} : vector<8x8xf32> to vector<8x1xf32>
    %1046 = arith.mulf %1045, %984 : vector<8x1xf32>
    %1047 = vector.broadcast %1046 : vector<8x1xf32> to vector<8x8xf32>
    %1048 = arith.mulf %974, %1047 : vector<8x8xf32>
    %1049 = arith.subf %981, %1048 : vector<8x8xf32>
    %1050 = vector.shape_cast %24 : vector<1x8xi1> to vector<1x8xi1>
    %1051 = vector.broadcast %1050 : vector<1x8xi1> to vector<8x8xi1>
    %1052 = vector.shape_cast %1046 : vector<8x1xf32> to vector<8x1xf32>
    %1053 = vector.broadcast %1052 : vector<8x1xf32> to vector<8x8xf32>
    %1054 = arith.select %1051, %1053, %1049 : vector<8x8xi1>, vector<8x8xf32>
    %1055 = vector.extract_strided_slice %994 {offsets = [0, 1], sizes = [8, 1], strides = [1, 1]} : vector<8x8xf32> to vector<8x1xf32>
    %cst_109 = arith.constant 1.000000e+00 : f32
    %1056 = vector.broadcast %cst_109 : f32 to vector<8x1xf32>
    %1057 = arith.divf %1056, %1055 : vector<8x1xf32>
    %1058 = vector.extract_strided_slice %1004 {offsets = [0, 1], sizes = [8, 1], strides = [1, 1]} : vector<8x8xf32> to vector<8x1xf32>
    %1059 = arith.mulf %1058, %1057 : vector<8x1xf32>
    %1060 = vector.broadcast %1059 : vector<8x1xf32> to vector<8x8xf32>
    %1061 = arith.mulf %994, %1060 : vector<8x8xf32>
    %1062 = arith.subf %1004, %1061 : vector<8x8xf32>
    %1063 = vector.shape_cast %26 : vector<1x8xi1> to vector<1x8xi1>
    %1064 = vector.broadcast %1063 : vector<1x8xi1> to vector<8x8xi1>
    %1065 = vector.shape_cast %1059 : vector<8x1xf32> to vector<8x1xf32>
    %1066 = vector.broadcast %1065 : vector<8x1xf32> to vector<8x8xf32>
    %1067 = arith.select %1064, %1066, %1062 : vector<8x8xi1>, vector<8x8xf32>
    %1068 = vector.extract_strided_slice %1014 {offsets = [0, 1], sizes = [8, 1], strides = [1, 1]} : vector<8x8xf32> to vector<8x1xf32>
    %1069 = arith.mulf %1068, %1057 : vector<8x1xf32>
    %1070 = vector.broadcast %1069 : vector<8x1xf32> to vector<8x8xf32>
    %1071 = arith.mulf %994, %1070 : vector<8x8xf32>
    %1072 = arith.subf %1014, %1071 : vector<8x8xf32>
    %1073 = vector.shape_cast %26 : vector<1x8xi1> to vector<1x8xi1>
    %1074 = vector.broadcast %1073 : vector<1x8xi1> to vector<8x8xi1>
    %1075 = vector.shape_cast %1069 : vector<8x1xf32> to vector<8x1xf32>
    %1076 = vector.broadcast %1075 : vector<8x1xf32> to vector<8x8xf32>
    %1077 = arith.select %1074, %1076, %1072 : vector<8x8xi1>, vector<8x8xf32>
    %1078 = vector.extract_strided_slice %1024 {offsets = [0, 1], sizes = [8, 1], strides = [1, 1]} : vector<8x8xf32> to vector<8x1xf32>
    %1079 = arith.mulf %1078, %1057 : vector<8x1xf32>
    %1080 = vector.broadcast %1079 : vector<8x1xf32> to vector<8x8xf32>
    %1081 = arith.mulf %994, %1080 : vector<8x8xf32>
    %1082 = arith.subf %1024, %1081 : vector<8x8xf32>
    %1083 = vector.shape_cast %26 : vector<1x8xi1> to vector<1x8xi1>
    %1084 = vector.broadcast %1083 : vector<1x8xi1> to vector<8x8xi1>
    %1085 = vector.shape_cast %1079 : vector<8x1xf32> to vector<8x1xf32>
    %1086 = vector.broadcast %1085 : vector<8x1xf32> to vector<8x8xf32>
    %1087 = arith.select %1084, %1086, %1082 : vector<8x8xi1>, vector<8x8xf32>
    %1088 = vector.extract_strided_slice %1034 {offsets = [0, 1], sizes = [8, 1], strides = [1, 1]} : vector<8x8xf32> to vector<8x1xf32>
    %1089 = arith.mulf %1088, %1057 : vector<8x1xf32>
    %1090 = vector.broadcast %1089 : vector<8x1xf32> to vector<8x8xf32>
    %1091 = arith.mulf %994, %1090 : vector<8x8xf32>
    %1092 = arith.subf %1034, %1091 : vector<8x8xf32>
    %1093 = vector.shape_cast %26 : vector<1x8xi1> to vector<1x8xi1>
    %1094 = vector.broadcast %1093 : vector<1x8xi1> to vector<8x8xi1>
    %1095 = vector.shape_cast %1089 : vector<8x1xf32> to vector<8x1xf32>
    %1096 = vector.broadcast %1095 : vector<8x1xf32> to vector<8x8xf32>
    %1097 = arith.select %1094, %1096, %1092 : vector<8x8xi1>, vector<8x8xf32>
    %1098 = vector.extract_strided_slice %1044 {offsets = [0, 1], sizes = [8, 1], strides = [1, 1]} : vector<8x8xf32> to vector<8x1xf32>
    %1099 = arith.mulf %1098, %1057 : vector<8x1xf32>
    %1100 = vector.broadcast %1099 : vector<8x1xf32> to vector<8x8xf32>
    %1101 = arith.mulf %994, %1100 : vector<8x8xf32>
    %1102 = arith.subf %1044, %1101 : vector<8x8xf32>
    %1103 = vector.shape_cast %26 : vector<1x8xi1> to vector<1x8xi1>
    %1104 = vector.broadcast %1103 : vector<1x8xi1> to vector<8x8xi1>
    %1105 = vector.shape_cast %1099 : vector<8x1xf32> to vector<8x1xf32>
    %1106 = vector.broadcast %1105 : vector<8x1xf32> to vector<8x8xf32>
    %1107 = arith.select %1104, %1106, %1102 : vector<8x8xi1>, vector<8x8xf32>
    %1108 = vector.extract_strided_slice %1054 {offsets = [0, 1], sizes = [8, 1], strides = [1, 1]} : vector<8x8xf32> to vector<8x1xf32>
    %1109 = arith.mulf %1108, %1057 : vector<8x1xf32>
    %1110 = vector.broadcast %1109 : vector<8x1xf32> to vector<8x8xf32>
    %1111 = arith.mulf %994, %1110 : vector<8x8xf32>
    %1112 = arith.subf %1054, %1111 : vector<8x8xf32>
    %1113 = vector.shape_cast %26 : vector<1x8xi1> to vector<1x8xi1>
    %1114 = vector.broadcast %1113 : vector<1x8xi1> to vector<8x8xi1>
    %1115 = vector.shape_cast %1109 : vector<8x1xf32> to vector<8x1xf32>
    %1116 = vector.broadcast %1115 : vector<8x1xf32> to vector<8x8xf32>
    %1117 = arith.select %1114, %1116, %1112 : vector<8x8xi1>, vector<8x8xf32>
    %1118 = vector.extract_strided_slice %1067 {offsets = [0, 2], sizes = [8, 1], strides = [1, 1]} : vector<8x8xf32> to vector<8x1xf32>
    %cst_110 = arith.constant 1.000000e+00 : f32
    %1119 = vector.broadcast %cst_110 : f32 to vector<8x1xf32>
    %1120 = arith.divf %1119, %1118 : vector<8x1xf32>
    %1121 = vector.extract_strided_slice %1077 {offsets = [0, 2], sizes = [8, 1], strides = [1, 1]} : vector<8x8xf32> to vector<8x1xf32>
    %1122 = arith.mulf %1121, %1120 : vector<8x1xf32>
    %1123 = vector.broadcast %1122 : vector<8x1xf32> to vector<8x8xf32>
    %1124 = arith.mulf %1067, %1123 : vector<8x8xf32>
    %1125 = arith.subf %1077, %1124 : vector<8x8xf32>
    %1126 = vector.shape_cast %28 : vector<1x8xi1> to vector<1x8xi1>
    %1127 = vector.broadcast %1126 : vector<1x8xi1> to vector<8x8xi1>
    %1128 = vector.shape_cast %1122 : vector<8x1xf32> to vector<8x1xf32>
    %1129 = vector.broadcast %1128 : vector<8x1xf32> to vector<8x8xf32>
    %1130 = arith.select %1127, %1129, %1125 : vector<8x8xi1>, vector<8x8xf32>
    %1131 = vector.extract_strided_slice %1087 {offsets = [0, 2], sizes = [8, 1], strides = [1, 1]} : vector<8x8xf32> to vector<8x1xf32>
    %1132 = arith.mulf %1131, %1120 : vector<8x1xf32>
    %1133 = vector.broadcast %1132 : vector<8x1xf32> to vector<8x8xf32>
    %1134 = arith.mulf %1067, %1133 : vector<8x8xf32>
    %1135 = arith.subf %1087, %1134 : vector<8x8xf32>
    %1136 = vector.shape_cast %28 : vector<1x8xi1> to vector<1x8xi1>
    %1137 = vector.broadcast %1136 : vector<1x8xi1> to vector<8x8xi1>
    %1138 = vector.shape_cast %1132 : vector<8x1xf32> to vector<8x1xf32>
    %1139 = vector.broadcast %1138 : vector<8x1xf32> to vector<8x8xf32>
    %1140 = arith.select %1137, %1139, %1135 : vector<8x8xi1>, vector<8x8xf32>
    %1141 = vector.extract_strided_slice %1097 {offsets = [0, 2], sizes = [8, 1], strides = [1, 1]} : vector<8x8xf32> to vector<8x1xf32>
    %1142 = arith.mulf %1141, %1120 : vector<8x1xf32>
    %1143 = vector.broadcast %1142 : vector<8x1xf32> to vector<8x8xf32>
    %1144 = arith.mulf %1067, %1143 : vector<8x8xf32>
    %1145 = arith.subf %1097, %1144 : vector<8x8xf32>
    %1146 = vector.shape_cast %28 : vector<1x8xi1> to vector<1x8xi1>
    %1147 = vector.broadcast %1146 : vector<1x8xi1> to vector<8x8xi1>
    %1148 = vector.shape_cast %1142 : vector<8x1xf32> to vector<8x1xf32>
    %1149 = vector.broadcast %1148 : vector<8x1xf32> to vector<8x8xf32>
    %1150 = arith.select %1147, %1149, %1145 : vector<8x8xi1>, vector<8x8xf32>
    %1151 = vector.extract_strided_slice %1107 {offsets = [0, 2], sizes = [8, 1], strides = [1, 1]} : vector<8x8xf32> to vector<8x1xf32>
    %1152 = arith.mulf %1151, %1120 : vector<8x1xf32>
    %1153 = vector.broadcast %1152 : vector<8x1xf32> to vector<8x8xf32>
    %1154 = arith.mulf %1067, %1153 : vector<8x8xf32>
    %1155 = arith.subf %1107, %1154 : vector<8x8xf32>
    %1156 = vector.shape_cast %28 : vector<1x8xi1> to vector<1x8xi1>
    %1157 = vector.broadcast %1156 : vector<1x8xi1> to vector<8x8xi1>
    %1158 = vector.shape_cast %1152 : vector<8x1xf32> to vector<8x1xf32>
    %1159 = vector.broadcast %1158 : vector<8x1xf32> to vector<8x8xf32>
    %1160 = arith.select %1157, %1159, %1155 : vector<8x8xi1>, vector<8x8xf32>
    %1161 = vector.extract_strided_slice %1117 {offsets = [0, 2], sizes = [8, 1], strides = [1, 1]} : vector<8x8xf32> to vector<8x1xf32>
    %1162 = arith.mulf %1161, %1120 : vector<8x1xf32>
    %1163 = vector.broadcast %1162 : vector<8x1xf32> to vector<8x8xf32>
    %1164 = arith.mulf %1067, %1163 : vector<8x8xf32>
    %1165 = arith.subf %1117, %1164 : vector<8x8xf32>
    %1166 = vector.shape_cast %28 : vector<1x8xi1> to vector<1x8xi1>
    %1167 = vector.broadcast %1166 : vector<1x8xi1> to vector<8x8xi1>
    %1168 = vector.shape_cast %1162 : vector<8x1xf32> to vector<8x1xf32>
    %1169 = vector.broadcast %1168 : vector<8x1xf32> to vector<8x8xf32>
    %1170 = arith.select %1167, %1169, %1165 : vector<8x8xi1>, vector<8x8xf32>
    %1171 = vector.extract_strided_slice %1130 {offsets = [0, 3], sizes = [8, 1], strides = [1, 1]} : vector<8x8xf32> to vector<8x1xf32>
    %cst_111 = arith.constant 1.000000e+00 : f32
    %1172 = vector.broadcast %cst_111 : f32 to vector<8x1xf32>
    %1173 = arith.divf %1172, %1171 : vector<8x1xf32>
    %1174 = vector.extract_strided_slice %1140 {offsets = [0, 3], sizes = [8, 1], strides = [1, 1]} : vector<8x8xf32> to vector<8x1xf32>
    %1175 = arith.mulf %1174, %1173 : vector<8x1xf32>
    %1176 = vector.broadcast %1175 : vector<8x1xf32> to vector<8x8xf32>
    %1177 = arith.mulf %1130, %1176 : vector<8x8xf32>
    %1178 = arith.subf %1140, %1177 : vector<8x8xf32>
    %1179 = vector.shape_cast %30 : vector<1x8xi1> to vector<1x8xi1>
    %1180 = vector.broadcast %1179 : vector<1x8xi1> to vector<8x8xi1>
    %1181 = vector.shape_cast %1175 : vector<8x1xf32> to vector<8x1xf32>
    %1182 = vector.broadcast %1181 : vector<8x1xf32> to vector<8x8xf32>
    %1183 = arith.select %1180, %1182, %1178 : vector<8x8xi1>, vector<8x8xf32>
    %1184 = vector.extract_strided_slice %1150 {offsets = [0, 3], sizes = [8, 1], strides = [1, 1]} : vector<8x8xf32> to vector<8x1xf32>
    %1185 = arith.mulf %1184, %1173 : vector<8x1xf32>
    %1186 = vector.broadcast %1185 : vector<8x1xf32> to vector<8x8xf32>
    %1187 = arith.mulf %1130, %1186 : vector<8x8xf32>
    %1188 = arith.subf %1150, %1187 : vector<8x8xf32>
    %1189 = vector.shape_cast %30 : vector<1x8xi1> to vector<1x8xi1>
    %1190 = vector.broadcast %1189 : vector<1x8xi1> to vector<8x8xi1>
    %1191 = vector.shape_cast %1185 : vector<8x1xf32> to vector<8x1xf32>
    %1192 = vector.broadcast %1191 : vector<8x1xf32> to vector<8x8xf32>
    %1193 = arith.select %1190, %1192, %1188 : vector<8x8xi1>, vector<8x8xf32>
    %1194 = vector.extract_strided_slice %1160 {offsets = [0, 3], sizes = [8, 1], strides = [1, 1]} : vector<8x8xf32> to vector<8x1xf32>
    %1195 = arith.mulf %1194, %1173 : vector<8x1xf32>
    %1196 = vector.broadcast %1195 : vector<8x1xf32> to vector<8x8xf32>
    %1197 = arith.mulf %1130, %1196 : vector<8x8xf32>
    %1198 = arith.subf %1160, %1197 : vector<8x8xf32>
    %1199 = vector.shape_cast %30 : vector<1x8xi1> to vector<1x8xi1>
    %1200 = vector.broadcast %1199 : vector<1x8xi1> to vector<8x8xi1>
    %1201 = vector.shape_cast %1195 : vector<8x1xf32> to vector<8x1xf32>
    %1202 = vector.broadcast %1201 : vector<8x1xf32> to vector<8x8xf32>
    %1203 = arith.select %1200, %1202, %1198 : vector<8x8xi1>, vector<8x8xf32>
    %1204 = vector.extract_strided_slice %1170 {offsets = [0, 3], sizes = [8, 1], strides = [1, 1]} : vector<8x8xf32> to vector<8x1xf32>
    %1205 = arith.mulf %1204, %1173 : vector<8x1xf32>
    %1206 = vector.broadcast %1205 : vector<8x1xf32> to vector<8x8xf32>
    %1207 = arith.mulf %1130, %1206 : vector<8x8xf32>
    %1208 = arith.subf %1170, %1207 : vector<8x8xf32>
    %1209 = vector.shape_cast %30 : vector<1x8xi1> to vector<1x8xi1>
    %1210 = vector.broadcast %1209 : vector<1x8xi1> to vector<8x8xi1>
    %1211 = vector.shape_cast %1205 : vector<8x1xf32> to vector<8x1xf32>
    %1212 = vector.broadcast %1211 : vector<8x1xf32> to vector<8x8xf32>
    %1213 = arith.select %1210, %1212, %1208 : vector<8x8xi1>, vector<8x8xf32>
    %1214 = vector.extract_strided_slice %1183 {offsets = [0, 4], sizes = [8, 1], strides = [1, 1]} : vector<8x8xf32> to vector<8x1xf32>
    %cst_112 = arith.constant 1.000000e+00 : f32
    %1215 = vector.broadcast %cst_112 : f32 to vector<8x1xf32>
    %1216 = arith.divf %1215, %1214 : vector<8x1xf32>
    %1217 = vector.extract_strided_slice %1193 {offsets = [0, 4], sizes = [8, 1], strides = [1, 1]} : vector<8x8xf32> to vector<8x1xf32>
    %1218 = arith.mulf %1217, %1216 : vector<8x1xf32>
    %1219 = vector.broadcast %1218 : vector<8x1xf32> to vector<8x8xf32>
    %1220 = arith.mulf %1183, %1219 : vector<8x8xf32>
    %1221 = arith.subf %1193, %1220 : vector<8x8xf32>
    %1222 = vector.shape_cast %32 : vector<1x8xi1> to vector<1x8xi1>
    %1223 = vector.broadcast %1222 : vector<1x8xi1> to vector<8x8xi1>
    %1224 = vector.shape_cast %1218 : vector<8x1xf32> to vector<8x1xf32>
    %1225 = vector.broadcast %1224 : vector<8x1xf32> to vector<8x8xf32>
    %1226 = arith.select %1223, %1225, %1221 : vector<8x8xi1>, vector<8x8xf32>
    %1227 = vector.extract_strided_slice %1203 {offsets = [0, 4], sizes = [8, 1], strides = [1, 1]} : vector<8x8xf32> to vector<8x1xf32>
    %1228 = arith.mulf %1227, %1216 : vector<8x1xf32>
    %1229 = vector.broadcast %1228 : vector<8x1xf32> to vector<8x8xf32>
    %1230 = arith.mulf %1183, %1229 : vector<8x8xf32>
    %1231 = arith.subf %1203, %1230 : vector<8x8xf32>
    %1232 = vector.shape_cast %32 : vector<1x8xi1> to vector<1x8xi1>
    %1233 = vector.broadcast %1232 : vector<1x8xi1> to vector<8x8xi1>
    %1234 = vector.shape_cast %1228 : vector<8x1xf32> to vector<8x1xf32>
    %1235 = vector.broadcast %1234 : vector<8x1xf32> to vector<8x8xf32>
    %1236 = arith.select %1233, %1235, %1231 : vector<8x8xi1>, vector<8x8xf32>
    %1237 = vector.extract_strided_slice %1213 {offsets = [0, 4], sizes = [8, 1], strides = [1, 1]} : vector<8x8xf32> to vector<8x1xf32>
    %1238 = arith.mulf %1237, %1216 : vector<8x1xf32>
    %1239 = vector.broadcast %1238 : vector<8x1xf32> to vector<8x8xf32>
    %1240 = arith.mulf %1183, %1239 : vector<8x8xf32>
    %1241 = arith.subf %1213, %1240 : vector<8x8xf32>
    %1242 = vector.shape_cast %32 : vector<1x8xi1> to vector<1x8xi1>
    %1243 = vector.broadcast %1242 : vector<1x8xi1> to vector<8x8xi1>
    %1244 = vector.shape_cast %1238 : vector<8x1xf32> to vector<8x1xf32>
    %1245 = vector.broadcast %1244 : vector<8x1xf32> to vector<8x8xf32>
    %1246 = arith.select %1243, %1245, %1241 : vector<8x8xi1>, vector<8x8xf32>
    %1247 = vector.extract_strided_slice %1226 {offsets = [0, 5], sizes = [8, 1], strides = [1, 1]} : vector<8x8xf32> to vector<8x1xf32>
    %cst_113 = arith.constant 1.000000e+00 : f32
    %1248 = vector.broadcast %cst_113 : f32 to vector<8x1xf32>
    %1249 = arith.divf %1248, %1247 : vector<8x1xf32>
    %1250 = vector.extract_strided_slice %1236 {offsets = [0, 5], sizes = [8, 1], strides = [1, 1]} : vector<8x8xf32> to vector<8x1xf32>
    %1251 = arith.mulf %1250, %1249 : vector<8x1xf32>
    %1252 = vector.broadcast %1251 : vector<8x1xf32> to vector<8x8xf32>
    %1253 = arith.mulf %1226, %1252 : vector<8x8xf32>
    %1254 = arith.subf %1236, %1253 : vector<8x8xf32>
    %1255 = vector.shape_cast %34 : vector<1x8xi1> to vector<1x8xi1>
    %1256 = vector.broadcast %1255 : vector<1x8xi1> to vector<8x8xi1>
    %1257 = vector.shape_cast %1251 : vector<8x1xf32> to vector<8x1xf32>
    %1258 = vector.broadcast %1257 : vector<8x1xf32> to vector<8x8xf32>
    %1259 = arith.select %1256, %1258, %1254 : vector<8x8xi1>, vector<8x8xf32>
    %1260 = vector.extract_strided_slice %1246 {offsets = [0, 5], sizes = [8, 1], strides = [1, 1]} : vector<8x8xf32> to vector<8x1xf32>
    %1261 = arith.mulf %1260, %1249 : vector<8x1xf32>
    %1262 = vector.broadcast %1261 : vector<8x1xf32> to vector<8x8xf32>
    %1263 = arith.mulf %1226, %1262 : vector<8x8xf32>
    %1264 = arith.subf %1246, %1263 : vector<8x8xf32>
    %1265 = vector.shape_cast %34 : vector<1x8xi1> to vector<1x8xi1>
    %1266 = vector.broadcast %1265 : vector<1x8xi1> to vector<8x8xi1>
    %1267 = vector.shape_cast %1261 : vector<8x1xf32> to vector<8x1xf32>
    %1268 = vector.broadcast %1267 : vector<8x1xf32> to vector<8x8xf32>
    %1269 = arith.select %1266, %1268, %1264 : vector<8x8xi1>, vector<8x8xf32>
    %1270 = vector.extract_strided_slice %1259 {offsets = [0, 6], sizes = [8, 1], strides = [1, 1]} : vector<8x8xf32> to vector<8x1xf32>
    %cst_114 = arith.constant 1.000000e+00 : f32
    %1271 = vector.broadcast %cst_114 : f32 to vector<8x1xf32>
    %1272 = arith.divf %1271, %1270 : vector<8x1xf32>
    %1273 = vector.extract_strided_slice %1269 {offsets = [0, 6], sizes = [8, 1], strides = [1, 1]} : vector<8x8xf32> to vector<8x1xf32>
    %1274 = arith.mulf %1273, %1272 : vector<8x1xf32>
    %1275 = vector.broadcast %1274 : vector<8x1xf32> to vector<8x8xf32>
    %1276 = arith.mulf %1259, %1275 : vector<8x8xf32>
    %1277 = arith.subf %1269, %1276 : vector<8x8xf32>
    %1278 = vector.shape_cast %36 : vector<1x8xi1> to vector<1x8xi1>
    %1279 = vector.broadcast %1278 : vector<1x8xi1> to vector<8x8xi1>
    %1280 = vector.shape_cast %1274 : vector<8x1xf32> to vector<8x1xf32>
    %1281 = vector.broadcast %1280 : vector<8x1xf32> to vector<8x8xf32>
    %1282 = arith.select %1279, %1281, %1277 : vector<8x8xi1>, vector<8x8xf32>
    %1283 = vector.extract_strided_slice %1282 {offsets = [0, 7], sizes = [8, 1], strides = [1, 1]} : vector<8x8xf32> to vector<8x1xf32>
    %cst_115 = arith.constant 1.000000e+00 : f32
    %1284 = vector.broadcast %cst_115 : f32 to vector<8x1xf32>
    %1285 = arith.divf %1284, %1283 : vector<8x1xf32>
    %1286 = arith.subf %10, %9 : vector<1x16xf32>
    %1287 = vector.broadcast %10 : vector<1x16xf32> to vector<8x16xf32>
    %1288 = arith.subf %1287, %943 : vector<8x16xf32>
    %cst_116 = arith.constant 0.000000e+00 : f32
    %1289 = vector.broadcast %cst_116 : f32 to vector<8x16xf32>
    %1290 = arith.maximumf %1288, %1289 : vector<8x16xf32>
    %1291 = vector.broadcast %1286 : vector<1x16xf32> to vector<8x16xf32>
    %1292 = arith.subf %1291, %1290 : vector<8x16xf32>
    %cst_117 = arith.constant 0.000000e+00 : f32
    %1293 = vector.broadcast %cst_117 : f32 to vector<8x16xf32>
    %1294 = arith.maximumf %1292, %1293 : vector<8x16xf32>
    %1295 = vector.broadcast %9 : vector<1x16xf32> to vector<8x16xf32>
    %1296 = arith.addf %1295, %1294 : vector<8x16xf32>
    %cst_118 = arith.constant 2.000000e+00 : f32
    %1297 = vector.broadcast %cst_118 : f32 to vector<8x16xf32>
    %1298 = arith.mulf %1297, %1296 : vector<8x16xf32>
    %1299 = arith.subf %1298, %943 : vector<8x16xf32>
    %1300 = arith.addf %1299, %1 : vector<8x16xf32>
    %1301 = vector.broadcast %19 : vector<1x16xf32> to vector<8x16xf32>
    %1302 = arith.mulf %1300, %1301 : vector<8x16xf32>
    %1303 = arith.subf %1299, %39 : vector<8x16xf32>
    %1304 = arith.mulf %972, %1303 : vector<8x16xf32>
    %cst_119 = arith.constant 1.000000e+00 : f32
    %1305 = vector.broadcast %cst_119 : f32 to vector<8x16xf32>
    %1306 = arith.mulf %1305, %1302 : vector<8x16xf32>
    %1307 = arith.subf %1304, %1306 : vector<8x16xf32>
    %cst_120 = arith.constant dense<0.000000e+00> : vector<8x8xf32>
    %1308 = tpu.matmul %1307, %8, %cst_120 {dimension_numbers = #tpu.dot_dimension_numbers<[1], [0], [0], [1], [0, 0, 1, 1], [], []>} : vector<8x16xf32>, vector<16x8xf32>, vector<8x8xf32> -> vector<8x8xf32>
    %1309 = vector.extract_strided_slice %1308 {offsets = [0, 0], sizes = [8, 1], strides = [1, 1]} : vector<8x8xf32> to vector<8x1xf32>
    %1310 = arith.mulf %1309, %984 : vector<8x1xf32>
    %1311 = vector.broadcast %1310 : vector<8x1xf32> to vector<8x8xf32>
    %1312 = arith.mulf %974, %1311 : vector<8x8xf32>
    %1313 = arith.subf %1308, %1312 : vector<8x8xf32>
    %1314 = vector.shape_cast %24 : vector<1x8xi1> to vector<1x8xi1>
    %1315 = vector.broadcast %1314 : vector<1x8xi1> to vector<8x8xi1>
    %1316 = vector.shape_cast %1310 : vector<8x1xf32> to vector<8x1xf32>
    %1317 = vector.broadcast %1316 : vector<8x1xf32> to vector<8x8xf32>
    %1318 = arith.select %1315, %1317, %1313 : vector<8x8xi1>, vector<8x8xf32>
    %1319 = vector.extract_strided_slice %1318 {offsets = [0, 1], sizes = [8, 1], strides = [1, 1]} : vector<8x8xf32> to vector<8x1xf32>
    %1320 = arith.mulf %1319, %1057 : vector<8x1xf32>
    %1321 = vector.broadcast %1320 : vector<8x1xf32> to vector<8x8xf32>
    %1322 = arith.mulf %994, %1321 : vector<8x8xf32>
    %1323 = arith.subf %1318, %1322 : vector<8x8xf32>
    %1324 = vector.shape_cast %26 : vector<1x8xi1> to vector<1x8xi1>
    %1325 = vector.broadcast %1324 : vector<1x8xi1> to vector<8x8xi1>
    %1326 = vector.shape_cast %1320 : vector<8x1xf32> to vector<8x1xf32>
    %1327 = vector.broadcast %1326 : vector<8x1xf32> to vector<8x8xf32>
    %1328 = arith.select %1325, %1327, %1323 : vector<8x8xi1>, vector<8x8xf32>
    %1329 = vector.extract_strided_slice %1328 {offsets = [0, 2], sizes = [8, 1], strides = [1, 1]} : vector<8x8xf32> to vector<8x1xf32>
    %1330 = arith.mulf %1329, %1120 : vector<8x1xf32>
    %1331 = vector.broadcast %1330 : vector<8x1xf32> to vector<8x8xf32>
    %1332 = arith.mulf %1067, %1331 : vector<8x8xf32>
    %1333 = arith.subf %1328, %1332 : vector<8x8xf32>
    %1334 = vector.shape_cast %28 : vector<1x8xi1> to vector<1x8xi1>
    %1335 = vector.broadcast %1334 : vector<1x8xi1> to vector<8x8xi1>
    %1336 = vector.shape_cast %1330 : vector<8x1xf32> to vector<8x1xf32>
    %1337 = vector.broadcast %1336 : vector<8x1xf32> to vector<8x8xf32>
    %1338 = arith.select %1335, %1337, %1333 : vector<8x8xi1>, vector<8x8xf32>
    %1339 = vector.extract_strided_slice %1338 {offsets = [0, 3], sizes = [8, 1], strides = [1, 1]} : vector<8x8xf32> to vector<8x1xf32>
    %1340 = arith.mulf %1339, %1173 : vector<8x1xf32>
    %1341 = vector.broadcast %1340 : vector<8x1xf32> to vector<8x8xf32>
    %1342 = arith.mulf %1130, %1341 : vector<8x8xf32>
    %1343 = arith.subf %1338, %1342 : vector<8x8xf32>
    %1344 = vector.shape_cast %30 : vector<1x8xi1> to vector<1x8xi1>
    %1345 = vector.broadcast %1344 : vector<1x8xi1> to vector<8x8xi1>
    %1346 = vector.shape_cast %1340 : vector<8x1xf32> to vector<8x1xf32>
    %1347 = vector.broadcast %1346 : vector<8x1xf32> to vector<8x8xf32>
    %1348 = arith.select %1345, %1347, %1343 : vector<8x8xi1>, vector<8x8xf32>
    %1349 = vector.extract_strided_slice %1348 {offsets = [0, 4], sizes = [8, 1], strides = [1, 1]} : vector<8x8xf32> to vector<8x1xf32>
    %1350 = arith.mulf %1349, %1216 : vector<8x1xf32>
    %1351 = vector.broadcast %1350 : vector<8x1xf32> to vector<8x8xf32>
    %1352 = arith.mulf %1183, %1351 : vector<8x8xf32>
    %1353 = arith.subf %1348, %1352 : vector<8x8xf32>
    %1354 = vector.shape_cast %32 : vector<1x8xi1> to vector<1x8xi1>
    %1355 = vector.broadcast %1354 : vector<1x8xi1> to vector<8x8xi1>
    %1356 = vector.shape_cast %1350 : vector<8x1xf32> to vector<8x1xf32>
    %1357 = vector.broadcast %1356 : vector<8x1xf32> to vector<8x8xf32>
    %1358 = arith.select %1355, %1357, %1353 : vector<8x8xi1>, vector<8x8xf32>
    %1359 = vector.extract_strided_slice %1358 {offsets = [0, 5], sizes = [8, 1], strides = [1, 1]} : vector<8x8xf32> to vector<8x1xf32>
    %1360 = arith.mulf %1359, %1249 : vector<8x1xf32>
    %1361 = vector.broadcast %1360 : vector<8x1xf32> to vector<8x8xf32>
    %1362 = arith.mulf %1226, %1361 : vector<8x8xf32>
    %1363 = arith.subf %1358, %1362 : vector<8x8xf32>
    %1364 = vector.shape_cast %34 : vector<1x8xi1> to vector<1x8xi1>
    %1365 = vector.broadcast %1364 : vector<1x8xi1> to vector<8x8xi1>
    %1366 = vector.shape_cast %1360 : vector<8x1xf32> to vector<8x1xf32>
    %1367 = vector.broadcast %1366 : vector<8x1xf32> to vector<8x8xf32>
    %1368 = arith.select %1365, %1367, %1363 : vector<8x8xi1>, vector<8x8xf32>
    %1369 = vector.extract_strided_slice %1368 {offsets = [0, 6], sizes = [8, 1], strides = [1, 1]} : vector<8x8xf32> to vector<8x1xf32>
    %1370 = arith.mulf %1369, %1272 : vector<8x1xf32>
    %1371 = vector.broadcast %1370 : vector<8x1xf32> to vector<8x8xf32>
    %1372 = arith.mulf %1259, %1371 : vector<8x8xf32>
    %1373 = arith.subf %1368, %1372 : vector<8x8xf32>
    %1374 = vector.shape_cast %36 : vector<1x8xi1> to vector<1x8xi1>
    %1375 = vector.broadcast %1374 : vector<1x8xi1> to vector<8x8xi1>
    %1376 = vector.shape_cast %1370 : vector<8x1xf32> to vector<8x1xf32>
    %1377 = vector.broadcast %1376 : vector<8x1xf32> to vector<8x8xf32>
    %1378 = arith.select %1375, %1377, %1373 : vector<8x8xi1>, vector<8x8xf32>
    %1379 = vector.extract_strided_slice %1378 {offsets = [0, 7], sizes = [8, 1], strides = [1, 1]} : vector<8x8xf32> to vector<8x1xf32>
    %1380 = arith.mulf %1379, %1285 : vector<8x1xf32>
    %1381 = vector.broadcast %1380 : vector<8x1xf32> to vector<8x8xf32>
    %1382 = arith.mulf %1282, %1381 : vector<8x8xf32>
    %1383 = arith.subf %1378, %1382 : vector<8x8xf32>
    %1384 = vector.shape_cast %38 : vector<1x8xi1> to vector<1x8xi1>
    %1385 = vector.broadcast %1384 : vector<1x8xi1> to vector<8x8xi1>
    %1386 = vector.shape_cast %1380 : vector<8x1xf32> to vector<8x1xf32>
    %1387 = vector.broadcast %1386 : vector<8x1xf32> to vector<8x8xf32>
    %1388 = arith.select %1385, %1387, %1383 : vector<8x8xi1>, vector<8x8xf32>
    %cst_121 = arith.constant dense<0.000000e+00> : vector<8x16xf32>
    %1389 = tpu.matmul %1388, %6, %cst_121 {dimension_numbers = #tpu.dot_dimension_numbers<[1], [0], [0], [1], [0, 0, 1, 1], [], []>} : vector<8x8xf32>, vector<8x16xf32>, vector<8x16xf32> -> vector<8x16xf32>
    %1390 = arith.addf %1389, %39 : vector<8x16xf32>
    %1391 = arith.subf %1390, %1296 : vector<8x16xf32>
    %1392 = arith.addf %943, %1391 : vector<8x16xf32>
    %1393 = arith.subf %10, %9 : vector<1x16xf32>
    %1394 = vector.broadcast %10 : vector<1x16xf32> to vector<8x16xf32>
    %1395 = arith.subf %1394, %1392 : vector<8x16xf32>
    %cst_122 = arith.constant 0.000000e+00 : f32
    %1396 = vector.broadcast %cst_122 : f32 to vector<8x16xf32>
    %1397 = arith.maximumf %1395, %1396 : vector<8x16xf32>
    %1398 = vector.broadcast %1393 : vector<1x16xf32> to vector<8x16xf32>
    %1399 = arith.subf %1398, %1397 : vector<8x16xf32>
    %cst_123 = arith.constant 0.000000e+00 : f32
    %1400 = vector.broadcast %cst_123 : f32 to vector<8x16xf32>
    %1401 = arith.maximumf %1399, %1400 : vector<8x16xf32>
    %1402 = vector.broadcast %9 : vector<1x16xf32> to vector<8x16xf32>
    %1403 = arith.addf %1402, %1401 : vector<8x16xf32>
    %cst_124 = arith.constant 2.000000e+00 : f32
    %1404 = vector.broadcast %cst_124 : f32 to vector<8x16xf32>
    %1405 = arith.mulf %1404, %1403 : vector<8x16xf32>
    %1406 = arith.subf %1405, %1392 : vector<8x16xf32>
    %1407 = arith.addf %1406, %1 : vector<8x16xf32>
    %1408 = vector.broadcast %19 : vector<1x16xf32> to vector<8x16xf32>
    %1409 = arith.mulf %1407, %1408 : vector<8x16xf32>
    %1410 = arith.subf %1406, %39 : vector<8x16xf32>
    %1411 = arith.mulf %972, %1410 : vector<8x16xf32>
    %cst_125 = arith.constant 1.000000e+00 : f32
    %1412 = vector.broadcast %cst_125 : f32 to vector<8x16xf32>
    %1413 = arith.mulf %1412, %1409 : vector<8x16xf32>
    %1414 = arith.subf %1411, %1413 : vector<8x16xf32>
    %cst_126 = arith.constant dense<0.000000e+00> : vector<8x8xf32>
    %1415 = tpu.matmul %1414, %8, %cst_126 {dimension_numbers = #tpu.dot_dimension_numbers<[1], [0], [0], [1], [0, 0, 1, 1], [], []>} : vector<8x16xf32>, vector<16x8xf32>, vector<8x8xf32> -> vector<8x8xf32>
    %1416 = vector.extract_strided_slice %1415 {offsets = [0, 0], sizes = [8, 1], strides = [1, 1]} : vector<8x8xf32> to vector<8x1xf32>
    %1417 = arith.mulf %1416, %984 : vector<8x1xf32>
    %1418 = vector.broadcast %1417 : vector<8x1xf32> to vector<8x8xf32>
    %1419 = arith.mulf %974, %1418 : vector<8x8xf32>
    %1420 = arith.subf %1415, %1419 : vector<8x8xf32>
    %1421 = vector.shape_cast %24 : vector<1x8xi1> to vector<1x8xi1>
    %1422 = vector.broadcast %1421 : vector<1x8xi1> to vector<8x8xi1>
    %1423 = vector.shape_cast %1417 : vector<8x1xf32> to vector<8x1xf32>
    %1424 = vector.broadcast %1423 : vector<8x1xf32> to vector<8x8xf32>
    %1425 = arith.select %1422, %1424, %1420 : vector<8x8xi1>, vector<8x8xf32>
    %1426 = vector.extract_strided_slice %1425 {offsets = [0, 1], sizes = [8, 1], strides = [1, 1]} : vector<8x8xf32> to vector<8x1xf32>
    %1427 = arith.mulf %1426, %1057 : vector<8x1xf32>
    %1428 = vector.broadcast %1427 : vector<8x1xf32> to vector<8x8xf32>
    %1429 = arith.mulf %994, %1428 : vector<8x8xf32>
    %1430 = arith.subf %1425, %1429 : vector<8x8xf32>
    %1431 = vector.shape_cast %26 : vector<1x8xi1> to vector<1x8xi1>
    %1432 = vector.broadcast %1431 : vector<1x8xi1> to vector<8x8xi1>
    %1433 = vector.shape_cast %1427 : vector<8x1xf32> to vector<8x1xf32>
    %1434 = vector.broadcast %1433 : vector<8x1xf32> to vector<8x8xf32>
    %1435 = arith.select %1432, %1434, %1430 : vector<8x8xi1>, vector<8x8xf32>
    %1436 = vector.extract_strided_slice %1435 {offsets = [0, 2], sizes = [8, 1], strides = [1, 1]} : vector<8x8xf32> to vector<8x1xf32>
    %1437 = arith.mulf %1436, %1120 : vector<8x1xf32>
    %1438 = vector.broadcast %1437 : vector<8x1xf32> to vector<8x8xf32>
    %1439 = arith.mulf %1067, %1438 : vector<8x8xf32>
    %1440 = arith.subf %1435, %1439 : vector<8x8xf32>
    %1441 = vector.shape_cast %28 : vector<1x8xi1> to vector<1x8xi1>
    %1442 = vector.broadcast %1441 : vector<1x8xi1> to vector<8x8xi1>
    %1443 = vector.shape_cast %1437 : vector<8x1xf32> to vector<8x1xf32>
    %1444 = vector.broadcast %1443 : vector<8x1xf32> to vector<8x8xf32>
    %1445 = arith.select %1442, %1444, %1440 : vector<8x8xi1>, vector<8x8xf32>
    %1446 = vector.extract_strided_slice %1445 {offsets = [0, 3], sizes = [8, 1], strides = [1, 1]} : vector<8x8xf32> to vector<8x1xf32>
    %1447 = arith.mulf %1446, %1173 : vector<8x1xf32>
    %1448 = vector.broadcast %1447 : vector<8x1xf32> to vector<8x8xf32>
    %1449 = arith.mulf %1130, %1448 : vector<8x8xf32>
    %1450 = arith.subf %1445, %1449 : vector<8x8xf32>
    %1451 = vector.shape_cast %30 : vector<1x8xi1> to vector<1x8xi1>
    %1452 = vector.broadcast %1451 : vector<1x8xi1> to vector<8x8xi1>
    %1453 = vector.shape_cast %1447 : vector<8x1xf32> to vector<8x1xf32>
    %1454 = vector.broadcast %1453 : vector<8x1xf32> to vector<8x8xf32>
    %1455 = arith.select %1452, %1454, %1450 : vector<8x8xi1>, vector<8x8xf32>
    %1456 = vector.extract_strided_slice %1455 {offsets = [0, 4], sizes = [8, 1], strides = [1, 1]} : vector<8x8xf32> to vector<8x1xf32>
    %1457 = arith.mulf %1456, %1216 : vector<8x1xf32>
    %1458 = vector.broadcast %1457 : vector<8x1xf32> to vector<8x8xf32>
    %1459 = arith.mulf %1183, %1458 : vector<8x8xf32>
    %1460 = arith.subf %1455, %1459 : vector<8x8xf32>
    %1461 = vector.shape_cast %32 : vector<1x8xi1> to vector<1x8xi1>
    %1462 = vector.broadcast %1461 : vector<1x8xi1> to vector<8x8xi1>
    %1463 = vector.shape_cast %1457 : vector<8x1xf32> to vector<8x1xf32>
    %1464 = vector.broadcast %1463 : vector<8x1xf32> to vector<8x8xf32>
    %1465 = arith.select %1462, %1464, %1460 : vector<8x8xi1>, vector<8x8xf32>
    %1466 = vector.extract_strided_slice %1465 {offsets = [0, 5], sizes = [8, 1], strides = [1, 1]} : vector<8x8xf32> to vector<8x1xf32>
    %1467 = arith.mulf %1466, %1249 : vector<8x1xf32>
    %1468 = vector.broadcast %1467 : vector<8x1xf32> to vector<8x8xf32>
    %1469 = arith.mulf %1226, %1468 : vector<8x8xf32>
    %1470 = arith.subf %1465, %1469 : vector<8x8xf32>
    %1471 = vector.shape_cast %34 : vector<1x8xi1> to vector<1x8xi1>
    %1472 = vector.broadcast %1471 : vector<1x8xi1> to vector<8x8xi1>
    %1473 = vector.shape_cast %1467 : vector<8x1xf32> to vector<8x1xf32>
    %1474 = vector.broadcast %1473 : vector<8x1xf32> to vector<8x8xf32>
    %1475 = arith.select %1472, %1474, %1470 : vector<8x8xi1>, vector<8x8xf32>
    %1476 = vector.extract_strided_slice %1475 {offsets = [0, 6], sizes = [8, 1], strides = [1, 1]} : vector<8x8xf32> to vector<8x1xf32>
    %1477 = arith.mulf %1476, %1272 : vector<8x1xf32>
    %1478 = vector.broadcast %1477 : vector<8x1xf32> to vector<8x8xf32>
    %1479 = arith.mulf %1259, %1478 : vector<8x8xf32>
    %1480 = arith.subf %1475, %1479 : vector<8x8xf32>
    %1481 = vector.shape_cast %36 : vector<1x8xi1> to vector<1x8xi1>
    %1482 = vector.broadcast %1481 : vector<1x8xi1> to vector<8x8xi1>
    %1483 = vector.shape_cast %1477 : vector<8x1xf32> to vector<8x1xf32>
    %1484 = vector.broadcast %1483 : vector<8x1xf32> to vector<8x8xf32>
    %1485 = arith.select %1482, %1484, %1480 : vector<8x8xi1>, vector<8x8xf32>
    %1486 = vector.extract_strided_slice %1485 {offsets = [0, 7], sizes = [8, 1], strides = [1, 1]} : vector<8x8xf32> to vector<8x1xf32>
    %1487 = arith.mulf %1486, %1285 : vector<8x1xf32>
    %1488 = vector.broadcast %1487 : vector<8x1xf32> to vector<8x8xf32>
    %1489 = arith.mulf %1282, %1488 : vector<8x8xf32>
    %1490 = arith.subf %1485, %1489 : vector<8x8xf32>
    %1491 = vector.shape_cast %38 : vector<1x8xi1> to vector<1x8xi1>
    %1492 = vector.broadcast %1491 : vector<1x8xi1> to vector<8x8xi1>
    %1493 = vector.shape_cast %1487 : vector<8x1xf32> to vector<8x1xf32>
    %1494 = vector.broadcast %1493 : vector<8x1xf32> to vector<8x8xf32>
    %1495 = arith.select %1492, %1494, %1490 : vector<8x8xi1>, vector<8x8xf32>
    %cst_127 = arith.constant dense<0.000000e+00> : vector<8x16xf32>
    %1496 = tpu.matmul %1495, %6, %cst_127 {dimension_numbers = #tpu.dot_dimension_numbers<[1], [0], [0], [1], [0, 0, 1, 1], [], []>} : vector<8x8xf32>, vector<8x16xf32>, vector<8x16xf32> -> vector<8x16xf32>
    %1497 = arith.addf %1496, %39 : vector<8x16xf32>
    %1498 = arith.subf %1497, %1403 : vector<8x16xf32>
    %1499 = arith.addf %1392, %1498 : vector<8x16xf32>
    %1500 = arith.subf %10, %9 : vector<1x16xf32>
    %1501 = vector.broadcast %10 : vector<1x16xf32> to vector<8x16xf32>
    %1502 = arith.subf %1501, %1499 : vector<8x16xf32>
    %cst_128 = arith.constant 0.000000e+00 : f32
    %1503 = vector.broadcast %cst_128 : f32 to vector<8x16xf32>
    %1504 = arith.maximumf %1502, %1503 : vector<8x16xf32>
    %1505 = vector.broadcast %1500 : vector<1x16xf32> to vector<8x16xf32>
    %1506 = arith.subf %1505, %1504 : vector<8x16xf32>
    %cst_129 = arith.constant 0.000000e+00 : f32
    %1507 = vector.broadcast %cst_129 : f32 to vector<8x16xf32>
    %1508 = arith.maximumf %1506, %1507 : vector<8x16xf32>
    %1509 = vector.broadcast %9 : vector<1x16xf32> to vector<8x16xf32>
    %1510 = arith.addf %1509, %1508 : vector<8x16xf32>
    %cst_130 = arith.constant 2.000000e+00 : f32
    %1511 = vector.broadcast %cst_130 : f32 to vector<8x16xf32>
    %1512 = arith.mulf %1511, %1510 : vector<8x16xf32>
    %1513 = arith.subf %1512, %1499 : vector<8x16xf32>
    %1514 = arith.addf %1513, %1 : vector<8x16xf32>
    %1515 = vector.broadcast %19 : vector<1x16xf32> to vector<8x16xf32>
    %1516 = arith.mulf %1514, %1515 : vector<8x16xf32>
    %1517 = arith.subf %1513, %39 : vector<8x16xf32>
    %1518 = arith.mulf %972, %1517 : vector<8x16xf32>
    %cst_131 = arith.constant 1.000000e+00 : f32
    %1519 = vector.broadcast %cst_131 : f32 to vector<8x16xf32>
    %1520 = arith.mulf %1519, %1516 : vector<8x16xf32>
    %1521 = arith.subf %1518, %1520 : vector<8x16xf32>
    %cst_132 = arith.constant dense<0.000000e+00> : vector<8x8xf32>
    %1522 = tpu.matmul %1521, %8, %cst_132 {dimension_numbers = #tpu.dot_dimension_numbers<[1], [0], [0], [1], [0, 0, 1, 1], [], []>} : vector<8x16xf32>, vector<16x8xf32>, vector<8x8xf32> -> vector<8x8xf32>
    %1523 = vector.extract_strided_slice %1522 {offsets = [0, 0], sizes = [8, 1], strides = [1, 1]} : vector<8x8xf32> to vector<8x1xf32>
    %1524 = arith.mulf %1523, %984 : vector<8x1xf32>
    %1525 = vector.broadcast %1524 : vector<8x1xf32> to vector<8x8xf32>
    %1526 = arith.mulf %974, %1525 : vector<8x8xf32>
    %1527 = arith.subf %1522, %1526 : vector<8x8xf32>
    %1528 = vector.shape_cast %24 : vector<1x8xi1> to vector<1x8xi1>
    %1529 = vector.broadcast %1528 : vector<1x8xi1> to vector<8x8xi1>
    %1530 = vector.shape_cast %1524 : vector<8x1xf32> to vector<8x1xf32>
    %1531 = vector.broadcast %1530 : vector<8x1xf32> to vector<8x8xf32>
    %1532 = arith.select %1529, %1531, %1527 : vector<8x8xi1>, vector<8x8xf32>
    %1533 = vector.extract_strided_slice %1532 {offsets = [0, 1], sizes = [8, 1], strides = [1, 1]} : vector<8x8xf32> to vector<8x1xf32>
    %1534 = arith.mulf %1533, %1057 : vector<8x1xf32>
    %1535 = vector.broadcast %1534 : vector<8x1xf32> to vector<8x8xf32>
    %1536 = arith.mulf %994, %1535 : vector<8x8xf32>
    %1537 = arith.subf %1532, %1536 : vector<8x8xf32>
    %1538 = vector.shape_cast %26 : vector<1x8xi1> to vector<1x8xi1>
    %1539 = vector.broadcast %1538 : vector<1x8xi1> to vector<8x8xi1>
    %1540 = vector.shape_cast %1534 : vector<8x1xf32> to vector<8x1xf32>
    %1541 = vector.broadcast %1540 : vector<8x1xf32> to vector<8x8xf32>
    %1542 = arith.select %1539, %1541, %1537 : vector<8x8xi1>, vector<8x8xf32>
    %1543 = vector.extract_strided_slice %1542 {offsets = [0, 2], sizes = [8, 1], strides = [1, 1]} : vector<8x8xf32> to vector<8x1xf32>
    %1544 = arith.mulf %1543, %1120 : vector<8x1xf32>
    %1545 = vector.broadcast %1544 : vector<8x1xf32> to vector<8x8xf32>
    %1546 = arith.mulf %1067, %1545 : vector<8x8xf32>
    %1547 = arith.subf %1542, %1546 : vector<8x8xf32>
    %1548 = vector.shape_cast %28 : vector<1x8xi1> to vector<1x8xi1>
    %1549 = vector.broadcast %1548 : vector<1x8xi1> to vector<8x8xi1>
    %1550 = vector.shape_cast %1544 : vector<8x1xf32> to vector<8x1xf32>
    %1551 = vector.broadcast %1550 : vector<8x1xf32> to vector<8x8xf32>
    %1552 = arith.select %1549, %1551, %1547 : vector<8x8xi1>, vector<8x8xf32>
    %1553 = vector.extract_strided_slice %1552 {offsets = [0, 3], sizes = [8, 1], strides = [1, 1]} : vector<8x8xf32> to vector<8x1xf32>
    %1554 = arith.mulf %1553, %1173 : vector<8x1xf32>
    %1555 = vector.broadcast %1554 : vector<8x1xf32> to vector<8x8xf32>
    %1556 = arith.mulf %1130, %1555 : vector<8x8xf32>
    %1557 = arith.subf %1552, %1556 : vector<8x8xf32>
    %1558 = vector.shape_cast %30 : vector<1x8xi1> to vector<1x8xi1>
    %1559 = vector.broadcast %1558 : vector<1x8xi1> to vector<8x8xi1>
    %1560 = vector.shape_cast %1554 : vector<8x1xf32> to vector<8x1xf32>
    %1561 = vector.broadcast %1560 : vector<8x1xf32> to vector<8x8xf32>
    %1562 = arith.select %1559, %1561, %1557 : vector<8x8xi1>, vector<8x8xf32>
    %1563 = vector.extract_strided_slice %1562 {offsets = [0, 4], sizes = [8, 1], strides = [1, 1]} : vector<8x8xf32> to vector<8x1xf32>
    %1564 = arith.mulf %1563, %1216 : vector<8x1xf32>
    %1565 = vector.broadcast %1564 : vector<8x1xf32> to vector<8x8xf32>
    %1566 = arith.mulf %1183, %1565 : vector<8x8xf32>
    %1567 = arith.subf %1562, %1566 : vector<8x8xf32>
    %1568 = vector.shape_cast %32 : vector<1x8xi1> to vector<1x8xi1>
    %1569 = vector.broadcast %1568 : vector<1x8xi1> to vector<8x8xi1>
    %1570 = vector.shape_cast %1564 : vector<8x1xf32> to vector<8x1xf32>
    %1571 = vector.broadcast %1570 : vector<8x1xf32> to vector<8x8xf32>
    %1572 = arith.select %1569, %1571, %1567 : vector<8x8xi1>, vector<8x8xf32>
    %1573 = vector.extract_strided_slice %1572 {offsets = [0, 5], sizes = [8, 1], strides = [1, 1]} : vector<8x8xf32> to vector<8x1xf32>
    %1574 = arith.mulf %1573, %1249 : vector<8x1xf32>
    %1575 = vector.broadcast %1574 : vector<8x1xf32> to vector<8x8xf32>
    %1576 = arith.mulf %1226, %1575 : vector<8x8xf32>
    %1577 = arith.subf %1572, %1576 : vector<8x8xf32>
    %1578 = vector.shape_cast %34 : vector<1x8xi1> to vector<1x8xi1>
    %1579 = vector.broadcast %1578 : vector<1x8xi1> to vector<8x8xi1>
    %1580 = vector.shape_cast %1574 : vector<8x1xf32> to vector<8x1xf32>
    %1581 = vector.broadcast %1580 : vector<8x1xf32> to vector<8x8xf32>
    %1582 = arith.select %1579, %1581, %1577 : vector<8x8xi1>, vector<8x8xf32>
    %1583 = vector.extract_strided_slice %1582 {offsets = [0, 6], sizes = [8, 1], strides = [1, 1]} : vector<8x8xf32> to vector<8x1xf32>
    %1584 = arith.mulf %1583, %1272 : vector<8x1xf32>
    %1585 = vector.broadcast %1584 : vector<8x1xf32> to vector<8x8xf32>
    %1586 = arith.mulf %1259, %1585 : vector<8x8xf32>
    %1587 = arith.subf %1582, %1586 : vector<8x8xf32>
    %1588 = vector.shape_cast %36 : vector<1x8xi1> to vector<1x8xi1>
    %1589 = vector.broadcast %1588 : vector<1x8xi1> to vector<8x8xi1>
    %1590 = vector.shape_cast %1584 : vector<8x1xf32> to vector<8x1xf32>
    %1591 = vector.broadcast %1590 : vector<8x1xf32> to vector<8x8xf32>
    %1592 = arith.select %1589, %1591, %1587 : vector<8x8xi1>, vector<8x8xf32>
    %1593 = vector.extract_strided_slice %1592 {offsets = [0, 7], sizes = [8, 1], strides = [1, 1]} : vector<8x8xf32> to vector<8x1xf32>
    %1594 = arith.mulf %1593, %1285 : vector<8x1xf32>
    %1595 = vector.broadcast %1594 : vector<8x1xf32> to vector<8x8xf32>
    %1596 = arith.mulf %1282, %1595 : vector<8x8xf32>
    %1597 = arith.subf %1592, %1596 : vector<8x8xf32>
    %1598 = vector.shape_cast %38 : vector<1x8xi1> to vector<1x8xi1>
    %1599 = vector.broadcast %1598 : vector<1x8xi1> to vector<8x8xi1>
    %1600 = vector.shape_cast %1594 : vector<8x1xf32> to vector<8x1xf32>
    %1601 = vector.broadcast %1600 : vector<8x1xf32> to vector<8x8xf32>
    %1602 = arith.select %1599, %1601, %1597 : vector<8x8xi1>, vector<8x8xf32>
    %cst_133 = arith.constant dense<0.000000e+00> : vector<8x16xf32>
    %1603 = tpu.matmul %1602, %6, %cst_133 {dimension_numbers = #tpu.dot_dimension_numbers<[1], [0], [0], [1], [0, 0, 1, 1], [], []>} : vector<8x8xf32>, vector<8x16xf32>, vector<8x16xf32> -> vector<8x16xf32>
    %1604 = arith.addf %1603, %39 : vector<8x16xf32>
    %1605 = arith.subf %1604, %1510 : vector<8x16xf32>
    %1606 = arith.addf %1499, %1605 : vector<8x16xf32>
    %cst_134 = arith.constant dense<0.000000e+00> : vector<8x128xf32>
    %1607 = tpu.matmul %1606, %13, %cst_134 {dimension_numbers = #tpu.dot_dimension_numbers<[1], [0], [0], [1], [0, 0, 1, 1], [], []>} : vector<8x16xf32>, vector<16x128xf32>, vector<8x128xf32> -> vector<8x128xf32>
    %cst_135 = arith.constant dense<0.000000e+00> : vector<8x128xf32>
    %1608 = tpu.matmul %1605, %14, %cst_135 {dimension_numbers = #tpu.dot_dimension_numbers<[1], [0], [0], [1], [0, 0, 1, 1], [], []>} : vector<8x16xf32>, vector<16x128xf32>, vector<8x128xf32> -> vector<8x128xf32>
    %1609 = arith.addf %1607, %1608 : vector<8x128xf32>
    %c0_136 = arith.constant 0 : index
    %c0_137 = arith.constant 0 : index
    %1610 = vector.load %arg7[%c0_136, %c0_137] : memref<8x128xf32, #tpu.memory_space<vmem>>, vector<8x128xf32>
    tpu.vector_store %arg7[%c0_136, %c0_137], %1609 {strides = array<i32>} : memref<8x128xf32, #tpu.memory_space<vmem>>, vector<8x128xf32>,
    return
  }
}

</mosaic_0001>

<bundles_post_ra>
// kernel: parametric_dr_forward.1
= control target key start
LH: loop header
LB: loop body
LE: loop exit
PB: predicated region body
PF: predicated region fallthrough
CT: control target
= control target key end

     0   :  { %12 = vsyncpa [#allocation5], 0  ;;  %s5788_s0 = inlined_call_operand.vmem [shape: f32[8,16], index: 0, kind: input, shape index: {}]   ;;  %s5789_s1 = inlined_call_operand.vmem [shape: f32[8,16], index: 1, kind: input, shape index: {}]   ;;  %s5790_s2 = inlined_call_operand.hbm [shape: f32[592,16], index: 2, kind: input, shape index: {}]   ;;  %s5791_s3 = inlined_call_operand.hbm [shape: f32[64,128], index: 3, kind: input, shape index: {}]   ;;  %s5792_s4 = inlined_call_operand.hbm [shape: f32[192,160], index: 4, kind: input, shape index: {}]   ;;  %s5793_s5 = inlined_call_operand.hbm [shape: f32[208,160], index: 5, kind: input, shape index: {}]   ;;  %s5794_s6 = inlined_call_operand.hbm [shape: f32[192,160], index: 6, kind: input, shape index: {}]   ;;  %s5795_s7 = inlined_call_operand.vmem [shape: f32[8,128], index: 7, kind: output, shape index: {}]  }
   0x1   :  { %13 = vsyncpa [#allocation7], 0 }
   0x2   :  { %14 = vsyncpa [#allocation10], 0  ;;  %s4687_s24 = smov [#allocation6]   ;;  %s4688_s26 = smov [#allocation4]  }
   0x3   :  { %s36_s25 = sshll.u32 %s4687_s24, 4  ;;  %s24_s27 = sshll.u32 %s4688_s26, 4  ;;  %s37_s25 = int_to_ptr.vmem [resolvable:$true] %s36_s25  ;;  %s4766_s27 = int_to_ptr.vmem [resolvable:$true] %s24_s27 }
   0x4   :  { %s4569_s30 = scalar_lea.hbm %s5791_s3, 1024 }
   0x5   :  { %p4570_p0 = scmp.ne.s32.totalorder %s5791_s3, %s4569_s30  ;;  %p4573_p1 = scmp.lt.u32.totalorder %s4569_s30, %s5791_s3 }
   0x7   :  { %p4575_p2 = pnand %p4573_p1, %p4570_p0 }
   0x9   :  { %4578 = shalt.err (!%p4575_p2)
}
   0xa   :  { %s4579_s12 = scalar_lea.vmem %s37_s25, 1024  ;;  %p4584_p4 = scmp.lt.s32.totalorder %s37_s25, %s37_s25 }
   0xb   :  { %p4580_p3 = scmp.ne.s32.totalorder %s37_s25, %s4579_s12  ;;  %p4585_p5 = scmp.lt.s32.totalorder %s4579_s12, %s4579_s12 }
   0xd   :  { %p4586_p6 = por %p4585_p5, %p4584_p4 }
   0xf   :  { %p4587_p7 = pnand %p4586_p6, %p4580_p3 }
  0x11   :  { %4590 = shalt.err (!%p4587_p7)
}
  0x12   :  { %s4689_s13 = smov 128   ;;  %s4690_s14 = smov 8  }
  0x13   :  { %42 = dma.hbm_to_vmem [thread:$0]  %s5791_s3, 1024, %s37_s25, [#allocation7], %s4689_s13, %s4689_s13, %s4690_s14  }
  0x14   :  { %s4591_s19 = scalar_lea.hbm %s5790_s2, 9472 }
  0x15   :  { %p4592_p8 = scmp.ne.s32.totalorder %s5790_s2, %s4591_s19  ;;  %p4595_p9 = scmp.lt.u32.totalorder %s4591_s19, %s5790_s2 }
  0x17   :  { %p4597_p10 = pnand %p4595_p9, %p4592_p8 }
  0x19   :  { %4600 = shalt.err (!%p4597_p10)
}
  0x1a   :  { %s4601_s24 = scalar_lea.vmem %s4766_s27, 9472  ;;  %p4606_p12 = scmp.lt.s32.totalorder %s4766_s27, %s4766_s27 }
  0x1b   :  { %p4602_p11 = scmp.ne.s32.totalorder %s4766_s27, %s4601_s24  ;;  %p4607_p13 = scmp.lt.s32.totalorder %s4601_s24, %s4601_s24 }
  0x1d   :  { %p4608_p0 = por %p4607_p13, %p4606_p12 }
  0x1f   :  { %p4609_p1 = pnand %p4608_p0, %p4602_p11 }
  0x21   :  { %4612 = shalt.err (!%p4609_p1)
}
  0x22   :  { %30 = dma.hbm_to_vmem [thread:$0]  %s5790_s2, 9472, %s4766_s27, [#allocation5], %s4689_s13, %s4689_s13, %s4690_s14  }
  0x23   :  { %s4691_s26 = smov [#allocation8]   ;;  %s4613_s8 = scalar_lea.hbm %s5792_s4, 6144 }
  0x24   :  { %s48_s28 = sshll.u32 %s4691_s26, 4  ;;  %p4614_p2 = scmp.ne.s32.totalorder %s5792_s4, %s4613_s8  ;;  %s49_s28 = int_to_ptr.vmem [resolvable:$true] %s48_s28 }
  0x25   :  { %p4617_p3 = scmp.lt.u32.totalorder %s4613_s8, %s5792_s4 }
  0x27   :  { %p4619_p4 = pnand %p4617_p3, %p4614_p2 }
  0x29   :  { %4622 = shalt.err (!%p4619_p4)
}
  0x2a   :  { %s4623_s15 = scalar_lea.vmem %s49_s28, 6144  ;;  %p4628_p6 = scmp.lt.s32.totalorder %s49_s28, %s49_s28 }
  0x2b   :  { %p4624_p5 = scmp.ne.s32.totalorder %s49_s28, %s4623_s15  ;;  %p4629_p7 = scmp.lt.s32.totalorder %s4623_s15, %s4623_s15 }
  0x2d   :  { %p4630_p8 = por %p4629_p7, %p4628_p6 }
  0x2f   :  { %p4631_p9 = pnand %p4630_p8, %p4624_p5 }
  0x31   :  { %4634 = shalt.err (!%p4631_p9)
}
  0x32   :  { %s4692_s2 = smov 256   ;;  %s4693_s27 = smov 16  }
  0x33   :  { %54 = dma.hbm_to_vmem [thread:$0]  %s5792_s4, 6144, %s49_s28, [#allocation7], %s4692_s2, %s4692_s2, %s4693_s27  }
  0x34   :  { %s4694_s17 = smov [#allocation9]   ;;  %s4635_s21 = scalar_lea.hbm %s5793_s5, 6656 }
  0x35   :  { %s60_s18 = sshll.u32 %s4694_s17, 4  ;;  %p4636_p10 = scmp.ne.s32.totalorder %s5793_s5, %s4635_s21  ;;  %s61_s18 = int_to_ptr.vmem [resolvable:$true] %s60_s18 }
  0x36   :  { %p4639_p11 = scmp.lt.u32.totalorder %s4635_s21, %s5793_s5 }
  0x38   :  { %p4641_p12 = pnand %p4639_p11, %p4636_p10 }
  0x3a   :  { %4644 = shalt.err (!%p4641_p12)
}
  0x3b   :  { %s4645_s25 = scalar_lea.vmem %s61_s18, 6656  ;;  %p4650_p0 = scmp.lt.s32.totalorder %s61_s18, %s61_s18 }
  0x3c   :  { %p4646_p13 = scmp.ne.s32.totalorder %s61_s18, %s4645_s25  ;;  %p4651_p1 = scmp.lt.s32.totalorder %s4645_s25, %s4645_s25 }
  0x3e   :  { %p4652_p2 = por %p4651_p1, %p4650_p0 }
  0x40   :  { %p4653_p3 = pnand %p4652_p2, %p4646_p13 }
  0x42   :  { %4656 = shalt.err (!%p4653_p3)
}
  0x43   :  { %66 = dma.hbm_to_vmem [thread:$0]  %s5793_s5, 6656, %s61_s18, [#allocation10], %s4692_s2, %s4692_s2, %s4693_s27  }
  0x44   :  { %4679 = dma.done.wait [#allocation5], 9472  }
  0x45   :  { %4680 = vsyncadd [#allocation5], 4294957824 }
  0x46   :  { %4681 = dma.done.wait [#allocation7], 7168  }
  0x47   :  { %4682 = vsyncadd [#allocation7], 4294960128 }
  0x48   :  { %4683 = dma.done.wait [#allocation10], 6656  }
  0x49   :  { %4684 = vsyncadd [#allocation10], 4294960640  ;;  %v4695_v0 = vmov 0.0   ;;  %vm4696_vm0 = vmmov 0   ;;  %v4828_v1 = vld [vmem:[#allocation6 + $0x20] sm:$0xff]  ;;  %v4830_v2 = vld [vmem:[#allocation6 + $0x28] sm:$0xff] }
  0x4a   :  { %4019 = vmatprep.subr.mxu0 %v4695_v0  ;;  %4021 = vmatprep.mubr.msk.f32.mxu0 %vm4696_vm0, %v4695_v0  ;;  %v4832_v3 = vld [vmem:[#allocation6 + $0x30] sm:$0xff]  ;;  %v4834_v4 = vld [vmem:[#allocation6 + $0x38] sm:$0xff]  ;;  %v4839_v5 = vld [vmem:[%s5789_s1] sm:$0xff]  ;;  %s4697_s29 = smov 120   ;;  %vm128_vm1 = vcmask 64512   ;;  %vm218_vm2 = vcmask 130048  }
  0x4b   :  { %v92_v6 = vld [vmem:[#allocation4] sm:$0xff]  ;;  %126 = vrot.lane.b32.xlu0 %v4839_v5, %s4697_s29  ;;  %v202_v7 = vld [vmem:[#allocation8 + $0x8] sm:$0xff]  ;;  %v204_v8 = vld [vmem:[#allocation8 + $0x18] sm:$0xff]  ;;  %vm368_vm3 = vcmask 261120   ;;  %s4702_s9 = smov 32   ;;  %s4703_s10 = smov 40  }
  0x4c   :  { %4020 = vmatpush3.msra.mxu0 %v92_v6  ;;  %v4126_v9 = vpack.c.bf16 %v204_v8, %v202_v7  ;;  %v201_v10 = vld [vmem:[#allocation8] sm:$0xff]  ;;  %v203_v11 = vld [vmem:[#allocation8 + $0x10] sm:$0xff]  ;;  %v293_v12 = vld [vmem:[#allocation8 + $0x38] sm:$0xff]  ;;  %s4704_s11 = smov 48   ;;  %s4705_s12 = smov 56  }
  0x4d   :  { %v295_v13 = vld [vmem:[#allocation8 + $0x48] sm:$0xff]  ;;  %v4128_v14 = vpack.c.bf16 %v203_v11, %v201_v10  ;;  %v292_v16 = vld [vmem:[#allocation8 + $0x30] sm:$0xff]  ;;  %v294_v17 = vld [vmem:[#allocation8 + $0x40] sm:$0xff]  ;;  %s4713_s15 = smov 104   ;;  %s4714_s2 = smov 112  }
  0x4e   :  { %4127 = vmatprep.subr.bf16.mxu0 %v4126_v9  ;;  %v4130_v15 = vpack.c.bf16 %v295_v13, %v293_v12  ;;  %v297_v19 = vld [vmem:[#allocation8 + $0x58] sm:$0xff]  ;;  %v299_v20 = vld [vmem:[#allocation8 + $0x68] sm:$0xff]  ;;  %v4132_v21 = vpack.c.bf16 %v294_v17, %v292_v16  ;;  %v296_v23 = vld [vmem:[#allocation8 + $0x50] sm:$0xff]  ;;  %s4715_s13 = smov 96   ;;  %s4716_s16 = smov 80  }
  0x4f   :  { %v4134_v22 = vpack.c.bf16 %v299_v20, %v297_v19  ;;  %v298_v24 = vld [vmem:[#allocation8 + $0x60] sm:$0xff]  ;;  %v301_v25 = vld [vmem:[#allocation8 + $0x78] sm:$0xff]  ;;  %v303_v26 = vld [vmem:[#allocation8 + $0x88] sm:$0xff]  ;;  %v4698_v19 = vmov 0.0|0.0   ;;  %s4717_s17 = smov 88   ;;  %s4718_s18 = smov 72  }
  0x50   :  { %v4136_v27 = vpack.c.bf16 %v298_v24, %v296_v23  ;;  %v4138_v28 = vpack.c.bf16 %v303_v26, %v301_v25  ;;  %v300_v29 = vld [vmem:[#allocation8 + $0x70] sm:$0xff]  ;;  %v302_v30 = vld [vmem:[#allocation8 + $0x80] sm:$0xff]  ;;  %v305_v31 = vld [vmem:[#allocation8 + $0x98] sm:$0xff]  ;;  %4170 = vmatprep.subr.bf16.mxu1 %v4698_v19  ;;  %s4657_s24 = scalar_lea.hbm %s5794_s6, 6144 }
  0x51   :  { %v307_v32 = vld [vmem:[#allocation8 + $0xa8] sm:$0xff]  ;;  %v4140_v33 = vpack.c.bf16 %v302_v30, %v300_v29  ;;  %v304_v35 = vld [vmem:[#allocation8 + $0x90] sm:$0xff]  ;;  %v306_v36 = vld [vmem:[#allocation8 + $0xa0] sm:$0xff]  ;;  %p4658_p4 = scmp.ne.s32.totalorder %s5794_s6, %s4657_s24  ;;  %p4661_p5 = scmp.lt.u32.totalorder %s4657_s24, %s5794_s6 }
  0x52   :  { %v4142_v34 = vpack.c.bf16 %v307_v32, %v305_v31  ;;  %v309_v37 = vld [vmem:[#allocation8 + $0xb8] sm:$0xff]  ;;  %v311_v38 = vld [vmem:[#allocation8 + $0xc8] sm:$0xff]  ;;  %v4144_v39 = vpack.c.bf16 %v306_v36, %v304_v35  ;;  %v308_v41 = vld [vmem:[#allocation8 + $0xb0] sm:$0xff] }
  0x53   :  { %v4146_v40 = vpack.c.bf16 %v311_v38, %v309_v37  ;;  %v310_v42 = vld [vmem:[#allocation8 + $0xc0] sm:$0xff]  ;;  %v313_v43 = vld [vmem:[#allocation8 + $0xd8] sm:$0xff]  ;;  %v315_v44 = vld [vmem:[#allocation8 + $0xe8] sm:$0xff]  ;;  %p4663_p6 = pnand %p4661_p5, %p4658_p4 }
  0x54   :  { %v4148_v45 = vpack.c.bf16 %v310_v42, %v308_v41  ;;  %v4150_v46 = vpack.c.bf16 %v315_v44, %v313_v43  ;;  %v312_v47 = vld [vmem:[#allocation8 + $0xd0] sm:$0xff]  ;;  %v314_v48 = vld [vmem:[#allocation8 + $0xe0] sm:$0xff]  ;;  %v317_v49 = vld [vmem:[#allocation8 + $0xf8] sm:$0xff]  ;;  %v111_v41 = vlaneseq }
  0x55   :  { %v319_v50 = vld [vmem:[#allocation8 + $0x108] sm:$0xff]  ;;  %v4152_v51 = vpack.c.bf16 %v314_v48, %v312_v47  ;;  %v316_v53 = vld [vmem:[#allocation8 + $0xf0] sm:$0xff]  ;;  %v318_v54 = vld [vmem:[#allocation8 + $0x100] sm:$0xff] }
  0x56   :  { %v4154_v52 = vpack.c.bf16 %v319_v50, %v317_v49  ;;  %v321_v55 = vld [vmem:[#allocation8 + $0x118] sm:$0xff]  ;;  %v323_v56 = vld [vmem:[#allocation8 + $0x128] sm:$0xff]  ;;  %v4156_v57 = vpack.c.bf16 %v318_v54, %v316_v53  ;;  %v320_v59 = vld [vmem:[#allocation8 + $0x110] sm:$0xff]  ;;  %v209_v42 = vshrl.u32 %v111_v41, 7 }
  0x57   :  { %v4158_v58 = vpack.c.bf16 %v323_v56, %v321_v55  ;;  %v322_v60 = vld [vmem:[#allocation8 + $0x120] sm:$0xff]  ;;  %v325_v62 = vld [vmem:[#allocation8 + $0x138] sm:$0xff]  ;;  %v327_v63 = vld [vmem:[#allocation8 + $0x148] sm:$0xff] }
  0x58   :  { %v4160_v61 = vpack.c.bf16 %v322_v60, %v320_v59  ;;  %v4162_v6 = vpack.c.bf16 %v327_v63, %v325_v62  ;;  %v324_v7 = vld [vmem:[#allocation8 + $0x130] sm:$0xff]  ;;  %v326_v8 = vld [vmem:[#allocation8 + $0x140] sm:$0xff]  ;;  %v329_v10 = vld [vmem:[#allocation8 + $0x158] sm:$0xff]  ;;  %v4858_v44 = vsub.s32 1, %v209_v42 }
  0x59   :  { %v4164_v9 = vpack.c.bf16 %v326_v8, %v324_v7  ;;  %v331_v11 = vld [vmem:[#allocation8 + $0x168] sm:$0xff]  ;;  %v328_v13 = vld [vmem:[#allocation8 + $0x150] sm:$0xff]  ;;  %v340_v26 = vld [vmem:[#allocation4 + $0x88] sm:$0xff] }
  0x5a   :  { %v4166_v12 = vpack.c.bf16 %v331_v11, %v329_v10  ;;  %v334_v16 = vld [vmem:[#allocation4 + $0x58] sm:$0xff]  ;;  %v335_v17 = vld [vmem:[#allocation4 + $0x60] sm:$0xff]  ;;  %v344_v32 = vld [vmem:[#allocation4 + $0xa8] sm:$0xff] }
  0x5b   :  { %v4171_v20 = vpack.c.bf16 %v335_v17, %v334_v16  ;;  %v338_v23 = vld [vmem:[#allocation4 + $0x78] sm:$0xff]  ;;  %v339_v24 = vld [vmem:[#allocation4 + $0x80] sm:$0xff]  ;;  %v348_v38 = vld [vmem:[#allocation4 + $0xc8] sm:$0xff] }
  0x5c   :  { %v4177_v25 = vpack.c.bf16 %v339_v24, %v338_v23  ;;  %v342_v29 = vld [vmem:[#allocation4 + $0x98] sm:$0xff]  ;;  %v343_v30 = vld [vmem:[#allocation4 + $0xa0] sm:$0xff]  ;;  %v352_v59 = vld [vmem:[#allocation4 + $0xe8] sm:$0xff] }
  0x5d   :  { %4172 = vmatpush1.bf16.msra.mxu1 %v4171_v20  ;;  %v4183_v31 = vpack.c.bf16 %v343_v30, %v342_v29  ;;  %v346_v35 = vld [vmem:[#allocation4 + $0xb8] sm:$0xff]  ;;  %v347_v36 = vld [vmem:[#allocation4 + $0xc0] sm:$0xff]  ;;  %v353_v60 = vld [vmem:[#allocation4 + $0xf0] sm:$0xff] }
  0x5e   :  { %4173 = vmatprep.subr.bf16.mxu1 %v4698_v19  ;;  %v4189_v37 = vpack.c.bf16 %v347_v36, %v346_v35  ;;  %v206_v43 = vld [vmem:[#allocation8 + $0x20] ss:$8 sm:$0x3]  ;;  %v333_v62 = vld [vmem:[#allocation8 + $0x170] ss:$8 sm:$0x3] }
  0x5f   :  { %v215_v49 = vrot.slane %v206_v43, %v4858_v44  ;;  %v350_v56 = vld [vmem:[#allocation4 + $0xd8] sm:$0xff]  ;;  %v100_v17 = vld [vmem:[#allocation4 + $0x40] sm:$0xff]  ;;  %v102_v20 = vld [vmem:[#allocation4 + $0x50] sm:$0x1] }
  0x60   :  { %v99_v16 = vld [vmem:[#allocation4 + $0x38] sm:$0xff]  ;;  %v4890_v23 = vld [vmem:[%s5788_s0] sm:$0xff]  ;;  %v101_v24 = vld [vmem:[#allocation4 + $0x48] sm:$0x1]  ;;  %s4701_s0 = smov 24  }
  0xbd   :  { %v127_v18 = vpop.permute.xlu0 %126 }
  0xbe   :  { %4022 = vmatmul.mubr.msk.f32.vlgmr.msra.gmra.mrb[0].mxu0 %vm128_vm1, %v127_v18  ;;  %v336_v18 = vld [vmem:[#allocation4 + $0x68] sm:$0xff] }
  0xbf   :  { %4129 = vmatpush1.bf16.msra.mxu0 %v4128_v14  ;;  %285 = vmatprep.mubr.f32.mxu0 %v4695_v0  ;;  %v330_v14 = vld [vmem:[#allocation8 + $0x160] sm:$0xff] }
  0xc0   :  { %4131 = vmatprep.subr.bf16.mxu0 %v4130_v15  ;;  %v4168_v15 = vpack.c.bf16 %v330_v14, %v328_v13  ;;  %v105_v13 = vld [vmem:[#allocation6 + $0x10] sm:$0xff]  ;;  %v106_v14 = vld [vmem:[#allocation6 + $0x18] sm:$0xff] }
  0xc2   :  { %3944 = vmatmul.mubr.msk.f32.vlgmr.msra.gmra.mrb[2].mxu0 %vm218_vm2, %v4839_v5 }
  0xc3   :  { %4133 = vmatpush1.bf16.msra.mxu0 %v4132_v21  ;;  %v337_v21 = vld [vmem:[#allocation4 + $0x70] sm:$0xff] }
  0xc4   :  { %4135 = vmatprep.subr.bf16.mxu0 %v4134_v22  ;;  %v4174_v22 = vpack.c.bf16 %v337_v21, %v336_v18  ;;  %v4880_v18 = vpack.c.bf16 %v100_v17, %v99_v16  ;;  %v3946_v21 = vld [vmem:[#allocation4 + $0xf8] ss:$0 sm:$0xff]  ;;  %v4707_v17 = vmov 48  }
  0xc6   :  { %4175 = vmatpush1.bf16.msra.mxu1 %v4174_v22 }
  0xc7   :  { %4137 = vmatpush1.bf16.msra.mxu0 %v4136_v27  ;;  %4176 = vmatprep.subr.bf16.mxu1 %v4698_v19  ;;  %v341_v27 = vld [vmem:[#allocation4 + $0x90] sm:$0xff] }
  0xc8   :  { %4139 = vmatprep.subr.bf16.mxu0 %v4138_v28  ;;  %v4180_v28 = vpack.c.bf16 %v341_v27, %v340_v26 }
  0xca   :  { %4178 = vmatpush1.bf16.msra.mxu1 %v4177_v25 }
  0xcb   :  { %4141 = vmatpush1.bf16.msra.mxu0 %v4140_v33  ;;  %4179 = vmatprep.subr.bf16.mxu1 %v4698_v19  ;;  %v345_v33 = vld [vmem:[#allocation4 + $0xb0] sm:$0xff] }
  0xcc   :  { %4143 = vmatprep.subr.bf16.mxu0 %v4142_v34  ;;  %v4186_v34 = vpack.c.bf16 %v345_v33, %v344_v32 }
  0xce   :  { %4181 = vmatpush1.bf16.msra.mxu1 %v4180_v28  ;;  %v962_v28 = vsub.f32 %v102_v20, %v101_v24 }
  0xcf   :  { %4145 = vmatpush1.bf16.msra.mxu0 %v4144_v39  ;;  %4182 = vmatprep.subr.bf16.mxu1 %v4698_v19  ;;  %v349_v39 = vld [vmem:[#allocation4 + $0xd0] sm:$0xff] }
  0xd0   :  { %4147 = vmatprep.subr.bf16.mxu0 %v4146_v40  ;;  %v4192_v40 = vpack.c.bf16 %v349_v39, %v348_v38 }
  0xd2   :  { %4184 = vmatpush1.bf16.msra.mxu1 %v4183_v31 }
  0xd3   :  { %4149 = vmatpush1.bf16.msra.mxu0 %v4148_v45  ;;  %4185 = vmatprep.subr.bf16.mxu1 %v4698_v19  ;;  %v4860_v45 = vsub.s32 0, %v209_v42 }
  0xd4   :  { %4151 = vmatprep.subr.bf16.mxu0 %v4150_v46 }
  0xd5   :  { %v211_v48 = vrot.slane %v206_v43, %v4860_v45  ;;  %v361_v63 = vrot.slane %v333_v62, %v4860_v45  ;;  %v4885_v22 = vrot.slane %v102_v20, %v4860_v45  ;;  %v4895_v33 = vrot.slane %v962_v28, %v4860_v45 }
  0xd6   :  { %4187 = vmatpush1.bf16.msra.mxu1 %v4186_v34  ;;  %v4899_v36 = vrot.slane %v101_v24, %v4860_v45  ;;  %v4708_v20 = vmov 32   ;;  %v4710_v28 = vmov 56  }
  0xd7   :  { %4153 = vmatpush1.bf16.msra.mxu0 %v4152_v51  ;;  %4188 = vmatprep.subr.bf16.mxu1 %v4698_v19  ;;  %v967_v29 = vsub.f32 %v4885_v22, %v4890_v23 }
  0xd8   :  { %4155 = vmatprep.subr.bf16.mxu0 %v4154_v52 }
  0xd9   :  { %v968_v32 = vmax.f32 %v967_v29, 0.0 }
  0xda   :  { %4190 = vmatpush1.bf16.msra.mxu1 %v4189_v37 }
  0xdb   :  { %4157 = vmatpush1.bf16.msra.mxu0 %v4156_v57  ;;  %4191 = vmatprep.subr.bf16.mxu1 %v4698_v19  ;;  %v351_v57 = vld [vmem:[#allocation4 + $0xe0] sm:$0xff]  ;;  %v973_v34 = vsub.f32 %v4895_v33, %v968_v32 }
  0xdc   :  { %4159 = vmatprep.subr.bf16.mxu0 %v4158_v58  ;;  %v4195_v58 = vpack.c.bf16 %v351_v57, %v350_v56  ;;  %v4699_v56 = vmov 8  }
  0xdd   :  { %v974_v35 = vmax.f32 %v973_v34, 0.0  ;;  %4428 = vset.pattern.permute.xlu1 %v4699_v56 }
  0xde   :  { %4193 = vmatpush1.bf16.msra.mxu1 %v4192_v40  ;;  %v4905_v40 = vand.u32 127, %v111_v41 }
  0xdf   :  { %4161 = vmatpush1.bf16.msra.mxu0 %v4160_v61  ;;  %4194 = vmatprep.subr.bf16.mxu1 %v4698_v19  ;;  %v4198_v61 = vpack.c.bf16 %v353_v60, %v352_v59  ;;  %v4902_v39 = vadd.f32 %v4899_v36, %v974_v35  ;;  %v4700_v59 = vmov 24  }
  0xe0   :  { %4163 = vmatprep.subr.bf16.mxu0 %v4162_v6  ;;  %v365_v6 = vrot.slane %v333_v62, %v4858_v44  ;;  %vm113_vm4 = vcmp.lt.s32.totalorder %v4905_v40, 8  ;;  %4430 = vset.pattern.permute.xlu0 %v4700_v59  ;;  %vm117_vm5 = vcmp.eq.s32.totalorder %v4905_v40, 0  ;;  %vm118_vm6 = vcmp.eq.s32.totalorder %v4905_v40, 1 }
  0xe1   :  { %v980_v42 = vmul.f32 2.0, %v4902_v39  ;;  %vm119_vm7 = vcmp.eq.s32.totalorder %v4905_v40, 2  ;;  %vm120_vm8 = vcmp.eq.s32.totalorder %v4905_v40, 3  ;;  %vm121_vm9 = vcmp.eq.s32.totalorder %v4905_v40, 4 }
  0xe2   :  { %4196 = vmatpush1.bf16.msra.mxu1 %v4195_v58  ;;  %vm122_vm10 = vcmp.eq.s32.totalorder %v4905_v40, 5  ;;  %vm123_vm11 = vcmp.eq.s32.totalorder %v4905_v40, 6  ;;  %vm124_vm12 = vcmp.eq.s32.totalorder %v4905_v40, 7 }
  0xe3   :  { %4165 = vmatpush1.bf16.msra.mxu0 %v4164_v9  ;;  %4197 = vmatprep.subr.bf16.mxu1 %v4698_v19  ;;  %v981_v43 = vsub.f32 %v980_v42, %v4890_v23 }
  0xe4   :  { %4167 = vmatprep.subr.bf16.mxu0 %v4166_v12 }
  0xe6   :  { %4199 = vmatpush1.bf16.msra.mxu1 %v4198_v61 }
  0xe7   :  { %4169 = vmatpush1.bf16.msra.mxu0 %v4168_v15  ;;  %4203 = vmatprep.subr.bf16.mxu1 %v4698_v19  ;;  %v4876_v15 = vpack.c.bf16 %v106_v14, %v105_v13 }
  0xe8   :  { %4200 = vmatprep.subr.bf16.mxu0 %v4698_v19 }
 0x191   :  { %v4862_v46 = vpop.f32.mrb[0].mxu0 }
 0x192   :  { %v4023_v47 = vpop.f32.mrb[1].mxu0 }
 0x193   :  { %v982_v47 = vadd.f32 %v981_v43, %v4839_v5 }
 0x195   :  { %v287_v50 = vpop.f32.mrb[2].mxu0 }
 0x196   :  { %v288_v51 = vadd.f32 %v287_v50, %v211_v48  ;;  %v289_v52 = vpop.f32.mrb[3].mxu0 }
 0x197   :  { %v290_v53 = vadd.f32 %v289_v52, %v215_v49  ;;  %v4912_v49 = vsel %vm113_vm4, 1.0, %v4695_v0  ;;  %v984_v52 = vsub.f32 %v981_v43, %v4862_v46 }
 0x198   :  { %v355_v55 = vmax.f32 %v288_v51, 0.0  ;;  %v983_v51 = vmul.f32 %v4912_v49, %v982_v47 }
 0x199   :  { %v356_v54 = vmax.f32 %v290_v53, 0.0 }
 0x19b   :  { %3945 = vmatprep.mubr.msk.f32.mxu0 %vm368_vm3, %v356_v54 }
 0x19c   :  { %437 = vmatmul.mubr.f32.vlgmr.msra.gmra.mrb[4].mxu0 %v355_v55 }
 0x19d   :  { %4028 = vmatprep.mubr.msk.f32.mxu0 %vm4696_vm0, %v4695_v0  ;;  %4202 = vmatpush3.bf16.msra.mxu0 %v4876_v15 }
 0x19e   :  { %4038 = vmatprep.subr.mxu0 %v4695_v0 }
 0x26f   :  { %v438_v7 = vpop.f32.mrb[4].mxu0 }
 0x270   :  { %v439_v8 = vadd.f32 %v438_v7, %v361_v63  ;;  %v440_v9 = vpop.f32.mrb[5].mxu0 }
 0x271   :  { %v441_v10 = vadd.f32 %v440_v9, %v365_v6 }
 0x272   :  { %v443_v12 = vmax.f32 %v439_v8, 0.0 }
 0x273   :  { %v444_v11 = vmax.f32 %v441_v10, 0.0 }
 0x275   :  { %3947 = vmatprep.mubr.msk.f32.mxu1 %vm368_vm3, %v444_v11 }
 0x276   :  { %517 = vmatmul.mubr.f32.vlgmr.msra.gmra.mrb[0].mxu1 %v443_v12  ;;  %v4706_v12 = vmov 16  }
 0x277   :  { %4035 = vmatprep.mubr.msk.f32.mxu1 %vm4696_vm0, %v4695_v0  ;;  %4205 = vmatpush3.bf16.msra.mxu1 %v4880_v18 }
 0x278   :  { %4206 = vmatprep.subr.bf16.mxu1 %v4698_v19 }
 0x349   :  { %v518_v25 = vpop.f32.mrb[0].mxu1 }
 0x34a   :  { %v519_v26 = vadd.f32 %v3946_v21, %v518_v25  ;;  %v520_v27 = vpop.f32.mrb[1].mxu1  ;;  %v4709_v25 = vmov 40  }
 0x34c   :  { %v522_v30 = vsub.f32 0.0, %v519_v26 }
 0x34e   :  { %v523_v31 = vmul.f32 1.442695, %v522_v30 }
 0x350   :  { %4471 = vpow2.f32 %v523_v31 }
 0x35a   :  { %v4472_v37 = vpop.eup %4471 }
 0x35b   :  { %v525_v38 = vadd.f32 1.0, %v4472_v37  ;;  %v4711_v37 = vmov 0  }
 0x35d   :  { %4473 = vrcp.f32 %v525_v38 }
 0x367   :  { %v4474_v48 = vpop.eup %4473 }
 0x368   :  { %v527_v50 = vmul.f32 1e+08, %v4474_v48 }
 0x36a   :  { %v528_v53 = vadd.f32 1e-08, %v527_v50 }
 0x36c   :  { %v985_v41 = vmul.f32 %v984_v52, %v528_v53  ;;  %4029 = vmatmul.mubr.msk.f32.vlgmr.msra.gmra.mrb[6].mxu0 %vm218_vm2, %v528_v53 }
 0x36d   :  { %4040 = vmatprep.mubr.msk.f32.mxu0 %vm4696_vm0, %v4695_v0 }
 0x36e   :  { %v986_v54 = vsub.f32 %v985_v41, %v983_v51 }
 0x370   :  { %4036 = vmatmul.mubr.msk.f32.vlgmr.msra.gmra.mrb[2].mxu1 %vm218_vm2, %v986_v54  ;;  %v4712_v54 = vmov 1  }
 0x371   :  { %4047 = vmatprep.mubr.msk.f32.mxu1 %vm4696_vm0, %v4695_v0 }
 0x43f   :  { %v4922_v55 = vpop.f32.mrb[6].mxu0 }
 0x440   :  { %4475 = vrcp.f32 %v4922_v55  ;;  %v4030_v57 = vpop.f32.mrb[7].mxu0 }
 0x443   :  { %v4926_v58 = vpop.f32.mrb[2].mxu1 }
 0x444   :  { %v4037_v60 = vpop.f32.mrb[3].mxu1 }
 0x44a   :  { %v4476_v61 = vpop.eup %4475 }
 0x44b   :  { %v4930_v62 = vmul.f32 %v4476_v61, %v4926_v58  ;;  %627 = vrot.lane.b32.xlu1 %v4476_v61, %s4693_s27  ;;  %605 = vrot.lane.b32.xlu0 %v4476_v61, %s4690_s14 }
 0x44f   :  { %647 = vrot.lane.b32.xlu1 %v4476_v61, %s4701_s0  ;;  %667 = vrot.lane.b32.xlu0 %v4476_v61, %s4702_s9 }
 0x453   :  { %687 = vrot.lane.b32.xlu1 %v4476_v61, %s4703_s10  ;;  %707 = vrot.lane.b32.xlu0 %v4476_v61, %s4704_s11 }
 0x457   :  { %727 = vrot.lane.b32.xlu0 %v4476_v61, %s4705_s12 }
 0x4bd   :  { %v628_v63 = vpop.permute.xlu1 %627  ;;  %v606_v6 = vpop.permute.xlu0 %605 }
 0x4be   :  { %v608_v7 = vmul.f32 %v606_v6, %v4922_v55  ;;  %v630_v11 = vmul.f32 %v628_v63, %v4922_v55 }
 0x4c0   :  { %611 = vperm.xlu1 %4428, %v608_v7  }
 0x4c1   :  { %v648_v8 = vpop.permute.xlu1 %647  ;;  %v668_v9 = vpop.permute.xlu0 %667 }
 0x4c2   :  { %v650_v10 = vmul.f32 %v648_v8, %v4922_v55  ;;  %v670_v16 = vmul.f32 %v668_v9, %v4922_v55 }
 0x4c4   :  { %653 = vperm.xlu0 %4430, %v650_v10   ;;  %4429 = vset.pattern.permute.xlu1 %v4706_v12 }
 0x4c5   :  { %633 = vperm.xlu1 %4429, %v630_v11   ;;  %v708_v13 = vpop.permute.xlu0 %707  ;;  %v688_v21 = vpop.permute.xlu1 %687 }
 0x4c6   :  { %v710_v14 = vmul.f32 %v708_v13, %v4922_v55  ;;  %v690_v24 = vmul.f32 %v688_v21, %v4922_v55 }
 0x4c8   :  { %4433 = vset.pattern.permute.xlu0 %v4707_v17 }
 0x4c9   :  { %4431 = vset.pattern.permute.xlu1 %v4708_v20  ;;  %713 = vperm.xlu0 %4433, %v710_v14   ;;  %v728_v26 = vpop.permute.xlu0 %727 }
 0x4ca   :  { %673 = vperm.xlu1 %4431, %v670_v16   ;;  %v730_v27 = vmul.f32 %v728_v26, %v4922_v55 }
 0x4cd   :  { %4436 = vset.pattern.permute.xlu0 %v4712_v54 }
 0x4ce   :  { %4432 = vset.pattern.permute.xlu1 %v4709_v25 }
 0x4cf   :  { %693 = vperm.xlu1 %4432, %v690_v24  }
 0x4d3   :  { %4434 = vset.pattern.permute.xlu1 %v4710_v28 }
 0x4d4   :  { %733 = vperm.xlu1 %4434, %v730_v27  }
 0x4d8   :  { %4435 = vset.pattern.permute.xlu1 %v4711_v37 }
 0x53f   :  { %v612_v29 = vpop.permute.xlu1 %611 }
 0x540   :  { %v614_v30 = vmul.f32 %v612_v29, %v4922_v55 }
 0x542   :  { %616 = vrot.lane.b32.xlu1 %v614_v30, %s4690_s14 }
 0x543   :  { %v654_v31 = vpop.permute.xlu0 %653 }
 0x544   :  { %v656_v32 = vmul.f32 %v654_v31, %v4922_v55  ;;  %v634_v34 = vpop.permute.xlu1 %633 }
 0x545   :  { %v636_v35 = vmul.f32 %v634_v34, %v4922_v55 }
 0x546   :  { %658 = vrot.lane.b32.xlu1 %v656_v32, %s4701_s0 }
 0x547   :  { %638 = vrot.lane.b32.xlu0 %v636_v35, %s4693_s27 }
 0x548   :  { %v714_v43 = vpop.permute.xlu0 %713 }
 0x549   :  { %v674_v38 = vpop.permute.xlu1 %673  ;;  %v716_v47 = vmul.f32 %v714_v43, %v4922_v55 }
 0x54a   :  { %v676_v42 = vmul.f32 %v674_v38, %v4922_v55 }
 0x54c   :  { %678 = vrot.lane.b32.xlu0 %v676_v42, %s4702_s9 }
 0x54e   :  { %v694_v48 = vpop.permute.xlu1 %693 }
 0x54f   :  { %v696_v50 = vmul.f32 %v694_v48, %v4922_v55 }
 0x550   :  { %718 = vrot.lane.b32.xlu0 %v716_v47, %s4704_s11 }
 0x551   :  { %698 = vrot.lane.b32.xlu1 %v696_v50, %s4703_s10 }
 0x553   :  { %v734_v51 = vpop.permute.xlu1 %733 }
 0x554   :  { %v736_v52 = vmul.f32 %v734_v51, %v4922_v55 }
 0x556   :  { %738 = vrot.lane.b32.xlu0 %v736_v52, %s4705_s12 }
 0x5b4   :  { %v617_v53 = vpop.permute.xlu1 %616 }
 0x5b5   :  { %v619_v41 = vsub.f32 %v4922_v55, %v617_v53 }
 0x5b7   :  { %623 = vrot.lane.b32.xlu1 %v619_v41, %s4697_s29 }
 0x5b8   :  { %v659_v57 = vpop.permute.xlu1 %658 }
 0x5b9   :  { %v661_v60 = vsub.f32 %v4922_v55, %v659_v57  ;;  %v639_v61 = vpop.permute.xlu0 %638 }
 0x5ba   :  { %v641_v63 = vsub.f32 %v4922_v55, %v639_v61 }
 0x5bb   :  { %663 = vrot.lane.b32.xlu0 %v661_v60, %s4713_s15 }
 0x5bc   :  { %643 = vrot.lane.b32.xlu1 %v641_v63, %s4714_s2 }
 0x5be   :  { %v679_v6 = vpop.permute.xlu0 %678 }
 0x5bf   :  { %v681_v7 = vsub.f32 %v4922_v55, %v679_v6  ;;  %v4719_v6 = vmov 2  }
 0x5c1   :  { %683 = vrot.lane.b32.xlu1 %v681_v7, %s4715_s13 }
 0x5c2   :  { %v719_v8 = vpop.permute.xlu0 %718 }
 0x5c3   :  { %v721_v9 = vsub.f32 %v4922_v55, %v719_v8  ;;  %v699_v10 = vpop.permute.xlu1 %698 }
 0x5c4   :  { %v701_v11 = vsub.f32 %v4922_v55, %v699_v10 }
 0x5c5   :  { %723 = vrot.lane.b32.xlu1 %v721_v9, %s4716_s16 }
 0x5c6   :  { %703 = vrot.lane.b32.xlu0 %v701_v11, %s4717_s17 }
 0x5c8   :  { %v739_v13 = vpop.permute.xlu0 %738 }
 0x5c9   :  { %v741_v14 = vsub.f32 %v4922_v55, %v739_v13  ;;  %1063 = vperm.xlu1 %4435, %v4930_v62  }
 0x5cb   :  { %743 = vrot.lane.b32.xlu0 %v741_v14, %s4718_s18 }
 0x5cd   :  { %4437 = vset.pattern.permute.xlu1 %v4712_v54 }
 0x629   :  { %v624_v16 = vpop.permute.xlu1 %623 }
 0x62a   :  { %v4986_v21 = vsel %vm117_vm5, %v612_v29, %v624_v16 }
 0x62b   :  { %4477 = vrcp.f32 %v4986_v21 }
 0x62d   :  { %v664_v26 = vpop.permute.xlu0 %663 }
 0x62e   :  { %v644_v24 = vpop.permute.xlu1 %643  ;;  %v666_v62 = vsel %vm117_vm5, %v654_v31, %v664_v26 }
 0x62f   :  { %v646_v32 = vsel %vm117_vm5, %v634_v34, %v644_v24 }
 0x633   :  { %v684_v27 = vpop.permute.xlu1 %683 }
 0x634   :  { %v686_v47 = vsel %vm117_vm5, %v674_v38, %v684_v27 }
 0x635   :  { %v4478_v30 = vpop.eup %4477 }
 0x636   :  { %v760_v35 = vmul.f32 %v4478_v30, %v666_v62  ;;  %v749_v42 = vmul.f32 %v4478_v30, %v646_v32  ;;  %v769_v53 = vmul.f32 %v4478_v30, %v686_v47 }
 0x637   :  { %v724_v50 = vpop.permute.xlu1 %723 }
 0x638   :  { %752 = vperm.xlu0 %4436, %v749_v42   ;;  %v704_v29 = vpop.permute.xlu0 %703  ;;  %763 = vperm.xlu1 %4437, %v760_v35   ;;  %v726_v31 = vsel %vm117_vm5, %v714_v43, %v724_v50 }
 0x639   :  { %v706_v52 = vsel %vm117_vm5, %v694_v48, %v704_v29  ;;  %v787_v57 = vmul.f32 %v4478_v30, %v726_v31 }
 0x63a   :  { %v778_v41 = vmul.f32 %v4478_v30, %v706_v52 }
 0x63c   :  { %781 = vperm.xlu0 %4436, %v778_v41   ;;  %772 = vperm.xlu1 %4437, %v769_v53  }
 0x63d   :  { %v744_v34 = vpop.permute.xlu0 %743 }
 0x63e   :  { %v746_v60 = vsel %vm117_vm5, %v734_v51, %v744_v34 }
 0x63f   :  { %v796_v38 = vmul.f32 %v4478_v30, %v746_v60 }
 0x640   :  { %790 = vperm.xlu1 %4437, %v787_v57  }
 0x641   :  { %799 = vperm.xlu0 %4436, %v796_v38  }
 0x645   :  { %4438 = vset.pattern.permute.xlu0 %v4719_v6 }
 0x648   :  { %v1064_v61 = vpop.permute.xlu1 %1063 }
 0x649   :  { %v1066_v63 = vmul.f32 %v1064_v61, %v4922_v55 }
 0x64b   :  { %v1067_v48 = vsub.f32 %v4926_v58, %v1066_v63 }
 0x64d   :  { %v1068_v43 = vsel %vm117_vm5, %v1064_v61, %v1067_v48 }
 0x64e   :  { %v1069_v7 = vmul.f32 %v4478_v30, %v1068_v43 }
 0x650   :  { %1072 = vperm.xlu1 %4437, %v1069_v7  }
 0x654   :  { %4439 = vset.pattern.permute.xlu1 %v4719_v6 }
 0x6b7   :  { %v753_v8 = vpop.permute.xlu0 %752  ;;  %v764_v51 = vpop.permute.xlu1 %763 }
 0x6b8   :  { %v755_v9 = vmul.f32 %v753_v8, %v4986_v21  ;;  %v766_v14 = vmul.f32 %v764_v51, %v4986_v21 }
 0x6ba   :  { %v756_v10 = vsub.f32 %v646_v32, %v755_v9  ;;  %v767_v27 = vsub.f32 %v666_v62, %v766_v14  ;;  %v4720_v9 = vmov 3  }
 0x6bb   :  { %v773_v55 = vpop.permute.xlu1 %772  ;;  %v782_v58 = vpop.permute.xlu0 %781 }
 0x6bc   :  { %v5011_v11 = vsel %vm118_vm6, %v753_v8, %v756_v10  ;;  %v775_v13 = vmul.f32 %v773_v55, %v4986_v21  ;;  %v784_v24 = vmul.f32 %v782_v58, %v4986_v21  ;;  %v768_v53 = vsel %vm118_vm6, %v764_v51, %v767_v27 }
 0x6bd   :  { %4479 = vrcp.f32 %v5011_v11 }
 0x6be   :  { %v776_v26 = vsub.f32 %v686_v47, %v775_v13  ;;  %v785_v42 = vsub.f32 %v706_v52, %v784_v24 }
 0x6bf   :  { %v791_v16 = vpop.permute.xlu1 %790 }
 0x6c0   :  { %v793_v30 = vmul.f32 %v791_v16, %v4986_v21  ;;  %v800_v32 = vpop.permute.xlu0 %799  ;;  %v777_v50 = vsel %vm118_vm6, %v773_v55, %v776_v26  ;;  %v786_v62 = vsel %vm118_vm6, %v782_v58, %v785_v42 }
 0x6c1   :  { %v802_v29 = vmul.f32 %v800_v32, %v4986_v21 }
 0x6c2   :  { %v794_v34 = vsub.f32 %v726_v31, %v793_v30 }
 0x6c3   :  { %v803_v47 = vsub.f32 %v746_v60, %v802_v29 }
 0x6c4   :  { %v795_v52 = vsel %vm118_vm6, %v791_v16, %v794_v34 }
 0x6c5   :  { %v804_v63 = vsel %vm118_vm6, %v800_v32, %v803_v47 }
 0x6c7   :  { %v4480_v35 = vpop.eup %4479 }
 0x6c8   :  { %v818_v41 = vmul.f32 %v4480_v35, %v777_v50  ;;  %v807_v57 = vmul.f32 %v4480_v35, %v768_v53  ;;  %v827_v38 = vmul.f32 %v4480_v35, %v786_v62  ;;  %v836_v61 = vmul.f32 %v4480_v35, %v795_v52 }
 0x6c9   :  { %v845_v7 = vmul.f32 %v4480_v35, %v804_v63 }
 0x6ca   :  { %821 = vperm.xlu1 %4439, %v818_v41   ;;  %810 = vperm.xlu0 %4438, %v807_v57  }
 0x6ce   :  { %830 = vperm.xlu1 %4439, %v827_v38   ;;  %839 = vperm.xlu0 %4438, %v836_v61  }
 0x6cf   :  { %v1073_v48 = vpop.permute.xlu1 %1072 }
 0x6d0   :  { %v1075_v31 = vmul.f32 %v1073_v48, %v4986_v21 }
 0x6d2   :  { %v1076_v8 = vsub.f32 %v1068_v43, %v1075_v31  ;;  %848 = vperm.xlu1 %4439, %v845_v7  }
 0x6d4   :  { %v1077_v60 = vsel %vm118_vm6, %v1073_v48, %v1076_v8 }
 0x6d5   :  { %v1078_v51 = vmul.f32 %v4480_v35, %v1077_v60 }
 0x6d6   :  { %4440 = vset.pattern.permute.xlu1 %v4720_v9 }
 0x6d7   :  { %1081 = vperm.xlu0 %4438, %v1078_v51  }
 0x6db   :  { %4441 = vset.pattern.permute.xlu0 %v4720_v9 }
 0x749   :  { %v822_v10 = vpop.permute.xlu1 %821  ;;  %v811_v55 = vpop.permute.xlu0 %810 }
 0x74a   :  { %v813_v58 = vmul.f32 %v811_v55, %v5011_v11  ;;  %v824_v14 = vmul.f32 %v822_v10, %v5011_v11 }
 0x74c   :  { %v814_v13 = vsub.f32 %v768_v53, %v813_v58  ;;  %v825_v26 = vsub.f32 %v777_v50, %v824_v14 }
 0x74d   :  { %v831_v43 = vpop.permute.xlu1 %830  ;;  %v840_v16 = vpop.permute.xlu0 %839 }
 0x74e   :  { %v817_v21 = vsel %vm119_vm7, %v811_v55, %v814_v13  ;;  %v833_v24 = vmul.f32 %v831_v43, %v5011_v11  ;;  %v842_v27 = vmul.f32 %v840_v16, %v5011_v11  ;;  %v826_v41 = vsel %vm119_vm7, %v822_v10, %v825_v26 }
 0x74f   :  { %4481 = vrcp.f32 %v817_v21 }
 0x750   :  { %v834_v30 = vsub.f32 %v786_v62, %v833_v24  ;;  %v843_v34 = vsub.f32 %v795_v52, %v842_v27 }
 0x751   :  { %v849_v35 = vpop.permute.xlu1 %848 }
 0x752   :  { %v835_v57 = vsel %vm119_vm7, %v831_v43, %v834_v30  ;;  %v851_v47 = vmul.f32 %v849_v35, %v5011_v11  ;;  %v844_v61 = vsel %vm119_vm7, %v840_v16, %v843_v34 }
 0x754   :  { %v852_v48 = vsub.f32 %v804_v63, %v851_v47 }
 0x756   :  { %v1082_v32 = vpop.permute.xlu0 %1081  ;;  %v853_v52 = vsel %vm119_vm7, %v849_v35, %v852_v48 }
 0x757   :  { %v1084_v42 = vmul.f32 %v1082_v32, %v5011_v11  ;;  %v4721_v11 = vmov 4  }
 0x759   :  { %v1085_v29 = vsub.f32 %v1077_v60, %v1084_v42  ;;  %v4482_v53 = vpop.eup %4481 }
 0x75a   :  { %v856_v38 = vmul.f32 %v4482_v53, %v826_v41  ;;  %v867_v50 = vmul.f32 %v4482_v53, %v835_v57  ;;  %v876_v7 = vmul.f32 %v4482_v53, %v844_v61  ;;  %v885_v8 = vmul.f32 %v4482_v53, %v853_v52 }
 0x75b   :  { %v1086_v62 = vsel %vm119_vm7, %v1082_v32, %v1085_v29 }
 0x75c   :  { %859 = vperm.xlu1 %4440, %v856_v38   ;;  %870 = vperm.xlu0 %4441, %v867_v50   ;;  %v1087_v31 = vmul.f32 %v4482_v53, %v1086_v62 }
 0x760   :  { %879 = vperm.xlu1 %4440, %v876_v7   ;;  %1090 = vperm.xlu0 %4441, %v1087_v31  }
 0x764   :  { %888 = vperm.xlu1 %4440, %v885_v8   ;;  %4443 = vset.pattern.permute.xlu0 %v4721_v11 }
 0x768   :  { %4442 = vset.pattern.permute.xlu1 %v4721_v11 }
 0x7db   :  { %v860_v60 = vpop.permute.xlu1 %859  ;;  %v871_v55 = vpop.permute.xlu0 %870 }
 0x7dc   :  { %v862_v51 = vmul.f32 %v860_v60, %v817_v21  ;;  %v873_v13 = vmul.f32 %v871_v55, %v817_v21 }
 0x7de   :  { %v863_v10 = vsub.f32 %v826_v41, %v862_v51  ;;  %v874_v16 = vsub.f32 %v835_v57, %v873_v13 }
 0x7df   :  { %v880_v63 = vpop.permute.xlu1 %879  ;;  %v1091_v27 = vpop.permute.xlu0 %1090 }
 0x7e0   :  { %v866_v58 = vsel %vm120_vm8, %v860_v60, %v863_v10  ;;  %v882_v43 = vmul.f32 %v880_v63, %v817_v21  ;;  %v875_v32 = vsel %vm120_vm8, %v871_v55, %v874_v16  ;;  %v1093_v35 = vmul.f32 %v1091_v27, %v817_v21 }
 0x7e1   :  { %4483 = vrcp.f32 %v866_v58 }
 0x7e2   :  { %v883_v24 = vsub.f32 %v844_v61, %v882_v43  ;;  %v1094_v34 = vsub.f32 %v1086_v62, %v1093_v35 }
 0x7e3   :  { %v889_v14 = vpop.permute.xlu1 %888 }
 0x7e4   :  { %v891_v26 = vmul.f32 %v889_v14, %v817_v21  ;;  %v884_v42 = vsel %vm120_vm8, %v880_v63, %v883_v24  ;;  %v1095_v38 = vsel %vm120_vm8, %v1091_v27, %v1094_v34  ;;  %v4722_v21 = vmov 5  }
 0x7e6   :  { %v892_v29 = vsub.f32 %v853_v52, %v891_v26 }
 0x7e8   :  { %v893_v57 = vsel %vm120_vm8, %v889_v14, %v892_v29 }
 0x7eb   :  { %v4484_v30 = vpop.eup %4483 }
 0x7ec   :  { %v907_v53 = vmul.f32 %v4484_v30, %v884_v42  ;;  %v896_v41 = vmul.f32 %v4484_v30, %v875_v32  ;;  %v916_v47 = vmul.f32 %v4484_v30, %v893_v57  ;;  %v1096_v50 = vmul.f32 %v4484_v30, %v1095_v38 }
 0x7ee   :  { %899 = vperm.xlu1 %4442, %v896_v41   ;;  %910 = vperm.xlu0 %4443, %v907_v53  }
 0x7f2   :  { %919 = vperm.xlu1 %4442, %v916_v47   ;;  %4444 = vset.pattern.permute.xlu0 %v4722_v21 }
 0x7f6   :  { %1099 = vperm.xlu1 %4442, %v1096_v50  }
 0x7fa   :  { %4445 = vset.pattern.permute.xlu1 %v4722_v21 }
 0x86d   :  { %v900_v61 = vpop.permute.xlu1 %899  ;;  %v911_v31 = vpop.permute.xlu0 %910 }
 0x86e   :  { %v902_v48 = vmul.f32 %v900_v61, %v866_v58  ;;  %v913_v8 = vmul.f32 %v911_v31, %v866_v58 }
 0x870   :  { %v903_v62 = vsub.f32 %v875_v32, %v902_v48  ;;  %v914_v10 = vsub.f32 %v884_v42, %v913_v8  ;;  %v4723_v32 = vmov 6  }
 0x871   :  { %v920_v7 = vpop.permute.xlu1 %919 }
 0x872   :  { %v906_v52 = vsel %vm121_vm9, %v900_v61, %v903_v62  ;;  %v922_v60 = vmul.f32 %v920_v7, %v866_v58  ;;  %v915_v43 = vsel %vm121_vm9, %v911_v31, %v914_v10  ;;  %v4724_v31 = vmov 7  }
 0x873   :  { %4485 = vrcp.f32 %v906_v52 }
 0x874   :  { %v923_v63 = vsub.f32 %v893_v57, %v922_v60 }
 0x875   :  { %v1100_v51 = vpop.permute.xlu1 %1099 }
 0x876   :  { %v1102_v55 = vmul.f32 %v1100_v51, %v866_v58  ;;  %v924_v14 = vsel %vm121_vm9, %v920_v7, %v923_v63 }
 0x878   :  { %v1103_v16 = vsub.f32 %v1095_v38, %v1102_v55 }
 0x87a   :  { %v1104_v27 = vsel %vm121_vm9, %v1100_v51, %v1103_v16  ;;  %v5093_v16 = vld [vmem:[#allocation4 + $0x20] sm:$0xff] }
 0x87b   :  { %4039 = vmatpush3.msra.mxu0 %v5093_v16 }
 0x87d   :  { %v4486_v13 = vpop.eup %4485 }
 0x87e   :  { %v938_v24 = vmul.f32 %v4486_v13, %v924_v14  ;;  %v927_v26 = vmul.f32 %v4486_v13, %v915_v43  ;;  %v1105_v30 = vmul.f32 %v4486_v13, %v1104_v27 }
 0x880   :  { %930 = vperm.xlu0 %4444, %v927_v26   ;;  %941 = vperm.xlu1 %4445, %v938_v24  }
 0x884   :  { %1108 = vperm.xlu1 %4445, %v1105_v30   ;;  %4446 = vset.pattern.permute.xlu0 %v4723_v32 }
 0x888   :  { %4447 = vset.pattern.permute.xlu1 %v4723_v32 }
 0x8ff   :  { %v931_v58 = vpop.permute.xlu0 %930  ;;  %v942_v35 = vpop.permute.xlu1 %941 }
 0x900   :  { %v933_v42 = vmul.f32 %v931_v58, %v906_v52  ;;  %v944_v34 = vmul.f32 %v942_v35, %v906_v52 }
 0x902   :  { %v934_v29 = vsub.f32 %v915_v43, %v933_v42  ;;  %v945_v47 = vsub.f32 %v924_v14, %v944_v34 }
 0x903   :  { %v1109_v41 = vpop.permute.xlu1 %1108 }
 0x904   :  { %v937_v53 = vsel %vm122_vm10, %v931_v58, %v934_v29  ;;  %v1111_v57 = vmul.f32 %v1109_v41, %v906_v52  ;;  %v946_v61 = vsel %vm122_vm10, %v942_v35, %v945_v47  ;;  %v93_v58 = vld [vmem:[#allocation4 + $0x8] sm:$0xff]  ;;  %v94_v35 = vld [vmem:[#allocation4 + $0x10] sm:$0xff]  ;;  %v1291_v29 = vld [vmem:[#allocation9 + $0x28] sm:$0xff] }
 0x905   :  { %4487 = vrcp.f32 %v937_v53  ;;  %v4207_v42 = vpack.c.bf16 %v94_v35, %v93_v58  ;;  %v1287_v47 = vld [vmem:[#allocation9 + $0x8] sm:$0xff]  ;;  %v1458_v35 = vld [vmem:[#allocation9 + $0x70] sm:$0xff] }
 0x906   :  { %v1112_v38 = vsub.f32 %v1104_v27, %v1111_v57  ;;  %v1292_v57 = vld [vmem:[#allocation9 + $0x30] sm:$0xff] }
 0x907   :  { %4208 = vmatpush3.bf16.msra.mxu1 %v4207_v42  ;;  %v1460_v42 = vld [vmem:[#allocation9 + $0x80] sm:$0xff] }
 0x908   :  { %v1113_v48 = vsel %vm122_vm10, %v1109_v41, %v1112_v38  ;;  %v1290_v41 = vld [vmem:[#allocation9 + $0x20] sm:$0xff]  ;;  %v1289_v38 = vld [vmem:[#allocation9 + $0x18] sm:$0xff] }
 0x90f   :  { %v4488_v50 = vpop.eup %4487 }
 0x910   :  { %v949_v62 = vmul.f32 %v4488_v50, %v946_v61  ;;  %v1114_v7 = vmul.f32 %v4488_v50, %v1113_v48  ;;  %v4211_v50 = vpack.c.bf16 %v1292_v57, %v1290_v41  ;;  %v1462_v41 = vld [vmem:[#allocation9 + $0x90] sm:$0xff]  ;;  %v1467_v57 = vld [vmem:[#allocation9 + $0xb8] sm:$0xff] }
 0x912   :  { %952 = vperm.xlu0 %4446, %v949_v62   ;;  %1117 = vperm.xlu1 %4447, %v1114_v7   ;;  %v1288_v62 = vld [vmem:[#allocation9 + $0x10] sm:$0xff] }
 0x916   :  { %4449 = vset.pattern.permute.xlu0 %v4699_v56  ;;  %4448 = vset.pattern.permute.xlu1 %v4724_v31 }
 0x991   :  { %v953_v8 = vpop.permute.xlu0 %952  ;;  %v1118_v10 = vpop.permute.xlu1 %1117 }
 0x992   :  { %v955_v52 = vmul.f32 %v953_v8, %v937_v53  ;;  %v1120_v63 = vmul.f32 %v1118_v10, %v937_v53  ;;  %v1293_v53 = vld [vmem:[#allocation9 + $0x38] sm:$0xff] }
 0x993   :  { %v4209_v34 = vpack.c.bf16 %v1293_v53, %v1291_v29  ;;  %v1463_v29 = vld [vmem:[#allocation9 + $0x98] sm:$0xff] }
 0x994   :  { %v956_v60 = vsub.f32 %v946_v61, %v955_v52  ;;  %v1121_v55 = vsub.f32 %v1113_v48, %v1120_v63  ;;  %v4213_v61 = vpack.c.bf16 %v1289_v38, %v1287_v47  ;;  %v1286_v48 = vld [vmem:[#allocation9] sm:$0xff]  ;;  %v1469_v47 = vld [vmem:[#allocation9 + $0xc8] sm:$0xff] }
 0x995   :  { %4210 = vmatprep.subr.bf16.mxu0 %v4209_v34  ;;  %v4215_v7 = vpack.c.bf16 %v1288_v62, %v1286_v48  ;;  %v1464_v34 = vld [vmem:[#allocation9 + $0xa0] sm:$0xff]  ;;  %v1471_v62 = vld [vmem:[#allocation9 + $0xd8] sm:$0xff] }
 0x996   :  { %v959_v51 = vsel %vm123_vm11, %v953_v8, %v956_v60  ;;  %v1122_v43 = vsel %vm123_vm11, %v1118_v10, %v1121_v55  ;;  %v5105_v8 = vld [vmem:[%s5789_s1] sm:$0xff]  ;;  %v1455_v55 = vld [vmem:[#allocation9 + $0x58] sm:$0xff]  ;;  %v4227_v38 = vpack.c.bf16 %v1464_v34, %v1462_v41  ;;  %v1482_v34 = vld [vmem:[#allocation9 + $0x130] sm:$0xff]  ;;  %s4725_s1 = smov [#allocation2]  }
 0x997   :  { %4489 = vrcp.f32 %v959_v51  ;;  %v1468_v48 = vld [vmem:[#allocation9 + $0xc0] sm:$0xff]  ;;  %s86_s21 = sshll.u32 %s4725_s1, 4  ;;  %s87_s21 = int_to_ptr.vmem [resolvable:$true] %s86_s21 }
 0x9a1   :  { %v4490_v13 = vpop.eup %4489 }
 0x9a2   :  { %v1123_v14 = vmul.f32 %v4490_v13, %v1122_v43  ;;  %v1457_v13 = vld [vmem:[#allocation9 + $0x68] sm:$0xff] }
 0x9a4   :  { %1126 = vperm.xlu1 %4448, %v1123_v14   ;;  %v4217_v14 = vpack.c.bf16 %v1457_v13, %v1455_v55  ;;  %v1475_v55 = vld [vmem:[#allocation9 + $0xf8] sm:$0xff]  ;;  %v1477_v13 = vld [vmem:[#allocation9 + $0x108] sm:$0xff] }
 0x9a6   :  { %4218 = vmatprep.subr.bf16.mxu1 %v4217_v14  ;;  %v4237_v14 = vpack.c.bf16 %v1477_v13, %v1475_v55 }
 0x9a8   :  { %4450 = vset.pattern.permute.xlu1 %v4706_v12 }
 0xa23   :  { %v1127_v24 = vpop.permute.xlu1 %1126 }
 0xa24   :  { %v1129_v26 = vmul.f32 %v1127_v24, %v959_v51 }
 0xa26   :  { %v1130_v27 = vsub.f32 %v1122_v43, %v1129_v26  ;;  %v1454_v43 = vld [vmem:[#allocation9 + $0x50] sm:$0xff]  ;;  %v1459_v26 = vld [vmem:[#allocation9 + $0x78] sm:$0xff] }
 0xa28   :  { %v1133_v30 = vsel %vm124_vm12, %v1127_v24, %v1130_v27  ;;  %v1456_v24 = vld [vmem:[#allocation9 + $0x60] sm:$0xff]  ;;  %v1461_v27 = vld [vmem:[#allocation9 + $0x88] sm:$0xff] }
 0xa29   :  { %4041 = vmatmul.mubr.msk.f32.vlgmr.msra.gmra.mrb[8].mxu0 %vm128_vm1, %v1133_v30  ;;  %v4219_v30 = vpack.c.bf16 %v1456_v24, %v1454_v43  ;;  %v4221_v58 = vpack.c.bf16 %v1461_v27, %v1459_v26  ;;  %v1474_v24 = vld [vmem:[#allocation9 + $0xf0] sm:$0xff]  ;;  %v1476_v26 = vld [vmem:[#allocation9 + $0x100] sm:$0xff]  ;;  %v1479_v27 = vld [vmem:[#allocation9 + $0x118] sm:$0xff] }
 0xa2a   :  { %1358 = vmatprep.mubr.f32.mxu0 %v4695_v0  ;;  %4212 = vmatpush1.bf16.msra.mxu0 %v4211_v50  ;;  %v4229_v50 = vpack.c.bf16 %v1469_v47, %v1467_v57  ;;  %v1484_v57 = vld [vmem:[#allocation9 + $0x140] sm:$0xff]  ;;  %v1487_v47 = vld [vmem:[#allocation9 + $0x158] sm:$0xff] }
 0xa2b   :  { %4214 = vmatprep.subr.bf16.mxu0 %v4213_v61  ;;  %v1466_v61 = vld [vmem:[#allocation9 + $0xb0] sm:$0xff] }
 0xa2d   :  { %3952 = vmatmul.mubr.msk.f32.vlgmr.msra.gmra.mrb[10].mxu0 %vm218_vm2, %v5105_v8 }
 0xa2e   :  { %4216 = vmatpush1.bf16.msra.mxu0 %v4215_v7  ;;  %1432 = vmatprep.mubr.f32.mxu0 %v4695_v0  ;;  %v1473_v7 = vld [vmem:[#allocation9 + $0xe8] sm:$0xff] }
 0xa2f   :  { %4257 = vmatprep.subr.bf16.mxu0 %v4698_v19 }
 0xafc   :  { %v1203_v52 = vpop.f32.mrb[8].mxu0 }
 0xafd   :  { %v1204_v60 = vadd.f32 %v1203_v52, %v4862_v46  ;;  %v4042_v51 = vpop.f32.mrb[9].mxu0  ;;  %v4231_v52 = vpack.c.bf16 %v1468_v48, %v1466_v61  ;;  %v116_v48 = vsub.f32 1.0, %v4912_v49 }
 0xafe   :  { %v1470_v51 = vld [vmem:[#allocation9 + $0xd0] sm:$0xff] }
 0xaff   :  { %v1207_v10 = vsub.f32 %v1204_v60, %v4902_v39  ;;  %v1465_v39 = vld [vmem:[#allocation9 + $0xa8] sm:$0xff]  ;;  %v4233_v60 = vpack.c.bf16 %v1473_v7, %v1471_v62  ;;  %v1209_v62 = vmul.f32 %v5105_v8, %v116_v48 }
 0xb00   :  { %v4225_v53 = vpack.c.bf16 %v1465_v39, %v1463_v29  ;;  %v1480_v29 = vld [vmem:[#allocation9 + $0x120] sm:$0xff]  ;;  %v1483_v39 = vld [vmem:[#allocation9 + $0x138] sm:$0xff] }
 0xb01   :  { %v5114_v63 = vadd.f32 %v1207_v10, %v4890_v23  ;;  %v4223_v23 = vpack.c.bf16 %v1460_v42, %v1458_v35  ;;  %v1472_v10 = vld [vmem:[#allocation9 + $0xe0] sm:$0xff]  ;;  %v1478_v42 = vld [vmem:[#allocation9 + $0x110] sm:$0xff] }
 0xb02   :  { %v4235_v43 = vpack.c.bf16 %v1472_v10, %v1470_v51 }
 0xb03   :  { %4048 = vmatmul.mubr.msk.f32.vlgmr.msra.gmra.mrb[4].mxu1 %vm218_vm2, %v5114_v63  ;;  %v1691_v7 = vadd.f32 %v5105_v8, %v5114_v63  ;;  %v1284_v51 = vmul.f32 %v4912_v49, %v5114_v63 }
 0xb04   :  { %4220 = vmatpush1.bf16.msra.mxu1 %v4219_v30  ;;  %v1481_v30 = vld [vmem:[#allocation9 + $0x128] sm:$0xff] }
 0xb05   :  { %4222 = vmatprep.subr.bf16.mxu1 %v4221_v58  ;;  %v4239_v58 = vpack.c.bf16 %v1476_v26, %v1474_v24  ;;  %v4241_v35 = vpack.c.bf16 %v1481_v30, %v1479_v27  ;;  %v1486_v26 = vld [vmem:[#allocation9 + $0x150] sm:$0xff]  ;;  %v1488_v27 = vld [vmem:[#allocation9 + $0x160] sm:$0xff]  ;;  %v1491_v30 = vld [vmem:[#allocation9 + $0x178] sm:$0xff] }
 0xb06   :  { %v4251_v63 = vpack.c.bf16 %v1488_v27, %v1486_v26  ;;  %v1508_v27 = vld [vmem:[#allocation4 + $0x160] sm:$0xff] }
 0xb08   :  { %4224 = vmatpush1.bf16.msra.mxu1 %v4223_v23  ;;  %v1485_v23 = vld [vmem:[#allocation9 + $0x148] sm:$0xff] }
 0xb09   :  { %4226 = vmatprep.subr.bf16.mxu1 %v4225_v53  ;;  %v4243_v53 = vpack.c.bf16 %v1480_v29, %v1478_v42  ;;  %v4245_v41 = vpack.c.bf16 %v1485_v23, %v1483_v39  ;;  %v1490_v42 = vld [vmem:[#allocation9 + $0x170] sm:$0xff]  ;;  %v1492_v29 = vld [vmem:[#allocation9 + $0x180] sm:$0xff] }
 0xb0a   :  { %v4255_v39 = vpack.c.bf16 %v1492_v29, %v1490_v42  ;;  %v1496_v23 = vld [vmem:[#allocation4 + $0x100] sm:$0xff]  ;;  %v1440_v29 = vld [vmem:[#allocation9 + $0x40] ss:$8 sm:$0x3] }
 0xb0c   :  { %4228 = vmatpush1.bf16.msra.mxu1 %v4227_v38  ;;  %v1489_v38 = vld [vmem:[#allocation9 + $0x168] sm:$0xff] }
 0xb0d   :  { %4230 = vmatprep.subr.bf16.mxu1 %v4229_v50  ;;  %v4247_v50 = vpack.c.bf16 %v1484_v57, %v1482_v34  ;;  %v4249_v61 = vpack.c.bf16 %v1489_v38, %v1487_v47  ;;  %v1499_v57 = vld [vmem:[#allocation4 + $0x118] sm:$0xff]  ;;  %v1500_v38 = vld [vmem:[#allocation4 + $0x120] sm:$0xff] }
 0xb10   :  { %4232 = vmatpush1.bf16.msra.mxu1 %v4231_v52 }
 0xb11   :  { %4234 = vmatprep.subr.bf16.mxu1 %v4233_v60 }
 0xb14   :  { %4236 = vmatpush1.bf16.msra.mxu1 %v4235_v43  ;;  %v1692_v43 = vmul.f32 %v4912_v49, %v1691_v7  ;;  %v1503_v7 = vld [vmem:[#allocation4 + $0x138] sm:$0xff] }
 0xb15   :  { %4238 = vmatprep.subr.bf16.mxu1 %v4237_v14 }
 0xb18   :  { %4240 = vmatpush1.bf16.msra.mxu1 %v4239_v58  ;;  %v1493_v58 = vld [vmem:[#allocation9 + $0x188] sm:$0xff] }
 0xb19   :  { %4242 = vmatprep.subr.bf16.mxu1 %v4241_v35  ;;  %v4253_v35 = vpack.c.bf16 %v1493_v58, %v1491_v30  ;;  %v1510_v58 = vld [vmem:[#allocation4 + $0x170] sm:$0xff] }
 0xb1c   :  { %4244 = vmatpush1.bf16.msra.mxu1 %v4243_v53  ;;  %v1497_v53 = vld [vmem:[#allocation4 + $0x108] sm:$0xff] }
 0xb1d   :  { %4246 = vmatprep.subr.bf16.mxu1 %v4245_v41  ;;  %v1498_v41 = vld [vmem:[#allocation4 + $0x110] sm:$0xff]  ;;  %v4258_v34 = vpack.c.bf16 %v1497_v53, %v1496_v23  ;;  %v1449_v23 = vrot.slane %v1440_v29, %v4858_v44 }
 0xb1e   :  { %v4261_v47 = vpack.c.bf16 %v1499_v57, %v1498_v41 }
 0xb20   :  { %4248 = vmatpush1.bf16.msra.mxu1 %v4247_v50  ;;  %v1501_v50 = vld [vmem:[#allocation4 + $0x128] sm:$0xff] }
 0xb21   :  { %4250 = vmatprep.subr.bf16.mxu1 %v4249_v61  ;;  %v4264_v61 = vpack.c.bf16 %v1501_v50, %v1500_v38  ;;  %v1512_v50 = vld [vmem:[#allocation4 + $0x180] sm:$0xff] }
 0xb24   :  { %4252 = vmatpush1.bf16.msra.mxu1 %v4251_v63  ;;  %v1509_v63 = vld [vmem:[#allocation4 + $0x168] sm:$0xff] }
 0xb25   :  { %4254 = vmatprep.subr.bf16.mxu1 %v4253_v35  ;;  %v4276_v30 = vpack.c.bf16 %v1509_v63, %v1508_v27  ;;  %v1511_v35 = vld [vmem:[#allocation4 + $0x178] sm:$0xff] }
 0xb26   :  { %v4279_v42 = vpack.c.bf16 %v1511_v35, %v1510_v58  ;;  %v97_v35 = vld [vmem:[#allocation4 + $0x28] sm:$0xff] }
 0xb28   :  { %4256 = vmatpush1.bf16.msra.mxu1 %v4255_v39  ;;  %v1445_v39 = vrot.slane %v1440_v29, %v4860_v45 }
 0xb29   :  { %4287 = vmatprep.subr.bf16.mxu1 %v4698_v19 }
 0xbd6   :  { %v1279_v52 = vpop.f32.mrb[4].mxu1 }
 0xbd7   :  { %v5124_v60 = vsub.f32 %v1209_v62, %v1279_v52  ;;  %v4049_v10 = vpop.f32.mrb[5].mxu1  ;;  %v1502_v62 = vld [vmem:[#allocation4 + $0x130] sm:$0xff] }
 0xbd8   :  { %v4267_v52 = vpack.c.bf16 %v1503_v7, %v1502_v62  ;;  %v1505_v10 = vld [vmem:[#allocation4 + $0x148] sm:$0xff]  ;;  %v1514_v7 = vld [vmem:[#allocation4 + $0x190] sm:$0xff] }
 0xbd9   :  { %v1285_v55 = vadd.f32 %v1284_v51, %v5124_v60  ;;  %v1690_v13 = vmax.f32 %v5124_v60, 0.0  ;;  %v1694_v14 = vand.u32 2147483647, %v5124_v60 }
 0xbdb   :  { %v5134_v24 = vadd.f32 %v1692_v43, %v1690_v13  ;;  %v5136_v8 = vadd.f32 %v1694_v14, %v1284_v51  ;;  %3953 = vmatmul.mubr.msk.f32.vlgmr.msra.gmra.mrb[10].mxu0 %vm218_vm2, %v1285_v55  ;;  %v1504_v51 = vld [vmem:[#allocation4 + $0x140] sm:$0xff]  ;;  %v1506_v43 = vld [vmem:[#allocation4 + $0x150] sm:$0xff]  ;;  %v1507_v14 = vld [vmem:[#allocation4 + $0x158] sm:$0xff] }
 0xbdc   :  { %4259 = vmatpush1.bf16.msra.mxu0 %v4258_v34  ;;  %v4270_v55 = vpack.c.bf16 %v1505_v10, %v1504_v51  ;;  %v4273_v26 = vpack.c.bf16 %v1507_v14, %v1506_v43  ;;  %v1495_v10 = vld [vmem:[#allocation9 + $0x190] ss:$8 sm:$0x3] }
 0xbdd   :  { %4260 = vmatprep.subr.bf16.mxu0 %v4698_v19  ;;  %v1527_v43 = vrot.slane %v1495_v10, %v4858_v44 }
 0xbe0   :  { %4262 = vmatpush1.bf16.msra.mxu0 %v4261_v47 }
 0xbe1   :  { %4263 = vmatprep.subr.bf16.mxu0 %v4698_v19 }
 0xbe4   :  { %4265 = vmatpush1.bf16.msra.mxu0 %v4264_v61  ;;  %v1513_v61 = vld [vmem:[#allocation4 + $0x188] sm:$0xff] }
 0xbe5   :  { %4266 = vmatprep.subr.bf16.mxu0 %v4698_v19  ;;  %v4282_v62 = vpack.c.bf16 %v1513_v61, %v1512_v50 }
 0xbe8   :  { %4268 = vmatpush1.bf16.msra.mxu0 %v4267_v52  ;;  %v1515_v52 = vld [vmem:[#allocation4 + $0x198] sm:$0xff] }
 0xbe9   :  { %4269 = vmatprep.subr.bf16.mxu0 %v4698_v19  ;;  %v4285_v51 = vpack.c.bf16 %v1515_v52, %v1514_v7  ;;  %v104_v7 = vld [vmem:[#allocation6 + $0x8] sm:$0xff]  ;;  %v1696_v52 = vsub.f32 %v5136_v8, %v5134_v24 }
 0xbec   :  { %4271 = vmatpush1.bf16.msra.mxu0 %v4270_v55  ;;  %v1523_v55 = vrot.slane %v1495_v10, %v4860_v45 }
 0xbed   :  { %4272 = vmatprep.subr.bf16.mxu0 %v4698_v19 }
 0xbf0   :  { %4274 = vmatpush1.bf16.msra.mxu0 %v4273_v26 }
 0xbf1   :  { %4275 = vmatprep.subr.bf16.mxu0 %v4698_v19 }
 0xbf4   :  { %4277 = vmatpush1.bf16.msra.mxu0 %v4276_v30 }
 0xbf5   :  { %4278 = vmatprep.subr.bf16.mxu0 %v4698_v19 }
 0xbf8   :  { %4280 = vmatpush1.bf16.msra.mxu0 %v4279_v42  ;;  %v98_v42 = vld [vmem:[#allocation4 + $0x30] sm:$0xff] }
 0xbf9   :  { %4281 = vmatprep.subr.bf16.mxu0 %v4698_v19  ;;  %v4288_v29 = vpack.c.bf16 %v98_v42, %v97_v35 }
 0xbfc   :  { %4283 = vmatpush1.bf16.msra.mxu0 %v4282_v62  ;;  %v103_v62 = vld [vmem:[#allocation6] sm:$0xff] }
 0xbfd   :  { %4284 = vmatprep.subr.bf16.mxu0 %v4698_v19  ;;  %v4291_v10 = vpack.c.bf16 %v104_v7, %v103_v62 }
 0xc00   :  { %4286 = vmatpush1.bf16.msra.mxu0 %v4285_v51 }
 0xc01   :  { %4064 = vmatprep.subr.mxu0 %v4695_v0 }
 0xcae   :  { %v1434_v53 = vpop.f32.mrb[10].mxu0 }
 0xcaf   :  { %v1452_v41 = vadd.f32 %v1445_v39, %v1434_v53  ;;  %v1436_v34 = vpop.f32.mrb[11].mxu0  ;;  %v3955_v39 = vld [vmem:[#allocation4 + $0x1a0] ss:$0 sm:$0xff] }
 0xcb0   :  { %v1453_v57 = vadd.f32 %v1449_v23, %v1436_v34 }
 0xcb1   :  { %v1517_v38 = vmax.f32 %v1452_v41, 0.0 }
 0xcb2   :  { %v1518_v47 = vmax.f32 %v1453_v57, 0.0 }
 0xcb4   :  { %3954 = vmatprep.mubr.msk.f32.mxu1 %vm368_vm3, %v1518_v47 }
 0xcb5   :  { %1598 = vmatmul.mubr.f32.vlgmr.msra.gmra.mrb[6].mxu1 %v1517_v38 }
 0xcb6   :  { %4054 = vmatprep.mubr.msk.f32.mxu1 %vm4696_vm0, %v4695_v0  ;;  %4289 = vmatpush3.bf16.msra.mxu1 %v4288_v29 }
 0xcb7   :  { %4290 = vmatprep.subr.bf16.mxu1 %v4698_v19 }
 0xd88   :  { %v1599_v14 = vpop.f32.mrb[6].mxu1 }
 0xd89   :  { %v1600_v26 = vadd.f32 %v1599_v14, %v1523_v55  ;;  %v1601_v27 = vpop.f32.mrb[7].mxu1 }
 0xd8a   :  { %v1602_v63 = vadd.f32 %v1601_v27, %v1527_v43 }
 0xd8b   :  { %v1604_v58 = vmax.f32 %v1600_v26, 0.0 }
 0xd8c   :  { %v1605_v30 = vmax.f32 %v1602_v63, 0.0 }
 0xd8e   :  { %3956 = vmatprep.mubr.msk.f32.mxu0 %vm368_vm3, %v1605_v30 }
 0xd8f   :  { %1678 = vmatmul.mubr.f32.vlgmr.msra.gmra.mrb[12].mxu0 %v1604_v58 }
 0xd90   :  { %4066 = vmatprep.mubr.msk.f32.mxu0 %vm4696_vm0, %v4695_v0 }
 0xe62   :  { %v1679_v23 = vpop.f32.mrb[12].mxu0 }
 0xe63   :  { %v1680_v53 = vadd.f32 %v3955_v39, %v1679_v23  ;;  %v1681_v41 = vpop.f32.mrb[13].mxu0 }
 0xe65   :  { %v1683_v34 = vsub.f32 0.0, %v1680_v53 }
 0xe67   :  { %v1684_v57 = vmul.f32 1.442695, %v1683_v34 }
 0xe69   :  { %4491 = vpow2.f32 %v1684_v57 }
 0xe73   :  { %v4492_v47 = vpop.eup %4491 }
 0xe74   :  { %v1686_v38 = vadd.f32 1.0, %v4492_v47 }
 0xe76   :  { %4493 = vrcp.f32 %v1686_v38 }
 0xe80   :  { %v4494_v50 = vpop.eup %4493 }
 0xe81   :  { %v1688_v61 = vmul.f32 1e+08, %v4494_v50 }
 0xe83   :  { %v1689_v51 = vadd.f32 1e-08, %v1688_v61 }
 0xe85   :  { %v1697_v55 = vmul.f32 %v1696_v52, %v1689_v51 }
 0xe87   :  { %4055 = vmatmul.mubr.msk.f32.vlgmr.msra.gmra.mrb[8].mxu1 %vm218_vm2, %v1697_v55 }
 0xe88   :  { %4292 = vmatpush3.bf16.msra.mxu1 %v4291_v10  ;;  %4061 = vmatprep.mubr.msk.f32.mxu1 %vm4696_vm0, %v4695_v0 }
 0xe8b   :  { %4062 = vmatmul.mubr.msk.f32.vlgmr.msra.gmra.mrb[10].mxu1 %vm218_vm2, %v1689_v51 }
 0xf5a   :  { %v5167_v43 = vpop.f32.mrb[8].mxu1 }
 0xf5b   :  { %v4056_v14 = vpop.f32.mrb[9].mxu1 }
 0xf5e   :  { %v5169_v26 = vpop.f32.mrb[10].mxu1 }
 0xf5f   :  { %4495 = vrcp.f32 %v5169_v26  ;;  %v4063_v27 = vpop.f32.mrb[11].mxu1 }
 0xf69   :  { %v4496_v8 = vpop.eup %4495 }
 0xf6a   :  { %1867 = vrot.lane.b32.xlu1 %v4496_v8, %s4693_s27  ;;  %1847 = vrot.lane.b32.xlu0 %v4496_v8, %s4690_s14  ;;  %v5175_v63 = vmul.f32 %v4496_v8, %v5167_v43 }
 0xf6e   :  { %1907 = vrot.lane.b32.xlu1 %v4496_v8, %s4702_s9  ;;  %1887 = vrot.lane.b32.xlu0 %v4496_v8, %s4701_s0 }
 0xf72   :  { %1947 = vrot.lane.b32.xlu1 %v4496_v8, %s4704_s11  ;;  %1927 = vrot.lane.b32.xlu0 %v4496_v8, %s4703_s10 }
 0xf76   :  { %1967 = vrot.lane.b32.xlu1 %v4496_v8, %s4705_s12 }
 0xfdc   :  { %v1868_v30 = vpop.permute.xlu1 %1867  ;;  %v1848_v58 = vpop.permute.xlu0 %1847 }
 0xfdd   :  { %v1870_v35 = vmul.f32 %v1868_v30, %v5169_v26  ;;  %v1850_v42 = vmul.f32 %v1848_v58, %v5169_v26 }
 0xfdf   :  { %1873 = vperm.xlu1 %4450, %v1870_v35   ;;  %1853 = vperm.xlu0 %4449, %v1850_v42  }
 0xfe0   :  { %v1908_v29 = vpop.permute.xlu1 %1907  ;;  %v1888_v39 = vpop.permute.xlu0 %1887 }
 0xfe1   :  { %v1910_v23 = vmul.f32 %v1908_v29, %v5169_v26  ;;  %v1890_v53 = vmul.f32 %v1888_v39, %v5169_v26 }
 0xfe3   :  { %4452 = vset.pattern.permute.xlu1 %v4708_v20  ;;  %4451 = vset.pattern.permute.xlu0 %v4700_v59 }
 0xfe4   :  { %1913 = vperm.xlu1 %4452, %v1910_v23   ;;  %v1948_v41 = vpop.permute.xlu1 %1947  ;;  %1893 = vperm.xlu0 %4451, %v1890_v53   ;;  %v1928_v34 = vpop.permute.xlu0 %1927 }
 0xfe5   :  { %v1950_v57 = vmul.f32 %v1948_v41, %v5169_v26  ;;  %v1930_v47 = vmul.f32 %v1928_v34, %v5169_v26 }
 0xfe8   :  { %4453 = vset.pattern.permute.xlu1 %v4709_v25  ;;  %4454 = vset.pattern.permute.xlu0 %v4707_v17  ;;  %v1968_v38 = vpop.permute.xlu1 %1967 }
 0xfe9   :  { %1953 = vperm.xlu0 %4454, %v1950_v57   ;;  %1933 = vperm.xlu1 %4453, %v1930_v47   ;;  %v1970_v50 = vmul.f32 %v1968_v38, %v5169_v26 }
 0xfed   :  { %4455 = vset.pattern.permute.xlu1 %v4710_v28  ;;  %4457 = vset.pattern.permute.xlu0 %v4712_v54 }
 0xfee   :  { %1973 = vperm.xlu1 %4455, %v1970_v50  }
 0xff2   :  { %4456 = vset.pattern.permute.xlu1 %v4711_v37 }
0x105e   :  { %v1874_v61 = vpop.permute.xlu1 %1873  ;;  %v1854_v62 = vpop.permute.xlu0 %1853 }
0x105f   :  { %v1876_v7 = vmul.f32 %v1874_v61, %v5169_v26  ;;  %v1856_v52 = vmul.f32 %v1854_v62, %v5169_v26 }
0x1061   :  { %1878 = vrot.lane.b32.xlu0 %v1876_v7, %s4693_s27  ;;  %1858 = vrot.lane.b32.xlu1 %v1856_v52, %s4690_s14 }
0x1063   :  { %v1914_v51 = vpop.permute.xlu1 %1913  ;;  %v1894_v10 = vpop.permute.xlu0 %1893 }
0x1064   :  { %v1916_v55 = vmul.f32 %v1914_v51, %v5169_v26  ;;  %v1896_v14 = vmul.f32 %v1894_v10, %v5169_v26 }
0x1066   :  { %1918 = vrot.lane.b32.xlu0 %v1916_v55, %s4702_s9  ;;  %1898 = vrot.lane.b32.xlu1 %v1896_v14, %s4701_s0 }
0x1068   :  { %v1934_v27 = vpop.permute.xlu1 %1933  ;;  %v1954_v8 = vpop.permute.xlu0 %1953 }
0x1069   :  { %v1936_v30 = vmul.f32 %v1934_v27, %v5169_v26  ;;  %v1956_v58 = vmul.f32 %v1954_v8, %v5169_v26 }
0x106b   :  { %1938 = vrot.lane.b32.xlu1 %v1936_v30, %s4703_s10  ;;  %1958 = vrot.lane.b32.xlu0 %v1956_v58, %s4704_s11 }
0x106d   :  { %v1974_v35 = vpop.permute.xlu1 %1973 }
0x106e   :  { %v1976_v42 = vmul.f32 %v1974_v35, %v5169_v26 }
0x1070   :  { %1978 = vrot.lane.b32.xlu0 %v1976_v42, %s4705_s12 }
0x10d3   :  { %v1859_v29 = vpop.permute.xlu1 %1858  ;;  %v1879_v39 = vpop.permute.xlu0 %1878 }
0x10d4   :  { %v1861_v23 = vsub.f32 %v5169_v26, %v1859_v29  ;;  %v1881_v53 = vsub.f32 %v5169_v26, %v1879_v39 }
0x10d6   :  { %1863 = vrot.lane.b32.xlu1 %v1861_v23, %s4697_s29 }
0x10d8   :  { %v1899_v41 = vpop.permute.xlu1 %1898  ;;  %v1919_v34 = vpop.permute.xlu0 %1918 }
0x10d9   :  { %v1901_v57 = vsub.f32 %v5169_v26, %v1899_v41  ;;  %v1921_v47 = vsub.f32 %v5169_v26, %v1919_v34 }
0x10da   :  { %1883 = vrot.lane.b32.xlu1 %v1881_v53, %s4714_s2 }
0x10db   :  { %1903 = vrot.lane.b32.xlu0 %v1901_v57, %s4713_s15 }
0x10dd   :  { %v1939_v38 = vpop.permute.xlu1 %1938  ;;  %v1959_v50 = vpop.permute.xlu0 %1958 }
0x10de   :  { %v1941_v7 = vsub.f32 %v5169_v26, %v1939_v38  ;;  %1923 = vrot.lane.b32.xlu1 %v1921_v47, %s4715_s13  ;;  %v1961_v52 = vsub.f32 %v5169_v26, %v1959_v50 }
0x10e0   :  { %1943 = vrot.lane.b32.xlu0 %v1941_v7, %s4717_s17 }
0x10e2   :  { %1963 = vrot.lane.b32.xlu1 %v1961_v52, %s4716_s16  ;;  %v1979_v55 = vpop.permute.xlu0 %1978 }
0x10e3   :  { %v1981_v14 = vsub.f32 %v5169_v26, %v1979_v55 }
0x10e5   :  { %1983 = vrot.lane.b32.xlu0 %v1981_v14, %s4718_s18 }
0x10e6   :  { %2193 = vperm.xlu1 %4456, %v5175_v63  }
0x10ea   :  { %4458 = vset.pattern.permute.xlu1 %v4712_v54 }
0x1148   :  { %v1864_v30 = vpop.permute.xlu1 %1863 }
0x1149   :  { %v5228_v58 = vsel %vm117_vm5, %v1854_v62, %v1864_v30 }
0x114a   :  { %4497 = vrcp.f32 %v5228_v58 }
0x114c   :  { %v1884_v42 = vpop.permute.xlu1 %1883 }
0x114d   :  { %v1904_v29 = vpop.permute.xlu0 %1903  ;;  %v1886_v41 = vsel %vm117_vm5, %v1874_v61, %v1884_v42 }
0x114e   :  { %v1906_v63 = vsel %vm117_vm5, %v1894_v10, %v1904_v29 }
0x1150   :  { %v1924_v39 = vpop.permute.xlu1 %1923 }
0x1151   :  { %v1926_v50 = vsel %vm117_vm5, %v1914_v51, %v1924_v39 }
0x1152   :  { %v1944_v23 = vpop.permute.xlu0 %1943 }
0x1153   :  { %v1946_v47 = vsel %vm117_vm5, %v1934_v27, %v1944_v23 }
0x1154   :  { %v4498_v53 = vpop.eup %4497  ;;  %v1964_v62 = vpop.permute.xlu1 %1963 }
0x1155   :  { %v1989_v34 = vmul.f32 %v4498_v53, %v1886_v41  ;;  %v1998_v57 = vmul.f32 %v4498_v53, %v1906_v63  ;;  %v2007_v7 = vmul.f32 %v4498_v53, %v1926_v50  ;;  %v2016_v52 = vmul.f32 %v4498_v53, %v1946_v47 }
0x1156   :  { %v1966_v61 = vsel %vm117_vm5, %v1954_v8, %v1964_v62 }
0x1157   :  { %1992 = vperm.xlu0 %4457, %v1989_v34   ;;  %v1984_v38 = vpop.permute.xlu0 %1983  ;;  %2001 = vperm.xlu1 %4458, %v1998_v57   ;;  %v2025_v55 = vmul.f32 %v4498_v53, %v1966_v61 }
0x1158   :  { %v1986_v10 = vsel %vm117_vm5, %v1974_v35, %v1984_v38 }
0x1159   :  { %v2034_v14 = vmul.f32 %v4498_v53, %v1986_v10 }
0x115b   :  { %2019 = vperm.xlu0 %4457, %v2016_v52   ;;  %2010 = vperm.xlu1 %4458, %v2007_v7  }
0x115f   :  { %2037 = vperm.xlu0 %4457, %v2034_v14   ;;  %2028 = vperm.xlu1 %4458, %v2025_v55  }
0x1163   :  { %4459 = vset.pattern.permute.xlu0 %v4719_v6 }
0x1165   :  { %v2194_v27 = vpop.permute.xlu1 %2193 }
0x1166   :  { %v2196_v30 = vmul.f32 %v2194_v27, %v5169_v26 }
0x1168   :  { %v2197_v51 = vsub.f32 %v5167_v43, %v2196_v30 }
0x116a   :  { %v2198_v42 = vsel %vm117_vm5, %v2194_v27, %v2197_v51 }
0x116b   :  { %v2199_v8 = vmul.f32 %v4498_v53, %v2198_v42 }
0x116d   :  { %2202 = vperm.xlu1 %4458, %v2199_v8  }
0x1171   :  { %4460 = vset.pattern.permute.xlu1 %v4719_v6 }
0x11d6   :  { %v1993_v35 = vpop.permute.xlu0 %1992  ;;  %v2002_v29 = vpop.permute.xlu1 %2001 }
0x11d7   :  { %v1995_v39 = vmul.f32 %v1993_v35, %v5228_v58  ;;  %v2004_v26 = vmul.f32 %v2002_v29, %v5228_v58 }
0x11d9   :  { %v1996_v23 = vsub.f32 %v1886_v41, %v1995_v39  ;;  %v2005_v53 = vsub.f32 %v1906_v63, %v2004_v26 }
0x11da   :  { %v2011_v34 = vpop.permute.xlu1 %2010  ;;  %v2020_v43 = vpop.permute.xlu0 %2019 }
0x11db   :  { %v1997_v57 = vsel %vm118_vm6, %v1993_v35, %v1996_v23  ;;  %v2013_v62 = vmul.f32 %v2011_v34, %v5228_v58  ;;  %v2022_v7 = vmul.f32 %v2020_v43, %v5228_v58  ;;  %v2006_v41 = vsel %vm118_vm6, %v2002_v29, %v2005_v53 }
0x11dc   :  { %4499 = vrcp.f32 %v1997_v57 }
0x11dd   :  { %v2014_v52 = vsub.f32 %v1926_v50, %v2013_v62  ;;  %v2023_v30 = vsub.f32 %v1946_v47, %v2022_v7 }
0x11de   :  { %v2029_v38 = vpop.permute.xlu1 %2028  ;;  %v2038_v14 = vpop.permute.xlu0 %2037 }
0x11df   :  { %v2031_v55 = vmul.f32 %v2029_v38, %v5228_v58  ;;  %v2015_v51 = vsel %vm118_vm6, %v2011_v34, %v2014_v52  ;;  %v2040_v8 = vmul.f32 %v2038_v14, %v5228_v58  ;;  %v2024_v63 = vsel %vm118_vm6, %v2020_v43, %v2023_v30 }
0x11e1   :  { %v2032_v35 = vsub.f32 %v1966_v61, %v2031_v55  ;;  %v2041_v50 = vsub.f32 %v1986_v10, %v2040_v8 }
0x11e3   :  { %v2033_v26 = vsel %vm118_vm6, %v2029_v38, %v2032_v35  ;;  %v2042_v61 = vsel %vm118_vm6, %v2038_v14, %v2041_v50 }
0x11e6   :  { %v4500_v27 = vpop.eup %4499 }
0x11e7   :  { %v2045_v39 = vmul.f32 %v4500_v27, %v2006_v41  ;;  %v2054_v23 = vmul.f32 %v4500_v27, %v2015_v51  ;;  %v2063_v29 = vmul.f32 %v4500_v27, %v2024_v63  ;;  %v2072_v62 = vmul.f32 %v4500_v27, %v2033_v26 }
0x11e8   :  { %v2081_v34 = vmul.f32 %v4500_v27, %v2042_v61 }
0x11e9   :  { %2048 = vperm.xlu0 %4459, %v2045_v39   ;;  %2057 = vperm.xlu1 %4460, %v2054_v23  }
0x11ec   :  { %v2203_v47 = vpop.permute.xlu1 %2202 }
0x11ed   :  { %v2205_v53 = vmul.f32 %v2203_v47, %v5228_v58  ;;  %2066 = vperm.xlu1 %4460, %v2063_v29   ;;  %2075 = vperm.xlu0 %4459, %v2072_v62  }
0x11ef   :  { %v2206_v7 = vsub.f32 %v2198_v42, %v2205_v53 }
0x11f1   :  { %v2207_v52 = vsel %vm118_vm6, %v2203_v47, %v2206_v7  ;;  %2084 = vperm.xlu1 %4460, %v2081_v34  }
0x11f2   :  { %v2208_v10 = vmul.f32 %v4500_v27, %v2207_v52 }
0x11f4   :  { %2211 = vperm.xlu0 %4459, %v2208_v10  }
0x11f5   :  { %4461 = vset.pattern.permute.xlu1 %v4720_v9 }
0x11f8   :  { %4462 = vset.pattern.permute.xlu0 %v4720_v9 }
0x1268   :  { %v2049_v43 = vpop.permute.xlu0 %2048  ;;  %v2058_v38 = vpop.permute.xlu1 %2057 }
0x1269   :  { %v2051_v58 = vmul.f32 %v2049_v43, %v1997_v57  ;;  %v2060_v8 = vmul.f32 %v2058_v38, %v1997_v57 }
0x126b   :  { %v2052_v55 = vsub.f32 %v2006_v41, %v2051_v58  ;;  %v2061_v23 = vsub.f32 %v2015_v51, %v2060_v8 }
0x126c   :  { %v2067_v14 = vpop.permute.xlu1 %2066  ;;  %v2076_v42 = vpop.permute.xlu0 %2075 }
0x126d   :  { %v2053_v30 = vsel %vm119_vm7, %v2049_v43, %v2052_v55  ;;  %v2069_v35 = vmul.f32 %v2067_v14, %v1997_v57  ;;  %v2078_v27 = vmul.f32 %v2076_v42, %v1997_v57  ;;  %v2062_v34 = vsel %vm119_vm7, %v2058_v38, %v2061_v23 }
0x126e   :  { %4501 = vrcp.f32 %v2053_v30 }
0x126f   :  { %v2070_v50 = vsub.f32 %v2024_v63, %v2069_v35  ;;  %v2079_v41 = vsub.f32 %v2033_v26, %v2078_v27 }
0x1270   :  { %v2085_v62 = vpop.permute.xlu1 %2084 }
0x1271   :  { %v2071_v7 = vsel %vm119_vm7, %v2067_v14, %v2070_v50  ;;  %v2087_v10 = vmul.f32 %v2085_v62, %v1997_v57  ;;  %v2080_v51 = vsel %vm119_vm7, %v2076_v42, %v2079_v41 }
0x1273   :  { %v2212_v39 = vpop.permute.xlu0 %2211  ;;  %v2088_v63 = vsub.f32 %v2042_v61, %v2087_v10 }
0x1274   :  { %v2214_v29 = vmul.f32 %v2212_v39, %v1997_v57 }
0x1275   :  { %v2089_v26 = vsel %vm119_vm7, %v2085_v62, %v2088_v63 }
0x1276   :  { %v2215_v47 = vsub.f32 %v2207_v52, %v2214_v29 }
0x1278   :  { %v4502_v53 = vpop.eup %4501  ;;  %v2216_v55 = vsel %vm119_vm7, %v2212_v39, %v2215_v47 }
0x1279   :  { %v2092_v43 = vmul.f32 %v4502_v53, %v2062_v34  ;;  %v2101_v58 = vmul.f32 %v4502_v53, %v2071_v7  ;;  %v2110_v52 = vmul.f32 %v4502_v53, %v2080_v51  ;;  %v2217_v8 = vmul.f32 %v4502_v53, %v2216_v55 }
0x127a   :  { %v2119_v38 = vmul.f32 %v4502_v53, %v2089_v26 }
0x127b   :  { %2095 = vperm.xlu1 %4461, %v2092_v43   ;;  %2104 = vperm.xlu0 %4462, %v2101_v58  }
0x127f   :  { %2113 = vperm.xlu1 %4461, %v2110_v52   ;;  %2220 = vperm.xlu0 %4462, %v2217_v8  }
0x1283   :  { %2122 = vperm.xlu1 %4461, %v2119_v38   ;;  %4464 = vset.pattern.permute.xlu0 %v4721_v11 }
0x1287   :  { %4463 = vset.pattern.permute.xlu1 %v4721_v11 }
0x12fa   :  { %v2096_v57 = vpop.permute.xlu1 %2095  ;;  %v2105_v23 = vpop.permute.xlu0 %2104 }
0x12fb   :  { %v2098_v14 = vmul.f32 %v2096_v57, %v2053_v30  ;;  %v2107_v42 = vmul.f32 %v2105_v23, %v2053_v30 }
0x12fd   :  { %v2099_v35 = vsub.f32 %v2062_v34, %v2098_v14  ;;  %v2108_v29 = vsub.f32 %v2071_v7, %v2107_v42 }
0x12fe   :  { %v2114_v39 = vpop.permute.xlu1 %2113  ;;  %v2221_v53 = vpop.permute.xlu0 %2220 }
0x12ff   :  { %v2100_v61 = vsel %vm120_vm8, %v2096_v57, %v2099_v35  ;;  %v2116_v27 = vmul.f32 %v2114_v39, %v2053_v30  ;;  %v2109_v10 = vsel %vm120_vm8, %v2105_v23, %v2108_v29  ;;  %v2223_v43 = vmul.f32 %v2221_v53, %v2053_v30 }
0x1300   :  { %4503 = vrcp.f32 %v2100_v61 }
0x1301   :  { %v2117_v62 = vsub.f32 %v2080_v51, %v2116_v27  ;;  %v2224_v8 = vsub.f32 %v2216_v55, %v2223_v43 }
0x1302   :  { %v2123_v50 = vpop.permute.xlu1 %2122 }
0x1303   :  { %v2125_v47 = vmul.f32 %v2123_v50, %v2053_v30  ;;  %v2118_v34 = vsel %vm120_vm8, %v2114_v39, %v2117_v62  ;;  %v2225_v38 = vsel %vm120_vm8, %v2221_v53, %v2224_v8 }
0x1305   :  { %v2126_v58 = vsub.f32 %v2089_v26, %v2125_v47 }
0x1307   :  { %v2127_v7 = vsel %vm120_vm8, %v2123_v50, %v2126_v58 }
0x130a   :  { %v4504_v41 = vpop.eup %4503 }
0x130b   :  { %v2139_v63 = vmul.f32 %v4504_v41, %v2118_v34  ;;  %v2130_v52 = vmul.f32 %v4504_v41, %v2109_v10  ;;  %v2148_v51 = vmul.f32 %v4504_v41, %v2127_v7  ;;  %v2226_v30 = vmul.f32 %v4504_v41, %v2225_v38 }
0x130d   :  { %2133 = vperm.xlu1 %4463, %v2130_v52   ;;  %2142 = vperm.xlu0 %4464, %v2139_v63  }
0x1311   :  { %2151 = vperm.xlu1 %4463, %v2148_v51   ;;  %4465 = vset.pattern.permute.xlu0 %v4722_v21 }
0x1315   :  { %2229 = vperm.xlu1 %4463, %v2226_v30  }
0x1319   :  { %4466 = vset.pattern.permute.xlu1 %v4722_v21 }
0x138c   :  { %v2134_v26 = vpop.permute.xlu1 %2133  ;;  %v2143_v39 = vpop.permute.xlu0 %2142 }
0x138d   :  { %v2136_v57 = vmul.f32 %v2134_v26, %v2100_v61  ;;  %v2145_v23 = vmul.f32 %v2143_v39, %v2100_v61 }
0x138f   :  { %v2137_v14 = vsub.f32 %v2109_v10, %v2136_v57  ;;  %v2146_v50 = vsub.f32 %v2118_v34, %v2145_v23 }
0x1390   :  { %v2152_v35 = vpop.permute.xlu1 %2151 }
0x1391   :  { %v2138_v55 = vsel %vm121_vm9, %v2134_v26, %v2137_v14  ;;  %v2154_v42 = vmul.f32 %v2152_v35, %v2100_v61  ;;  %v2147_v53 = vsel %vm121_vm9, %v2143_v39, %v2146_v50 }
0x1392   :  { %4505 = vrcp.f32 %v2138_v55 }
0x1393   :  { %v2155_v29 = vsub.f32 %v2127_v7, %v2154_v42 }
0x1394   :  { %v2230_v27 = vpop.permute.xlu1 %2229 }
0x1395   :  { %v2232_v62 = vmul.f32 %v2230_v27, %v2100_v61  ;;  %v2156_v41 = vsel %vm121_vm9, %v2152_v35, %v2155_v29 }
0x1397   :  { %v2233_v10 = vsub.f32 %v2225_v38, %v2232_v62 }
0x1399   :  { %v2234_v63 = vsel %vm121_vm9, %v2230_v27, %v2233_v10 }
0x139c   :  { %v4506_v47 = vpop.eup %4505 }
0x139d   :  { %v2168_v43 = vmul.f32 %v4506_v47, %v2156_v41  ;;  %v2159_v58 = vmul.f32 %v4506_v47, %v2147_v53  ;;  %v2235_v52 = vmul.f32 %v4506_v47, %v2234_v63 }
0x139f   :  { %2162 = vperm.xlu0 %4465, %v2159_v58   ;;  %2171 = vperm.xlu1 %4466, %v2168_v43  }
0x13a3   :  { %2238 = vperm.xlu1 %4466, %v2235_v52   ;;  %4467 = vset.pattern.permute.xlu0 %v4723_v32 }
0x13a7   :  { %4468 = vset.pattern.permute.xlu1 %v4723_v32 }
0x141e   :  { %v2163_v61 = vpop.permute.xlu0 %2162  ;;  %v2172_v34 = vpop.permute.xlu1 %2171 }
0x141f   :  { %v2165_v8 = vmul.f32 %v2163_v61, %v2138_v55  ;;  %v2174_v30 = vmul.f32 %v2172_v34, %v2138_v55 }
0x1421   :  { %v2166_v7 = vsub.f32 %v2147_v53, %v2165_v8  ;;  %v2175_v57 = vsub.f32 %v2156_v41, %v2174_v30 }
0x1422   :  { %v2239_v38 = vpop.permute.xlu1 %2238 }
0x1423   :  { %v2167_v51 = vsel %vm122_vm10, %v2163_v61, %v2166_v7  ;;  %v2241_v26 = vmul.f32 %v2239_v38, %v2138_v55  ;;  %v2176_v39 = vsel %vm122_vm10, %v2172_v34, %v2175_v57 }
0x1424   :  { %4507 = vrcp.f32 %v2167_v51 }
0x1425   :  { %v2242_v14 = vsub.f32 %v2234_v63, %v2241_v26  ;;  %v95_v63 = vld [vmem:[#allocation4 + $0x18] sm:$0xff] }
0x1426   :  { %4065 = vmatpush3.msra.mxu0 %v95_v63 }
0x1427   :  { %v2243_v23 = vsel %vm122_vm10, %v2239_v38, %v2242_v14 }
0x142e   :  { %v4508_v35 = vpop.eup %4507 }
0x142f   :  { %v2179_v42 = vmul.f32 %v4508_v35, %v2176_v39  ;;  %v2244_v27 = vmul.f32 %v4508_v35, %v2243_v23 }
0x1431   :  { %2182 = vperm.xlu0 %4467, %v2179_v42   ;;  %2247 = vperm.xlu1 %4468, %v2244_v27  }
0x1435   :  { %4469 = vset.pattern.permute.xlu1 %v4724_v31  ;;  %4470 = vset.pattern.permute.xlu0 %v4724_v31 }
0x14b0   :  { %v2183_v50 = vpop.permute.xlu0 %2182  ;;  %v2248_v47 = vpop.permute.xlu1 %2247 }
0x14b1   :  { %v2185_v29 = vmul.f32 %v2183_v50, %v2167_v51  ;;  %v2250_v53 = vmul.f32 %v2248_v47, %v2167_v51 }
0x14b3   :  { %v2186_v55 = vsub.f32 %v2176_v39, %v2185_v29  ;;  %v2251_v41 = vsub.f32 %v2243_v23, %v2250_v53 }
0x14b5   :  { %v2187_v62 = vsel %vm123_vm11, %v2183_v50, %v2186_v55  ;;  %v2252_v43 = vsel %vm123_vm11, %v2248_v47, %v2251_v41 }
0x14b6   :  { %4509 = vrcp.f32 %v2187_v62 }
0x14c0   :  { %v4510_v10 = vpop.eup %4509 }
0x14c1   :  { %v2253_v58 = vmul.f32 %v4510_v10, %v2252_v43 }
0x14c3   :  { %2256 = vperm.xlu1 %4469, %v2253_v58  }
0x1542   :  { %v2257_v52 = vpop.permute.xlu1 %2256 }
0x1543   :  { %v2259_v61 = vmul.f32 %v2257_v52, %v2187_v62 }
0x1545   :  { %v2260_v34 = vsub.f32 %v2252_v43, %v2259_v61 }
0x1547   :  { %v2261_v8 = vsel %vm124_vm12, %v2257_v52, %v2260_v34 }
0x1548   :  { %4067 = vmatmul.mubr.msk.f32.vlgmr.msra.gmra.mrb[14].mxu0 %vm128_vm1, %v2261_v8 }
0x1549   :  { %4666 = shalt.err (!%p4663_p6)  }
0x154a   :  { %s4667_s5 = scalar_lea.vmem %s87_s21, 6144  ;;  %p4672_p8 = scmp.lt.s32.totalorder %s87_s21, %s87_s21 }
0x154b   :  { %p4668_p7 = scmp.ne.s32.totalorder %s87_s21, %s4667_s5  ;;  %p4673_p9 = scmp.lt.s32.totalorder %s4667_s5, %s4667_s5 }
0x154d   :  { %p4674_p10 = por %p4673_p9, %p4672_p8 }
0x154f   :  { %p4675_p11 = pnand %p4674_p10, %p4668_p7 }
0x1551   :  { %4678 = shalt.err (!%p4675_p11)  }
0x1552   :  { %89 = dma.hbm_to_vmem [thread:$0]  %s5794_s6, 6144, %s87_s21, [#allocation3]  ;;  %v2335_v7 = vsub.f32 %v4912_v49, %v116_v48  ;;  %v2337_v57 = vmul.f32 2.0, %v1690_v13 }
0x161b   :  { %v2331_v51 = vpop.f32.mrb[14].mxu0 }
0x161c   :  { %v2332_v38 = vadd.f32 %v2331_v51, %v5134_v24  ;;  %v4068_v30 = vpop.f32.mrb[15].mxu0 }
0x161e   :  { %v2336_v26 = vmul.f32 %v2335_v7, %v2332_v38 }
0x1620   :  { %v5341_v14 = vadd.f32 %v2337_v57, %v2336_v26 }
0x1621   :  { %4685 = dma.done.wait [#allocation3], 6144 }
0x1622   :  { %4686 = vsyncadd [#allocation3], 4294961152  ;;  %2424 = vmatprep.mubr.f32.mxu1 %v4695_v0  ;;  %4512 = vset.pattern.permute.xlu0 %v4699_v56  ;;  %v2344_v35 = vld [vmem:[#allocation2 + $0x8] sm:$0xff]  ;;  %v2346_v48 = vld [vmem:[#allocation2 + $0x18] sm:$0xff] }
0x1623   :  { %4513 = vset.pattern.permute.xlu1 %v4706_v12  ;;  %v2343_v39 = vld [vmem:[#allocation2] sm:$0xff]  ;;  %v4293_v23 = vpack.c.bf16 %v2346_v48, %v2344_v35  ;;  %v2345_v24 = vld [vmem:[#allocation2 + $0x10] sm:$0xff]  ;;  %v2432_v42 = vld [vmem:[#allocation2 + $0x38] sm:$0xff] }
0x1624   :  { %v2434_v27 = vld [vmem:[#allocation2 + $0x48] sm:$0xff]  ;;  %v4295_v50 = vpack.c.bf16 %v2345_v24, %v2343_v39  ;;  %v2431_v13 = vld [vmem:[#allocation2 + $0x30] sm:$0xff]  ;;  %v2433_v29 = vld [vmem:[#allocation2 + $0x40] sm:$0xff] }
0x1625   :  { %v4297_v60 = vpack.c.bf16 %v2434_v27, %v2432_v42  ;;  %v2436_v55 = vld [vmem:[#allocation2 + $0x58] sm:$0xff]  ;;  %4294 = vmatprep.subr.bf16.mxu1 %v4293_v23  ;;  %v4299_v62 = vpack.c.bf16 %v2433_v29, %v2431_v13  ;;  %v2438_v47 = vld [vmem:[#allocation2 + $0x68] sm:$0xff]  ;;  %v2435_v53 = vld [vmem:[#allocation2 + $0x50] sm:$0xff] }
0x1626   :  { %v2437_v41 = vld [vmem:[#allocation2 + $0x60] sm:$0xff]  ;;  %4296 = vmatpush1.bf16.msra.mxu1 %v4295_v50  ;;  %v4301_v56 = vpack.c.bf16 %v2438_v47, %v2436_v55  ;;  %v2440_v12 = vld [vmem:[#allocation2 + $0x78] sm:$0xff]  ;;  %v2442_v10 = vld [vmem:[#allocation2 + $0x88] sm:$0xff] }
0x1627   :  { %4298 = vmatprep.subr.bf16.mxu0 %v4297_v60  ;;  %v4303_v43 = vpack.c.bf16 %v2437_v41, %v2435_v53  ;;  %4337 = vmatprep.subr.bf16.mxu1 %v4698_v19  ;;  %v4305_v58 = vpack.c.bf16 %v2442_v10, %v2440_v12  ;;  %v2439_v63 = vld [vmem:[#allocation2 + $0x70] sm:$0xff]  ;;  %v2441_v52 = vld [vmem:[#allocation2 + $0x80] sm:$0xff]  ;;  %v2444_v61 = vld [vmem:[#allocation2 + $0x98] sm:$0xff] }
0x1628   :  { %4300 = vmatpush1.bf16.msra.mxu0 %v4299_v62  ;;  %v2446_v34 = vld [vmem:[#allocation2 + $0xa8] sm:$0xff]  ;;  %v4307_v8 = vpack.c.bf16 %v2441_v52, %v2439_v63  ;;  %v2443_v51 = vld [vmem:[#allocation2 + $0x90] sm:$0xff]  ;;  %v2445_v38 = vld [vmem:[#allocation2 + $0xa0] sm:$0xff] }
0x1629   :  { %4302 = vmatprep.subr.bf16.mxu0 %v4301_v56  ;;  %3960 = vmatmul.mubr.msk.f32.vlgmr.msra.gmra.mrb[12].mxu1 %vm218_vm2, %v4839_v5  ;;  %v4309_v7 = vpack.c.bf16 %v2446_v34, %v2444_v61  ;;  %v2448_v30 = vld [vmem:[#allocation2 + $0xb8] sm:$0xff]  ;;  %v2450_v26 = vld [vmem:[#allocation2 + $0xc8] sm:$0xff]  ;;  %v4311_v57 = vpack.c.bf16 %v2445_v38, %v2443_v51  ;;  %v2447_v48 = vld [vmem:[#allocation2 + $0xb0] sm:$0xff] }
0x162a   :  { %v4313_v35 = vpack.c.bf16 %v2450_v26, %v2448_v30  ;;  %v2449_v39 = vld [vmem:[#allocation2 + $0xc0] sm:$0xff]  ;;  %v2452_v23 = vld [vmem:[#allocation2 + $0xd8] sm:$0xff]  ;;  %v2454_v24 = vld [vmem:[#allocation2 + $0xe8] sm:$0xff] }
0x162b   :  { %v4315_v42 = vpack.c.bf16 %v2449_v39, %v2447_v48  ;;  %v4317_v27 = vpack.c.bf16 %v2454_v24, %v2452_v23  ;;  %v2451_v50 = vld [vmem:[#allocation2 + $0xd0] sm:$0xff]  ;;  %v2453_v60 = vld [vmem:[#allocation2 + $0xe0] sm:$0xff]  ;;  %v2456_v13 = vld [vmem:[#allocation2 + $0xf8] sm:$0xff] }
0x162c   :  { %4304 = vmatpush1.bf16.msra.mxu0 %v4303_v43  ;;  %v2458_v29 = vld [vmem:[#allocation2 + $0x108] sm:$0xff]  ;;  %v4319_v55 = vpack.c.bf16 %v2453_v60, %v2451_v50  ;;  %v2455_v47 = vld [vmem:[#allocation2 + $0xf0] sm:$0xff]  ;;  %v2457_v53 = vld [vmem:[#allocation2 + $0x100] sm:$0xff] }
0x162d   :  { %4306 = vmatprep.subr.bf16.mxu0 %v4305_v58  ;;  %v4321_v62 = vpack.c.bf16 %v2458_v29, %v2456_v13  ;;  %v2460_v41 = vld [vmem:[#allocation2 + $0x118] sm:$0xff]  ;;  %v2462_v56 = vld [vmem:[#allocation2 + $0x128] sm:$0xff]  ;;  %v4323_v12 = vpack.c.bf16 %v2457_v53, %v2455_v47  ;;  %v2459_v43 = vld [vmem:[#allocation2 + $0x110] sm:$0xff] }
0x162e   :  { %v4325_v10 = vpack.c.bf16 %v2462_v56, %v2460_v41  ;;  %v2461_v58 = vld [vmem:[#allocation2 + $0x120] sm:$0xff]  ;;  %v2464_v63 = vld [vmem:[#allocation2 + $0x138] sm:$0xff]  ;;  %v2466_v52 = vld [vmem:[#allocation2 + $0x148] sm:$0xff] }
0x162f   :  { %v4327_v61 = vpack.c.bf16 %v2461_v58, %v2459_v43  ;;  %v4329_v34 = vpack.c.bf16 %v2466_v52, %v2464_v63  ;;  %v2468_v38 = vld [vmem:[#allocation2 + $0x158] sm:$0xff]  ;;  %v2470_v30 = vld [vmem:[#allocation2 + $0x168] sm:$0xff]  ;;  %v2474_v23 = vld [vmem:[#allocation4 + $0x1b0] sm:$0xff] }
0x1630   :  { %4308 = vmatpush1.bf16.msra.mxu0 %v4307_v8  ;;  %v2463_v8 = vld [vmem:[#allocation2 + $0x130] sm:$0xff]  ;;  %v4333_v26 = vpack.c.bf16 %v2470_v30, %v2468_v38  ;;  %v2473_v39 = vld [vmem:[#allocation4 + $0x1a8] sm:$0xff]  ;;  %v2475_v24 = vld [vmem:[#allocation4 + $0x1b8] sm:$0xff] }
0x1631   :  { %4310 = vmatprep.subr.bf16.mxu0 %v4309_v7  ;;  %v2465_v7 = vld [vmem:[#allocation2 + $0x140] sm:$0xff]  ;;  %v2477_v60 = vld [vmem:[#allocation4 + $0x1c8] sm:$0xff]  ;;  %v2478_v13 = vld [vmem:[#allocation4 + $0x1d0] sm:$0xff] }
0x1632   :  { %v4331_v51 = vpack.c.bf16 %v2465_v7, %v2463_v8  ;;  %v4344_v29 = vpack.c.bf16 %v2478_v13, %v2477_v60  ;;  %v2481_v53 = vld [vmem:[#allocation4 + $0x1e8] sm:$0xff]  ;;  %v2482_v41 = vld [vmem:[#allocation4 + $0x1f0] sm:$0xff] }
0x1633   :  { %v4350_v56 = vpack.c.bf16 %v2482_v41, %v2481_v53  ;;  %v2485_v58 = vld [vmem:[#allocation4 + $0x208] sm:$0xff]  ;;  %v2486_v63 = vld [vmem:[#allocation4 + $0x210] sm:$0xff] }
0x1634   :  { %4312 = vmatpush1.bf16.msra.mxu0 %v4311_v57  ;;  %v2467_v57 = vld [vmem:[#allocation2 + $0x150] sm:$0xff]  ;;  %v4356_v52 = vpack.c.bf16 %v2486_v63, %v2485_v58  ;;  %v2348_v7 = vld [vmem:[#allocation2 + $0x20] ss:$8 sm:$0x3] }
0x1635   :  { %4314 = vmatprep.subr.bf16.mxu0 %v4313_v35  ;;  %v2469_v35 = vld [vmem:[#allocation2 + $0x160] sm:$0xff]  ;;  %v2357_v38 = vrot.slane %v2348_v7, %v4858_v44  ;;  %v2472_v13 = vld [vmem:[#allocation2 + $0x170] ss:$8 sm:$0x3] }
0x1636   :  { %v4335_v48 = vpack.c.bf16 %v2469_v35, %v2467_v57 }
0x1638   :  { %4316 = vmatpush1.bf16.msra.mxu0 %v4315_v42  ;;  %v4338_v42 = vpack.c.bf16 %v2474_v23, %v2473_v39  ;;  %v2489_v23 = vld [vmem:[#allocation4 + $0x228] sm:$0xff] }
0x1639   :  { %4318 = vmatprep.subr.bf16.mxu0 %v4317_v27  ;;  %v2476_v27 = vld [vmem:[#allocation4 + $0x1c0] sm:$0xff] }
0x163a   :  { %4339 = vmatpush1.bf16.msra.mxu1 %v4338_v42  ;;  %v4341_v50 = vpack.c.bf16 %v2476_v27, %v2475_v24  ;;  %v2490_v24 = vld [vmem:[#allocation4 + $0x230] sm:$0xff]  ;;  %v2491_v27 = vld [vmem:[#allocation4 + $0x238] sm:$0xff] }
0x163b   :  { %4340 = vmatprep.subr.bf16.mxu1 %v4698_v19  ;;  %v4362_v42 = vpack.c.bf16 %v2490_v24, %v2489_v23 }
0x163c   :  { %4320 = vmatpush1.bf16.msra.mxu0 %v4319_v55  ;;  %v2479_v55 = vld [vmem:[#allocation4 + $0x1d8] sm:$0xff] }
0x163d   :  { %4322 = vmatprep.subr.bf16.mxu0 %v4321_v62  ;;  %v2480_v62 = vld [vmem:[#allocation4 + $0x1e0] sm:$0xff] }
0x163e   :  { %4342 = vmatpush1.bf16.msra.mxu1 %v4341_v50  ;;  %v4347_v47 = vpack.c.bf16 %v2480_v62, %v2479_v55  ;;  %v2492_v50 = vld [vmem:[#allocation4 + $0x240] sm:$0xff] }
0x163f   :  { %4343 = vmatprep.subr.bf16.mxu1 %v4698_v19  ;;  %v4365_v60 = vpack.c.bf16 %v2492_v50, %v2491_v27 }
0x1640   :  { %4324 = vmatpush1.bf16.msra.mxu0 %v4323_v12  ;;  %v2483_v12 = vld [vmem:[#allocation4 + $0x1f8] sm:$0xff] }
0x1641   :  { %4326 = vmatprep.subr.bf16.mxu0 %v4325_v10  ;;  %v2484_v10 = vld [vmem:[#allocation4 + $0x200] sm:$0xff] }
0x1642   :  { %4345 = vmatpush1.bf16.msra.mxu1 %v4344_v29  ;;  %v4353_v43 = vpack.c.bf16 %v2484_v10, %v2483_v12  ;;  %v2504_v29 = vrot.slane %v2472_v13, %v4858_v44  ;;  %v3962_v12 = vld [vmem:[#allocation4 + $0x248] ss:$0 sm:$0xff] }
0x1643   :  { %4346 = vmatprep.subr.bf16.mxu1 %v4698_v19 }
0x1644   :  { %4328 = vmatpush1.bf16.msra.mxu0 %v4327_v61  ;;  %v2487_v61 = vld [vmem:[#allocation4 + $0x218] sm:$0xff] }
0x1645   :  { %4330 = vmatprep.subr.bf16.mxu0 %v4329_v34  ;;  %v2488_v34 = vld [vmem:[#allocation4 + $0x220] sm:$0xff] }
0x1646   :  { %4348 = vmatpush1.bf16.msra.mxu1 %v4347_v47  ;;  %v4359_v8 = vpack.c.bf16 %v2488_v34, %v2487_v61 }
0x1647   :  { %4349 = vmatprep.subr.bf16.mxu1 %v4698_v19 }
0x1648   :  { %4332 = vmatpush1.bf16.msra.mxu0 %v4331_v51  ;;  %v2353_v51 = vrot.slane %v2348_v7, %v4860_v45 }
0x1649   :  { %4334 = vmatprep.subr.bf16.mxu0 %v4333_v26 }
0x164a   :  { %4351 = vmatpush1.bf16.msra.mxu1 %v4350_v56 }
0x164b   :  { %4352 = vmatprep.subr.bf16.mxu1 %v4698_v19 }
0x164c   :  { %4336 = vmatpush1.bf16.msra.mxu0 %v4335_v48 }
0x164d   :  { %4367 = vmatprep.subr.bf16.mxu0 %v4698_v19 }
0x164e   :  { %4354 = vmatpush1.bf16.msra.mxu1 %v4353_v43  ;;  %v3086_v43 = vsub.f32 %v4885_v22, %v5341_v14 }
0x164f   :  { %4355 = vmatprep.subr.bf16.mxu1 %v4698_v19 }
0x1652   :  { %4357 = vmatpush1.bf16.msra.mxu1 %v4356_v52  ;;  %v3087_v52 = vmax.f32 %v3086_v43, 0.0 }
0x1653   :  { %4358 = vmatprep.subr.bf16.mxu1 %v4698_v19 }
0x1654   :  { %v3088_v61 = vsub.f32 %v4895_v33, %v3087_v52 }
0x1656   :  { %4360 = vmatpush1.bf16.msra.mxu1 %v4359_v8  ;;  %v3089_v34 = vmax.f32 %v3088_v61, 0.0 }
0x1657   :  { %4361 = vmatprep.subr.bf16.mxu1 %v4698_v19 }
0x1658   :  { %v5378_v7 = vadd.f32 %v3089_v34, %v4899_v36 }
0x165a   :  { %4363 = vmatpush1.bf16.msra.mxu1 %v4362_v42 }
0x165b   :  { %4364 = vmatprep.subr.bf16.mxu1 %v4698_v19 }
0x165e   :  { %4366 = vmatpush1.bf16.msra.mxu1 %v4365_v60 }
0x165f   :  { %4370 = vmatprep.subr.bf16.mxu1 %v4698_v19 }
0x16fc   :  { %v2426_v30 = vpop.f32.mrb[12].mxu1 }
0x16fd   :  { %v2427_v26 = vadd.f32 %v2426_v30, %v2353_v51  ;;  %v2428_v57 = vpop.f32.mrb[13].mxu1 }
0x16fe   :  { %v2429_v35 = vadd.f32 %v2428_v57, %v2357_v38  ;;  %v3091_v38 = vmul.f32 2.0, %v5378_v7 }
0x16ff   :  { %v2494_v39 = vmax.f32 %v2427_v26, 0.0 }
0x1700   :  { %v2495_v48 = vmax.f32 %v2429_v35, 0.0  ;;  %v3092_v30 = vsub.f32 %v3091_v38, %v5341_v14 }
0x1702   :  { %3961 = vmatprep.mubr.msk.f32.mxu0 %vm368_vm3, %v2495_v48  ;;  %v3093_v26 = vadd.f32 %v3092_v30, %v4839_v5  ;;  %v3095_v48 = vsub.f32 %v3092_v30, %v4862_v46 }
0x1703   :  { %2575 = vmatmul.mubr.f32.vlgmr.msra.gmra.mrb[16].mxu0 %v2494_v39 }
0x1704   :  { %4369 = vmatpush3.bf16.msra.mxu0 %v4876_v15  ;;  %4073 = vmatprep.mubr.msk.f32.mxu0 %vm4696_vm0, %v4695_v0  ;;  %v2500_v15 = vrot.slane %v2472_v13, %v4860_v45  ;;  %v3094_v23 = vmul.f32 %v4912_v49, %v3093_v26 }
0x1705   :  { %4083 = vmatprep.subr.mxu0 %v4695_v0 }
0x17d6   :  { %v2576_v55 = vpop.f32.mrb[16].mxu0 }
0x17d7   :  { %v2577_v62 = vadd.f32 %v2576_v55, %v2500_v15  ;;  %v2578_v47 = vpop.f32.mrb[17].mxu0 }
0x17d8   :  { %v2579_v53 = vadd.f32 %v2578_v47, %v2504_v29 }
0x17d9   :  { %v2581_v56 = vmax.f32 %v2577_v62, 0.0 }
0x17da   :  { %v2582_v41 = vmax.f32 %v2579_v53, 0.0 }
0x17dc   :  { %3963 = vmatprep.mubr.msk.f32.mxu1 %vm368_vm3, %v2582_v41 }
0x17dd   :  { %2655 = vmatmul.mubr.f32.vlgmr.msra.gmra.mrb[14].mxu1 %v2581_v56 }
0x17de   :  { %4372 = vmatpush3.bf16.msra.mxu1 %v4880_v18  ;;  %4080 = vmatprep.mubr.msk.f32.mxu1 %vm4696_vm0, %v4695_v0 }
0x17df   :  { %4373 = vmatprep.subr.bf16.mxu1 %v4698_v19 }
0x18b0   :  { %v2656_v45 = vpop.f32.mrb[14].mxu1 }
0x18b1   :  { %v2657_v10 = vadd.f32 %v3962_v12, %v2656_v45  ;;  %v2658_v44 = vpop.f32.mrb[15].mxu1 }
0x18b3   :  { %v2660_v58 = vsub.f32 0.0, %v2657_v10 }
0x18b5   :  { %v2661_v63 = vmul.f32 1.442695, %v2660_v58 }
0x18b7   :  { %4549 = vpow2.f32 %v2661_v63 }
0x18c1   :  { %v4550_v8 = vpop.eup %4549 }
0x18c2   :  { %v2663_v51 = vadd.f32 1.0, %v4550_v8 }
0x18c4   :  { %4551 = vrcp.f32 %v2663_v51 }
0x18ce   :  { %v4552_v57 = vpop.eup %4551 }
0x18cf   :  { %v2665_v35 = vmul.f32 4.8, %v4552_v57 }
0x18d1   :  { %v5384_v39 = vadd.f32 0.2, %v2665_v35 }
0x18d3   :  { %4074 = vmatmul.mubr.msk.f32.vlgmr.msra.gmra.mrb[18].mxu0 %vm218_vm2, %v5384_v39  ;;  %v3096_v24 = vmul.f32 %v3095_v48, %v5384_v39 }
0x18d4   :  { %4084 = vmatpush3.msra.mxu0 %v5093_v16  ;;  %4085 = vmatprep.mubr.msk.f32.mxu0 %vm4696_vm0, %v4695_v0 }
0x18d5   :  { %v3097_v42 = vsub.f32 %v3096_v24, %v3094_v23  ;;  %4095 = vmatprep.subr.mxu0 %v4695_v0 }
0x18d7   :  { %4081 = vmatmul.mubr.msk.f32.vlgmr.msra.gmra.mrb[16].mxu1 %vm218_vm2, %v3097_v42 }
0x18d8   :  { %4375 = vmatpush3.bf16.msra.mxu1 %v4880_v18  ;;  %4092 = vmatprep.mubr.msk.f32.mxu1 %vm4696_vm0, %v4695_v0 }
0x18d9   :  { %4376 = vmatprep.subr.bf16.mxu1 %v4698_v19 }
0x19a6   :  { %v5399_v27 = vpop.f32.mrb[18].mxu0 }
0x19a7   :  { %4553 = vrcp.f32 %v5399_v27  ;;  %v4075_v50 = vpop.f32.mrb[19].mxu0 }
0x19aa   :  { %v5402_v60 = vpop.f32.mrb[16].mxu1 }
0x19ab   :  { %v4082_v13 = vpop.f32.mrb[17].mxu1 }
0x19b1   :  { %v5404_v15 = vpop.eup %4553 }
0x19b2   :  { %2783 = vrot.lane.b32.xlu1 %v5404_v15, %s4701_s0  ;;  %2743 = vrot.lane.b32.xlu0 %v5404_v15, %s4690_s14 }
0x19b6   :  { %2803 = vrot.lane.b32.xlu1 %v5404_v15, %s4702_s9  ;;  %2763 = vrot.lane.b32.xlu0 %v5404_v15, %s4693_s27 }
0x19ba   :  { %2843 = vrot.lane.b32.xlu1 %v5404_v15, %s4704_s11  ;;  %2823 = vrot.lane.b32.xlu0 %v5404_v15, %s4703_s10 }
0x19be   :  { %2863 = vrot.lane.b32.xlu1 %v5404_v15, %s4705_s12 }
0x1a24   :  { %v2784_v29 = vpop.permute.xlu1 %2783  ;;  %v2744_v55 = vpop.permute.xlu0 %2743 }
0x1a25   :  { %v2746_v62 = vmul.f32 %v2744_v55, %v5399_v27  ;;  %v2786_v56 = vmul.f32 %v2784_v29, %v5399_v27 }
0x1a27   :  { %2749 = vperm.xlu0 %4512, %v2746_v62  }
0x1a28   :  { %v2804_v47 = vpop.permute.xlu1 %2803  ;;  %v2764_v53 = vpop.permute.xlu0 %2763 }
0x1a29   :  { %v2766_v41 = vmul.f32 %v2764_v53, %v5399_v27  ;;  %v2806_v45 = vmul.f32 %v2804_v47, %v5399_v27 }
0x1a2b   :  { %4514 = vset.pattern.permute.xlu0 %v4700_v59  ;;  %2769 = vperm.xlu1 %4513, %v2766_v41   ;;  %v3171_v41 = vmul.f32 %v5404_v15, %v5402_v60 }
0x1a2c   :  { %v2844_v12 = vpop.permute.xlu1 %2843  ;;  %2789 = vperm.xlu0 %4514, %v2786_v56   ;;  %v2824_v44 = vpop.permute.xlu0 %2823 }
0x1a2d   :  { %v2846_v10 = vmul.f32 %v2844_v12, %v5399_v27  ;;  %v2826_v43 = vmul.f32 %v2824_v44, %v5399_v27 }
0x1a2f   :  { %4515 = vset.pattern.permute.xlu1 %v4708_v20 }
0x1a30   :  { %4517 = vset.pattern.permute.xlu0 %v4707_v17  ;;  %2809 = vperm.xlu1 %4515, %v2806_v45   ;;  %v2864_v58 = vpop.permute.xlu1 %2863 }
0x1a31   :  { %2849 = vperm.xlu0 %4517, %v2846_v10   ;;  %v2866_v59 = vmul.f32 %v2864_v58, %v5399_v27 }
0x1a34   :  { %4516 = vset.pattern.permute.xlu1 %v4709_v25 }
0x1a35   :  { %2829 = vperm.xlu1 %4516, %v2826_v43   ;;  %4520 = vset.pattern.permute.xlu0 %v4712_v54 }
0x1a39   :  { %4518 = vset.pattern.permute.xlu1 %v4710_v28 }
0x1a3a   :  { %2869 = vperm.xlu1 %4518, %v2866_v59  }
0x1a3e   :  { %4519 = vset.pattern.permute.xlu1 %v4711_v37 }
0x1aa6   :  { %v2750_v20 = vpop.permute.xlu0 %2749 }
0x1aa7   :  { %v2752_v17 = vmul.f32 %v2750_v20, %v5399_v27 }
0x1aa9   :  { %2754 = vrot.lane.b32.xlu1 %v2752_v17, %s4690_s14 }
0x1aaa   :  { %v2770_v63 = vpop.permute.xlu1 %2769 }
0x1aab   :  { %v2790_v52 = vpop.permute.xlu0 %2789  ;;  %v2772_v25 = vmul.f32 %v2770_v63, %v5399_v27 }
0x1aac   :  { %v2792_v61 = vmul.f32 %v2790_v52, %v5399_v27 }
0x1aad   :  { %2774 = vrot.lane.b32.xlu0 %v2772_v25, %s4693_s27 }
0x1aae   :  { %2794 = vrot.lane.b32.xlu1 %v2792_v61, %s4701_s0 }
0x1aaf   :  { %v2810_v34 = vpop.permute.xlu1 %2809 }
0x1ab0   :  { %v2812_v28 = vmul.f32 %v2810_v34, %v5399_v27  ;;  %v2850_v8 = vpop.permute.xlu0 %2849 }
0x1ab1   :  { %v2852_v38 = vmul.f32 %v2850_v8, %v5399_v27 }
0x1ab2   :  { %2814 = vrot.lane.b32.xlu0 %v2812_v28, %s4702_s9 }
0x1ab4   :  { %v2830_v51 = vpop.permute.xlu1 %2829 }
0x1ab5   :  { %v2832_v30 = vmul.f32 %v2830_v51, %v5399_v27 }
0x1ab6   :  { %2854 = vrot.lane.b32.xlu0 %v2852_v38, %s4704_s11 }
0x1ab7   :  { %2834 = vrot.lane.b32.xlu1 %v2832_v30, %s4703_s10 }
0x1ab9   :  { %v2870_v26 = vpop.permute.xlu1 %2869 }
0x1aba   :  { %v2872_v57 = vmul.f32 %v2870_v26, %v5399_v27 }
0x1abc   :  { %2874 = vrot.lane.b32.xlu0 %v2872_v57, %s4705_s12 }
0x1b1b   :  { %v2755_v35 = vpop.permute.xlu1 %2754 }
0x1b1c   :  { %v2757_v48 = vsub.f32 %v5399_v27, %v2755_v35 }
0x1b1e   :  { %2759 = vrot.lane.b32.xlu1 %v2757_v48, %s4697_s29 }
0x1b1f   :  { %v2775_v23 = vpop.permute.xlu0 %2774 }
0x1b20   :  { %v2777_v24 = vsub.f32 %v5399_v27, %v2775_v23  ;;  %v2795_v42 = vpop.permute.xlu1 %2794 }
0x1b21   :  { %v2797_v50 = vsub.f32 %v5399_v27, %v2795_v42 }
0x1b22   :  { %2779 = vrot.lane.b32.xlu1 %v2777_v24, %s4714_s2 }
0x1b23   :  { %2799 = vrot.lane.b32.xlu0 %v2797_v50, %s4713_s15 }
0x1b24   :  { %v2815_v13 = vpop.permute.xlu0 %2814 }
0x1b25   :  { %v2817_v29 = vsub.f32 %v5399_v27, %v2815_v13 }
0x1b27   :  { %2819 = vrot.lane.b32.xlu1 %v2817_v29, %s4715_s13 }
0x1b28   :  { %v2855_v55 = vpop.permute.xlu0 %2854 }
0x1b29   :  { %v2857_v62 = vsub.f32 %v5399_v27, %v2855_v55  ;;  %v2835_v47 = vpop.permute.xlu1 %2834 }
0x1b2a   :  { %v2837_v53 = vsub.f32 %v5399_v27, %v2835_v47 }
0x1b2b   :  { %2859 = vrot.lane.b32.xlu1 %v2857_v62, %s4716_s16 }
0x1b2c   :  { %2839 = vrot.lane.b32.xlu0 %v2837_v53, %s4717_s17 }
0x1b2e   :  { %v2875_v56 = vpop.permute.xlu0 %2874 }
0x1b2f   :  { %v2877_v12 = vsub.f32 %v5399_v27, %v2875_v56  ;;  %3174 = vperm.xlu1 %4519, %v3171_v41  }
0x1b31   :  { %2879 = vrot.lane.b32.xlu0 %v2877_v12, %s4718_s18 }
0x1b33   :  { %4521 = vset.pattern.permute.xlu1 %v4712_v54 }
0x1b90   :  { %v2760_v45 = vpop.permute.xlu1 %2759 }
0x1b91   :  { %v5467_v10 = vsel %vm117_vm5, %v2750_v20, %v2760_v45 }
0x1b92   :  { %4555 = vrcp.f32 %v5467_v10 }
0x1b94   :  { %v2780_v44 = vpop.permute.xlu1 %2779 }
0x1b95   :  { %v2800_v43 = vpop.permute.xlu0 %2799  ;;  %v2782_v17 = vsel %vm117_vm5, %v2770_v63, %v2780_v44 }
0x1b96   :  { %v2802_v25 = vsel %vm117_vm5, %v2790_v52, %v2800_v43 }
0x1b99   :  { %v2820_v58 = vpop.permute.xlu1 %2819 }
0x1b9a   :  { %v2822_v57 = vsel %vm117_vm5, %v2810_v34, %v2820_v58 }
0x1b9c   :  { %v5470_v59 = vpop.eup %4555 }
0x1b9d   :  { %v2885_v61 = vmul.f32 %v5470_v59, %v2782_v17  ;;  %v2894_v28 = vmul.f32 %v5470_v59, %v2802_v25  ;;  %v2860_v20 = vpop.permute.xlu1 %2859  ;;  %v2903_v63 = vmul.f32 %v5470_v59, %v2822_v57 }
0x1b9e   :  { %v2840_v38 = vpop.permute.xlu0 %2839  ;;  %v2862_v52 = vsel %vm117_vm5, %v2850_v8, %v2860_v20 }
0x1b9f   :  { %v2842_v30 = vsel %vm117_vm5, %v2830_v51, %v2840_v38  ;;  %2888 = vperm.xlu0 %4520, %v2885_v61   ;;  %2897 = vperm.xlu1 %4521, %v2894_v28   ;;  %v2921_v51 = vmul.f32 %v5470_v59, %v2862_v52 }
0x1ba0   :  { %v2912_v35 = vmul.f32 %v5470_v59, %v2842_v30 }
0x1ba3   :  { %2915 = vperm.xlu0 %4520, %v2912_v35   ;;  %v2880_v48 = vpop.permute.xlu0 %2879  ;;  %2906 = vperm.xlu1 %4521, %v2903_v63  }
0x1ba4   :  { %v2882_v23 = vsel %vm117_vm5, %v2870_v26, %v2880_v48 }
0x1ba5   :  { %v2930_v24 = vmul.f32 %v5470_v59, %v2882_v23 }
0x1ba7   :  { %2933 = vperm.xlu0 %4520, %v2930_v24   ;;  %2924 = vperm.xlu1 %4521, %v2921_v51  }
0x1bab   :  { %4522 = vset.pattern.permute.xlu0 %v4719_v6 }
0x1bae   :  { %v3175_v34 = vpop.permute.xlu1 %3174 }
0x1baf   :  { %v3177_v42 = vmul.f32 %v3175_v34, %v5399_v27 }
0x1bb1   :  { %v3178_v50 = vsub.f32 %v5402_v60, %v3177_v42 }
0x1bb3   :  { %v3179_v8 = vsel %vm117_vm5, %v3175_v34, %v3178_v50 }
0x1bb4   :  { %v3180_v13 = vmul.f32 %v5470_v59, %v3179_v8 }
0x1bb6   :  { %3183 = vperm.xlu1 %4521, %v3180_v13  }
0x1bba   :  { %4523 = vset.pattern.permute.xlu1 %v4719_v6 }
0x1c1e   :  { %v2889_v26 = vpop.permute.xlu0 %2888  ;;  %v2898_v29 = vpop.permute.xlu1 %2897 }
0x1c1f   :  { %v2891_v55 = vmul.f32 %v2889_v26, %v5467_v10  ;;  %v2900_v60 = vmul.f32 %v2898_v29, %v5467_v10 }
0x1c21   :  { %v2892_v62 = vsub.f32 %v2782_v17, %v2891_v55  ;;  %v2901_v45 = vsub.f32 %v2802_v25, %v2900_v60 }
0x1c22   :  { %v2907_v47 = vpop.permute.xlu1 %2906  ;;  %v2916_v41 = vpop.permute.xlu0 %2915 }
0x1c23   :  { %v5500_v53 = vsel %vm118_vm6, %v2889_v26, %v2892_v62  ;;  %v2909_v56 = vmul.f32 %v2907_v47, %v5467_v10  ;;  %v2918_v44 = vmul.f32 %v2916_v41, %v5467_v10  ;;  %v2902_v61 = vsel %vm118_vm6, %v2898_v29, %v2901_v45 }
0x1c24   :  { %4557 = vrcp.f32 %v5500_v53 }
0x1c25   :  { %v2910_v43 = vsub.f32 %v2822_v57, %v2909_v56  ;;  %v2919_v38 = vsub.f32 %v2842_v30, %v2918_v44 }
0x1c26   :  { %v2925_v12 = vpop.permute.xlu1 %2924  ;;  %v2934_v17 = vpop.permute.xlu0 %2933 }
0x1c27   :  { %v2927_v58 = vmul.f32 %v2925_v12, %v5467_v10  ;;  %v2911_v20 = vsel %vm118_vm6, %v2907_v47, %v2910_v43  ;;  %v2936_v35 = vmul.f32 %v2934_v17, %v5467_v10  ;;  %v2920_v57 = vsel %vm118_vm6, %v2916_v41, %v2919_v38 }
0x1c29   :  { %v2928_v63 = vsub.f32 %v2862_v52, %v2927_v58  ;;  %v2937_v51 = vsub.f32 %v2882_v23, %v2936_v35 }
0x1c2b   :  { %v2929_v24 = vsel %vm118_vm6, %v2925_v12, %v2928_v63  ;;  %v2938_v42 = vsel %vm118_vm6, %v2934_v17, %v2937_v51 }
0x1c2e   :  { %v5509_v28 = vpop.eup %4557 }
0x1c2f   :  { %v2941_v25 = vmul.f32 %v5509_v28, %v2902_v61  ;;  %v2950_v48 = vmul.f32 %v5509_v28, %v2911_v20  ;;  %v2959_v30 = vmul.f32 %v5509_v28, %v2920_v57  ;;  %v2968_v34 = vmul.f32 %v5509_v28, %v2929_v24 }
0x1c30   :  { %v2977_v13 = vmul.f32 %v5509_v28, %v2938_v42 }
0x1c31   :  { %2944 = vperm.xlu0 %4522, %v2941_v25   ;;  %2953 = vperm.xlu1 %4523, %v2950_v48  }
0x1c35   :  { %2962 = vperm.xlu1 %4523, %v2959_v30   ;;  %2971 = vperm.xlu0 %4522, %v2968_v34   ;;  %v3184_v52 = vpop.permute.xlu1 %3183 }
0x1c36   :  { %v3186_v50 = vmul.f32 %v3184_v52, %v5467_v10 }
0x1c38   :  { %v3187_v26 = vsub.f32 %v3179_v8, %v3186_v50 }
0x1c39   :  { %2980 = vperm.xlu1 %4523, %v2977_v13  }
0x1c3a   :  { %v3188_v23 = vsel %vm118_vm6, %v3184_v52, %v3187_v26 }
0x1c3b   :  { %v3189_v29 = vmul.f32 %v5509_v28, %v3188_v23 }
0x1c3d   :  { %3192 = vperm.xlu0 %4522, %v3189_v29   ;;  %4524 = vset.pattern.permute.xlu1 %v4720_v9 }
0x1c41   :  { %4525 = vset.pattern.permute.xlu0 %v4720_v9 }
0x1cb0   :  { %v2945_v55 = vpop.permute.xlu0 %2944  ;;  %v2954_v62 = vpop.permute.xlu1 %2953 }
0x1cb1   :  { %v2947_v47 = vmul.f32 %v2945_v55, %v5500_v53  ;;  %v2956_v56 = vmul.f32 %v2954_v62, %v5500_v53 }
0x1cb3   :  { %v2948_v60 = vsub.f32 %v2902_v61, %v2947_v47  ;;  %v2957_v44 = vsub.f32 %v2911_v20, %v2956_v56 }
0x1cb4   :  { %v2963_v8 = vpop.permute.xlu1 %2962  ;;  %v2972_v12 = vpop.permute.xlu0 %2971 }
0x1cb5   :  { %v5534_v41 = vsel %vm119_vm7, %v2945_v55, %v2948_v60  ;;  %v2965_v45 = vmul.f32 %v2963_v8, %v5500_v53  ;;  %v2974_v43 = vmul.f32 %v2972_v12, %v5500_v53  ;;  %v2958_v25 = vsel %vm119_vm7, %v2954_v62, %v2957_v44 }
0x1cb6   :  { %4559 = vrcp.f32 %v5534_v41 }
0x1cb7   :  { %v2966_v58 = vsub.f32 %v2920_v57, %v2965_v45  ;;  %v2975_v48 = vsub.f32 %v2929_v24, %v2974_v43 }
0x1cb8   :  { %v2981_v38 = vpop.permute.xlu1 %2980 }
0x1cb9   :  { %v2967_v51 = vsel %vm119_vm7, %v2963_v8, %v2966_v58  ;;  %v2983_v30 = vmul.f32 %v2981_v38, %v5500_v53  ;;  %v2976_v52 = vsel %vm119_vm7, %v2972_v12, %v2975_v48 }
0x1cbb   :  { %v2984_v50 = vsub.f32 %v2938_v42, %v2983_v30 }
0x1cbc   :  { %v3193_v17 = vpop.permute.xlu0 %3192 }
0x1cbd   :  { %v3195_v61 = vmul.f32 %v3193_v17, %v5500_v53  ;;  %v2985_v26 = vsel %vm119_vm7, %v2981_v38, %v2984_v50 }
0x1cbf   :  { %v3196_v35 = vsub.f32 %v3188_v23, %v3195_v61 }
0x1cc0   :  { %v5541_v63 = vpop.eup %4559 }
0x1cc1   :  { %v2988_v20 = vmul.f32 %v5541_v63, %v2958_v25  ;;  %v2997_v57 = vmul.f32 %v5541_v63, %v2967_v51  ;;  %v3197_v34 = vsel %vm119_vm7, %v3193_v17, %v3196_v35  ;;  %v3006_v24 = vmul.f32 %v5541_v63, %v2976_v52 }
0x1cc2   :  { %v3198_v13 = vmul.f32 %v5541_v63, %v3197_v34  ;;  %v3015_v23 = vmul.f32 %v5541_v63, %v2985_v26 }
0x1cc3   :  { %2991 = vperm.xlu1 %4524, %v2988_v20   ;;  %3000 = vperm.xlu0 %4525, %v2997_v57  }
0x1cc7   :  { %3009 = vperm.xlu1 %4524, %v3006_v24   ;;  %3201 = vperm.xlu0 %4525, %v3198_v13  }
0x1ccb   :  { %3018 = vperm.xlu1 %4524, %v3015_v23   ;;  %4527 = vset.pattern.permute.xlu0 %v4721_v11 }
0x1ccf   :  { %4526 = vset.pattern.permute.xlu1 %v4721_v11 }
0x1d42   :  { %v2992_v29 = vpop.permute.xlu1 %2991  ;;  %v3001_v47 = vpop.permute.xlu0 %3000 }
0x1d43   :  { %v2994_v55 = vmul.f32 %v2992_v29, %v5534_v41  ;;  %v3003_v8 = vmul.f32 %v3001_v47, %v5534_v41 }
0x1d45   :  { %v2995_v42 = vsub.f32 %v2958_v25, %v2994_v55  ;;  %v3004_v45 = vsub.f32 %v2967_v51, %v3003_v8 }
0x1d46   :  { %v3010_v62 = vpop.permute.xlu1 %3009  ;;  %v3202_v58 = vpop.permute.xlu0 %3201 }
0x1d47   :  { %v5564_v60 = vsel %vm120_vm8, %v2992_v29, %v2995_v42  ;;  %v3012_v56 = vmul.f32 %v3010_v62, %v5534_v41  ;;  %v3005_v38 = vsel %vm120_vm8, %v3001_v47, %v3004_v45  ;;  %v3204_v61 = vmul.f32 %v3202_v58, %v5534_v41 }
0x1d48   :  { %4561 = vrcp.f32 %v5564_v60 }
0x1d49   :  { %v3013_v44 = vsub.f32 %v2976_v52, %v3012_v56  ;;  %v3205_v51 = vsub.f32 %v3197_v34, %v3204_v61 }
0x1d4a   :  { %v3019_v12 = vpop.permute.xlu1 %3018 }
0x1d4b   :  { %v3021_v43 = vmul.f32 %v3019_v12, %v5534_v41  ;;  %v3014_v35 = vsel %vm120_vm8, %v3010_v62, %v3013_v44  ;;  %v3206_v52 = vsel %vm120_vm8, %v3202_v58, %v3205_v51 }
0x1d4d   :  { %v3022_v25 = vsub.f32 %v2985_v26, %v3021_v43 }
0x1d4f   :  { %v3023_v20 = vsel %vm120_vm8, %v3019_v12, %v3022_v25 }
0x1d52   :  { %v5570_v17 = vpop.eup %4561 }
0x1d53   :  { %v3035_v48 = vmul.f32 %v5570_v17, %v3014_v35  ;;  %v3026_v30 = vmul.f32 %v5570_v17, %v3005_v38  ;;  %v3044_v57 = vmul.f32 %v5570_v17, %v3023_v20  ;;  %v3207_v50 = vmul.f32 %v5570_v17, %v3206_v52 }
0x1d55   :  { %3029 = vperm.xlu1 %4526, %v3026_v30   ;;  %3038 = vperm.xlu0 %4527, %v3035_v48  }
0x1d59   :  { %3047 = vperm.xlu1 %4526, %v3044_v57   ;;  %4528 = vset.pattern.permute.xlu0 %v4722_v21 }
0x1d5d   :  { %3210 = vperm.xlu1 %4526, %v3207_v50  }
0x1d61   :  { %4529 = vset.pattern.permute.xlu1 %v4722_v21 }
0x1dd4   :  { %v3030_v24 = vpop.permute.xlu1 %3029  ;;  %v3039_v23 = vpop.permute.xlu0 %3038 }
0x1dd5   :  { %v3032_v13 = vmul.f32 %v3030_v24, %v5564_v60  ;;  %v3041_v55 = vmul.f32 %v3039_v23, %v5564_v60 }
0x1dd7   :  { %v3033_v34 = vsub.f32 %v3005_v38, %v3032_v13  ;;  %v3042_v47 = vsub.f32 %v3014_v35, %v3041_v55 }
0x1dd8   :  { %v3048_v26 = vpop.permute.xlu1 %3047 }
0x1dd9   :  { %v5590_v29 = vsel %vm121_vm9, %v3030_v24, %v3033_v34  ;;  %v3050_v42 = vmul.f32 %v3048_v26, %v5564_v60  ;;  %v3043_v45 = vsel %vm121_vm9, %v3039_v23, %v3042_v47 }
0x1dda   :  { %4563 = vrcp.f32 %v5590_v29 }
0x1ddb   :  { %v3051_v8 = vsub.f32 %v3023_v20, %v3050_v42 }
0x1ddc   :  { %v3211_v62 = vpop.permute.xlu1 %3210 }
0x1ddd   :  { %v3213_v56 = vmul.f32 %v3211_v62, %v5564_v60  ;;  %v3052_v44 = vsel %vm121_vm9, %v3048_v26, %v3051_v8 }
0x1ddf   :  { %v3214_v43 = vsub.f32 %v3206_v52, %v3213_v56 }
0x1de1   :  { %v3215_v61 = vsel %vm121_vm9, %v3211_v62, %v3214_v43 }
0x1de4   :  { %v5596_v12 = vpop.eup %4563 }
0x1de5   :  { %v3064_v58 = vmul.f32 %v5596_v12, %v3052_v44  ;;  %v3055_v38 = vmul.f32 %v5596_v12, %v3043_v45  ;;  %v3216_v35 = vmul.f32 %v5596_v12, %v3215_v61 }
0x1de7   :  { %3058 = vperm.xlu0 %4528, %v3055_v38   ;;  %3067 = vperm.xlu1 %4529, %v3064_v58  }
0x1deb   :  { %3219 = vperm.xlu1 %4529, %v3216_v35   ;;  %4530 = vset.pattern.permute.xlu0 %v4723_v32 }
0x1def   :  { %4531 = vset.pattern.permute.xlu1 %v4723_v32 }
0x1e66   :  { %v3059_v25 = vpop.permute.xlu0 %3058  ;;  %v3068_v48 = vpop.permute.xlu1 %3067 }
0x1e67   :  { %v3061_v30 = vmul.f32 %v3059_v25, %v5590_v29  ;;  %v3070_v52 = vmul.f32 %v3068_v48, %v5590_v29 }
0x1e69   :  { %v3062_v51 = vsub.f32 %v3043_v45, %v3061_v30  ;;  %v3071_v24 = vsub.f32 %v3052_v44, %v3070_v52 }
0x1e6a   :  { %v3220_v57 = vpop.permute.xlu1 %3219 }
0x1e6b   :  { %v5612_v20 = vsel %vm122_vm10, %v3059_v25, %v3062_v51  ;;  %v3222_v50 = vmul.f32 %v3220_v57, %v5590_v29  ;;  %v3072_v26 = vsel %vm122_vm10, %v3068_v48, %v3071_v24 }
0x1e6c   :  { %4565 = vrcp.f32 %v5612_v20 }
0x1e6d   :  { %v3223_v13 = vsub.f32 %v3215_v61, %v3222_v50 }
0x1e6f   :  { %v3224_v23 = vsel %vm122_vm10, %v3220_v57, %v3223_v13 }
0x1e76   :  { %v5617_v34 = vpop.eup %4565 }
0x1e77   :  { %v3075_v55 = vmul.f32 %v5617_v34, %v3072_v26  ;;  %v3225_v42 = vmul.f32 %v5617_v34, %v3224_v23 }
0x1e79   :  { %3078 = vperm.xlu0 %4530, %v3075_v55   ;;  %3228 = vperm.xlu1 %4531, %v3225_v42  }
0x1e7d   :  { %4532 = vset.pattern.permute.xlu1 %v4724_v31  ;;  %4533 = vset.pattern.permute.xlu0 %v4711_v37 }
0x1ef8   :  { %v3079_v62 = vpop.permute.xlu0 %3078  ;;  %v3229_v45 = vpop.permute.xlu1 %3228 }
0x1ef9   :  { %v3081_v47 = vmul.f32 %v3079_v62, %v5612_v20  ;;  %v3231_v44 = vmul.f32 %v3229_v45, %v5612_v20 }
0x1efb   :  { %v3082_v8 = vsub.f32 %v3072_v26, %v3081_v47  ;;  %v3232_v43 = vsub.f32 %v3224_v23, %v3231_v44 }
0x1efd   :  { %v5630_v56 = vsel %vm123_vm11, %v3079_v62, %v3082_v8  ;;  %v3233_v38 = vsel %vm123_vm11, %v3229_v45, %v3232_v43 }
0x1efe   :  { %4567 = vrcp.f32 %v5630_v56 }
0x1f08   :  { %v5634_v58 = vpop.eup %4567 }
0x1f09   :  { %v3234_v61 = vmul.f32 %v5634_v58, %v3233_v38 }
0x1f0b   :  { %3237 = vperm.xlu1 %4532, %v3234_v61  }
0x1f0f   :  { %4534 = vset.pattern.permute.xlu1 %v4712_v54 }
0x1f8a   :  { %v3238_v35 = vpop.permute.xlu1 %3237 }
0x1f8b   :  { %v3240_v25 = vmul.f32 %v3238_v35, %v5630_v56 }
0x1f8d   :  { %v3241_v48 = vsub.f32 %v3233_v38, %v3240_v25 }
0x1f8f   :  { %v3242_v30 = vsel %vm124_vm12, %v3238_v35, %v3241_v48 }
0x1f90   :  { %4086 = vmatmul.mubr.msk.f32.vlgmr.msra.gmra.mrb[20].mxu0 %vm128_vm1, %v3242_v30 }
0x1f91   :  { %4096 = vmatpush3.msra.mxu0 %v5093_v16  ;;  %4097 = vmatprep.mubr.msk.f32.mxu0 %vm4696_vm0, %v4695_v0 }
0x1f92   :  { %4107 = vmatprep.subr.mxu0 %v4695_v0 }
0x2063   :  { %v3312_v51 = vpop.f32.mrb[20].mxu0 }
0x2064   :  { %v3313_v57 = vadd.f32 %v3312_v51, %v4862_v46  ;;  %v4087_v52 = vpop.f32.mrb[21].mxu0 }
0x2066   :  { %v3316_v50 = vsub.f32 %v3313_v57, %v5378_v7 }
0x2068   :  { %v5651_v24 = vadd.f32 %v3316_v50, %v5341_v14 }
0x206a   :  { %v3318_v13 = vsub.f32 %v4885_v22, %v5651_v24 }
0x206c   :  { %v3319_v26 = vmax.f32 %v3318_v13, 0.0 }
0x206e   :  { %v3320_v23 = vsub.f32 %v4895_v33, %v3319_v26 }
0x2070   :  { %v3321_v55 = vmax.f32 %v3320_v23, 0.0 }
0x2072   :  { %v5657_v42 = vadd.f32 %v3321_v55, %v4899_v36 }
0x2074   :  { %v3323_v62 = vmul.f32 2.0, %v5657_v42 }
0x2076   :  { %v3324_v47 = vsub.f32 %v3323_v62, %v5651_v24 }
0x2078   :  { %v3325_v8 = vadd.f32 %v3324_v47, %v4839_v5  ;;  %v3327_v7 = vsub.f32 %v3324_v47, %v4862_v46 }
0x207a   :  { %v3326_v14 = vmul.f32 %v4912_v49, %v3325_v8  ;;  %v3328_v45 = vmul.f32 %v3327_v7, %v5384_v39 }
0x207c   :  { %v3329_v44 = vsub.f32 %v3328_v45, %v3326_v14 }
0x207e   :  { %4093 = vmatmul.mubr.msk.f32.vlgmr.msra.gmra.mrb[18].mxu1 %vm218_vm2, %v3329_v44 }
0x207f   :  { %4378 = vmatpush3.bf16.msra.mxu1 %v4880_v18  ;;  %4104 = vmatprep.mubr.msk.f32.mxu1 %vm4696_vm0, %v4695_v0 }
0x2080   :  { %4379 = vmatprep.subr.bf16.mxu1 %v4698_v19 }
0x2151   :  { %v3399_v43 = vpop.f32.mrb[18].mxu1 }
0x2152   :  { %v3403_v38 = vmul.f32 %v5404_v15, %v3399_v43  ;;  %v4094_v61 = vpop.f32.mrb[19].mxu1 }
0x2154   :  { %3406 = vperm.xlu0 %4533, %v3403_v38  }
0x2158   :  { %4536 = vset.pattern.permute.xlu0 %v4720_v9 }
0x21d3   :  { %v3407_v35 = vpop.permute.xlu0 %3406 }
0x21d4   :  { %v3409_v25 = vmul.f32 %v3407_v35, %v5399_v27 }
0x21d6   :  { %v3410_v48 = vsub.f32 %v3399_v43, %v3409_v25 }
0x21d8   :  { %v3411_v30 = vsel %vm117_vm5, %v3407_v35, %v3410_v48 }
0x21d9   :  { %v3412_v18 = vmul.f32 %v5470_v59, %v3411_v30 }
0x21db   :  { %3415 = vperm.xlu1 %4534, %v3412_v18  }
0x21df   :  { %4535 = vset.pattern.permute.xlu1 %v4719_v6 }
0x225a   :  { %v3416_v51 = vpop.permute.xlu1 %3415 }
0x225b   :  { %v3418_v57 = vmul.f32 %v3416_v51, %v5467_v10 }
0x225d   :  { %v3419_v52 = vsub.f32 %v3411_v30, %v3418_v57 }
0x225f   :  { %v3420_v50 = vsel %vm118_vm6, %v3416_v51, %v3419_v52 }
0x2260   :  { %v3421_v13 = vmul.f32 %v5509_v28, %v3420_v50 }
0x2262   :  { %3424 = vperm.xlu1 %4535, %v3421_v13  }
0x2266   :  { %4537 = vset.pattern.permute.xlu1 %v4721_v11 }
0x22e1   :  { %v3425_v26 = vpop.permute.xlu1 %3424 }
0x22e2   :  { %v3427_v23 = vmul.f32 %v3425_v26, %v5500_v53 }
0x22e4   :  { %v3428_v55 = vsub.f32 %v3420_v50, %v3427_v23 }
0x22e6   :  { %v3429_v62 = vsel %vm119_vm7, %v3425_v26, %v3428_v55 }
0x22e7   :  { %v3430_v47 = vmul.f32 %v5541_v63, %v3429_v62 }
0x22e9   :  { %3433 = vperm.xlu0 %4536, %v3430_v47  }
0x22ed   :  { %4539 = vset.pattern.permute.xlu0 %v4723_v32 }
0x2368   :  { %v3434_v8 = vpop.permute.xlu0 %3433 }
0x2369   :  { %v3436_v7 = vmul.f32 %v3434_v8, %v5534_v41 }
0x236b   :  { %v3437_v14 = vsub.f32 %v3429_v62, %v3436_v7 }
0x236d   :  { %v3438_v45 = vsel %vm120_vm8, %v3434_v8, %v3437_v14 }
0x236e   :  { %v3439_v44 = vmul.f32 %v5570_v17, %v3438_v45 }
0x2370   :  { %3442 = vperm.xlu1 %4537, %v3439_v44  }
0x2374   :  { %4538 = vset.pattern.permute.xlu1 %v4722_v21 }
0x23ef   :  { %v3443_v43 = vpop.permute.xlu1 %3442 }
0x23f0   :  { %v3445_v38 = vmul.f32 %v3443_v43, %v5564_v60 }
0x23f2   :  { %v3446_v61 = vsub.f32 %v3438_v45, %v3445_v38 }
0x23f4   :  { %v3447_v35 = vsel %vm121_vm9, %v3443_v43, %v3446_v61 }
0x23f5   :  { %v3448_v25 = vmul.f32 %v5596_v12, %v3447_v35 }
0x23f7   :  { %3451 = vperm.xlu1 %4538, %v3448_v25  }
0x23fb   :  { %4540 = vset.pattern.permute.xlu1 %v4724_v31 }
0x2476   :  { %v3452_v48 = vpop.permute.xlu1 %3451 }
0x2477   :  { %v3454_v30 = vmul.f32 %v3452_v48, %v5590_v29 }
0x2479   :  { %v3455_v18 = vsub.f32 %v3447_v35, %v3454_v30 }
0x247b   :  { %v3456_v51 = vsel %vm122_vm10, %v3452_v48, %v3455_v18 }
0x247c   :  { %v3457_v57 = vmul.f32 %v5617_v34, %v3456_v51 }
0x247e   :  { %3460 = vperm.xlu0 %4539, %v3457_v57  }
0x2482   :  { %4542 = vset.pattern.permute.xlu0 %v4712_v54 }
0x24fd   :  { %v3461_v52 = vpop.permute.xlu0 %3460 }
0x24fe   :  { %v3463_v50 = vmul.f32 %v3461_v52, %v5612_v20 }
0x2500   :  { %v3464_v13 = vsub.f32 %v3456_v51, %v3463_v50 }
0x2502   :  { %v3465_v26 = vsel %vm123_vm11, %v3461_v52, %v3464_v13 }
0x2503   :  { %v3466_v23 = vmul.f32 %v5634_v58, %v3465_v26 }
0x2505   :  { %3469 = vperm.xlu1 %4540, %v3466_v23  }
0x2509   :  { %4541 = vset.pattern.permute.xlu1 %v4711_v37 }
0x2584   :  { %v3470_v55 = vpop.permute.xlu1 %3469 }
0x2585   :  { %v3472_v62 = vmul.f32 %v3470_v55, %v5630_v56 }
0x2587   :  { %v3473_v47 = vsub.f32 %v3465_v26, %v3472_v62 }
0x2589   :  { %v3474_v8 = vsel %vm124_vm12, %v3470_v55, %v3473_v47 }
0x258a   :  { %4098 = vmatmul.mubr.msk.f32.vlgmr.msra.gmra.mrb[22].mxu0 %vm128_vm1, %v3474_v8 }
0x258b   :  { %4108 = vmatpush3.msra.mxu0 %v5093_v16  ;;  %4109 = vmatprep.mubr.msk.f32.mxu0 %vm4696_vm0, %v4695_v0 }
0x265d   :  { %v3544_v54 = vpop.f32.mrb[22].mxu0 }
0x265e   :  { %v3545_v7 = vadd.f32 %v3544_v54, %v4862_v46  ;;  %v4099_v14 = vpop.f32.mrb[23].mxu0 }
0x2660   :  { %v3548_v37 = vsub.f32 %v3545_v7, %v5657_v42 }
0x2662   :  { %v5717_v45 = vadd.f32 %v3548_v37, %v5651_v24 }
0x2664   :  { %v3550_v44 = vsub.f32 %v4885_v22, %v5717_v45 }
0x2666   :  { %v3551_v43 = vmax.f32 %v3550_v44, 0.0 }
0x2668   :  { %v3552_v38 = vsub.f32 %v4895_v33, %v3551_v43 }
0x266a   :  { %v3553_v61 = vmax.f32 %v3552_v38, 0.0 }
0x266c   :  { %v5723_v16 = vadd.f32 %v3553_v61, %v4899_v36 }
0x266e   :  { %v3555_v35 = vmul.f32 2.0, %v5723_v16 }
0x2670   :  { %v3556_v25 = vsub.f32 %v3555_v35, %v5717_v45  ;;  %v4383_v35 = vpack.c.bf16 %v4830_v2, %v4828_v1 }
0x2672   :  { %v3559_v48 = vsub.f32 %v3556_v25, %v4862_v46  ;;  %v3557_v42 = vadd.f32 %v3556_v25, %v4839_v5 }
0x2674   :  { %v3558_v24 = vmul.f32 %v4912_v49, %v3557_v42  ;;  %v3560_v30 = vmul.f32 %v3559_v48, %v5384_v39 }
0x2676   :  { %v3561_v22 = vsub.f32 %v3560_v30, %v3558_v24 }
0x2678   :  { %4105 = vmatmul.mubr.msk.f32.vlgmr.msra.gmra.mrb[20].mxu1 %vm218_vm2, %v3561_v22 }
0x2679   :  { %4116 = vmatprep.mubr.msk.f32.mxu1 %vm4696_vm0, %v4695_v0 }
0x274b   :  { %v3631_v33 = vpop.f32.mrb[20].mxu1 }
0x274c   :  { %v3635_v36 = vmul.f32 %v5404_v15, %v3631_v33  ;;  %v4106_v18 = vpop.f32.mrb[21].mxu1 }
0x274e   :  { %3638 = vperm.xlu1 %4541, %v3635_v36  }
0x2752   :  { %4543 = vset.pattern.permute.xlu1 %v4719_v6 }
0x27cd   :  { %v3639_v51 = vpop.permute.xlu1 %3638 }
0x27ce   :  { %v3641_v5 = vmul.f32 %v3639_v51, %v5399_v27 }
0x27d0   :  { %v3642_v57 = vsub.f32 %v3631_v33, %v3641_v5 }
0x27d2   :  { %v3643_v49 = vsel %vm117_vm5, %v3639_v51, %v3642_v57 }
0x27d3   :  { %v3644_v39 = vmul.f32 %v5470_v59, %v3643_v49 }
0x27d5   :  { %3647 = vperm.xlu0 %4542, %v3644_v39  }
0x27d9   :  { %4545 = vset.pattern.permute.xlu0 %v4721_v11 }
0x2854   :  { %v3648_v52 = vpop.permute.xlu0 %3647 }
0x2855   :  { %v3650_v50 = vmul.f32 %v3648_v52, %v5467_v10 }
0x2857   :  { %v3651_v15 = vsub.f32 %v3643_v49, %v3650_v50 }
0x2859   :  { %v3652_v13 = vsel %vm118_vm6, %v3648_v52, %v3651_v15 }
0x285a   :  { %v3653_v6 = vmul.f32 %v5509_v28, %v3652_v13 }
0x285c   :  { %3656 = vperm.xlu1 %4543, %v3653_v6  }
0x2860   :  { %4544 = vset.pattern.permute.xlu1 %v4720_v9 }
0x28db   :  { %v3657_v27 = vpop.permute.xlu1 %3656 }
0x28dc   :  { %v3659_v26 = vmul.f32 %v3657_v27, %v5500_v53 }
0x28de   :  { %v3660_v23 = vsub.f32 %v3652_v13, %v3659_v26 }
0x28e0   :  { %v3661_v59 = vsel %vm119_vm7, %v3657_v27, %v3660_v23 }
0x28e1   :  { %v3662_v11 = vmul.f32 %v5541_v63, %v3661_v59 }
0x28e3   :  { %3665 = vperm.xlu1 %4544, %v3662_v11  }
0x28e7   :  { %4546 = vset.pattern.permute.xlu1 %v4722_v21 }
0x2962   :  { %v3666_v10 = vpop.permute.xlu1 %3665 }
0x2963   :  { %v3668_v55 = vmul.f32 %v3666_v10, %v5534_v41 }
0x2965   :  { %v3669_v62 = vsub.f32 %v3661_v59, %v3668_v55 }
0x2967   :  { %v3670_v28 = vsel %vm120_vm8, %v3666_v10, %v3669_v62 }
0x2968   :  { %v3671_v9 = vmul.f32 %v5570_v17, %v3670_v28 }
0x296a   :  { %3674 = vperm.xlu0 %4545, %v3671_v9  }
0x296e   :  { %4548 = vset.pattern.permute.xlu0 %v4724_v31 }
0x29e9   :  { %v3675_v53 = vpop.permute.xlu0 %3674 }
0x29ea   :  { %v3677_v47 = vmul.f32 %v3675_v53, %v5564_v60 }
0x29ec   :  { %v3678_v8 = vsub.f32 %v3670_v28, %v3677_v47 }
0x29ee   :  { %v3679_v63 = vsel %vm121_vm9, %v3675_v53, %v3678_v8 }
0x29ef   :  { %v3680_v21 = vmul.f32 %v5596_v12, %v3679_v63 }
0x29f1   :  { %3683 = vperm.xlu1 %4546, %v3680_v21  }
0x29f5   :  { %4547 = vset.pattern.permute.xlu1 %v4723_v32 }
0x2a70   :  { %v3684_v41 = vpop.permute.xlu1 %3683 }
0x2a71   :  { %v3686_v54 = vmul.f32 %v3684_v41, %v5590_v29 }
0x2a73   :  { %v3687_v7 = vsub.f32 %v3679_v63, %v3686_v54 }
0x2a75   :  { %v3688_v17 = vsel %vm122_vm10, %v3684_v41, %v3687_v7 }
0x2a76   :  { %v3689_v31 = vmul.f32 %v5617_v34, %v3688_v17  ;;  %v4380_v34 = vpack.c.bf16 %v4834_v4, %v4832_v3 }
0x2a78   :  { %3692 = vperm.xlu1 %4547, %v3689_v31   ;;  %4381 = vmatpush3.bf16.msra.mxu1 %v4380_v34 }
0x2a79   :  { %4382 = vmatprep.subr.bf16.mxu1 %v4698_v19 }
0x2af7   :  { %v3693_v60 = vpop.permute.xlu1 %3692 }
0x2af8   :  { %v3695_v14 = vmul.f32 %v3693_v60, %v5612_v20 }
0x2afa   :  { %v3696_v37 = vsub.f32 %v3688_v17, %v3695_v14 }
0x2afc   :  { %v3697_v12 = vsel %vm123_vm11, %v3693_v60, %v3696_v37 }
0x2afd   :  { %v3698_v44 = vmul.f32 %v5634_v58, %v3697_v12 }
0x2aff   :  { %3701 = vperm.xlu0 %4548, %v3698_v44  }
0x2b7e   :  { %v3702_v32 = vpop.permute.xlu0 %3701 }
0x2b7f   :  { %v3704_v29 = vmul.f32 %v3702_v32, %v5630_v56 }
0x2b81   :  { %v3705_v43 = vsub.f32 %v3697_v12, %v3704_v29 }
0x2b83   :  { %v3706_v38 = vsel %vm124_vm12, %v3702_v32, %v3705_v43 }
0x2b84   :  { %4110 = vmatmul.mubr.msk.f32.vlgmr.msra.gmra.mrb[24].mxu0 %vm128_vm1, %v3706_v38 }
0x2c57   :  { %v3776_v20 = vpop.f32.mrb[24].mxu0 }
0x2c58   :  { %v3777_v61 = vadd.f32 %v3776_v20, %v4862_v46  ;;  %v4111_v58 = vpop.f32.mrb[25].mxu0 }
0x2c5a   :  { %v3780_v56 = vsub.f32 %v3777_v61, %v5723_v16 }
0x2c5c   :  { %4117 = vmatmul.mubr.msk.f32.vlgmr.msra.gmra.mrb[22].mxu1 %vm218_vm2, %v3780_v56  ;;  %v3781_v3 = vadd.f32 %v3780_v56, %v5717_v45 }
0x2c5d   :  { %4384 = vmatpush3.bf16.msra.mxu1 %v4383_v35  ;;  %4123 = vmatprep.mubr.msk.f32.mxu1 %vm4696_vm0, %v4695_v0 }
0x2c64   :  { %4124 = vmatmul.mubr.msk.f32.vlgmr.msra.gmra.mrb[22].mxu1 %vm218_vm2, %v3781_v3 }
0x2d37   :  { %v3924_v4 = vpop.f32.mrb[22].mxu1 }
0x2d38   :  { %3928 = vst [vmem:[%s5795_s7] sm:$0xff] %v3924_v4  ;;  %v4125_v19 = vpop.f32.mrb[23].mxu1 }
0x2d39   :  { %3933 = vsyncpa [#allocation5], 1 }
0x2d3a   :  { %3934 = vsyncpa [#allocation7], 1 }
0x2d3b   :  { %3935 = vsyncpa [#allocation10], 1 }
0x2d3c   :  { %3936 = vsyncmov [#allocation3] }
0x2d3f   :  { %s3937_s27 = vpop.sfrf %3936 }
0x2d40   :  { %p3973_p12 = scmp.ne.s32.totalorder %s3937_s27, 0 }
0x2d42   :  { %3941 = shalt.err (%p3973_p12)  }

</bundles_post_ra>
